<compile_context>
chip_gen: v6e
topology: v6e:2x2x1
jax: 0.10.0
libtpu: 0.0.40
codegen_flags: <defaults>
</compile_context>

<pallas_src>
import math

import jax
import jax.numpy as jnp
import numpy as np
from jax.experimental import pallas as pl
from jax.experimental.pallas import tpu as pltpu

# ----------------------------- config -----------------------------
BATCH = 2
SEQ = 8
INPUT_SIZE = 8      # var_length; must equal OUTPUT_SIZE (pred feeds back as next input)
OUTPUT_SIZE = 8
HIDDEN = 32
NUM_LAYERS = 2
DROPOUT = 0.0       # TODO(synk): nn.LSTM dropout only applies in training mode; inference = identity


# ------------------------- pallas kernel ---------------------------
def make_fused_kernel(L, T, B, H, I, O):
    """Fused encoder + feedback-decoder autoencoder kernel (single invocation).

    Ref order (after x): enc layer0 (Wx, Wh, b), enc layers 1..L-1 (Wx, Wh, b),
    dec layer0 (Wh, b, Wfused, bfused), dec layers 1..L-1 (Wx, Wh, b),
    fc_wT, fc_b, out.
    All gate weights/biases arrive with i/f/o columns pre-scaled by 0.5.
    """
    H4 = 4 * H

    def kernel(*refs):
        idx = 0
        x_ref = refs[idx]; idx += 1                       # (T*B, I) time-major input
        enc0_Wx, enc0_Wh, enc0_b = refs[idx], refs[idx + 1], refs[idx + 2]; idx += 3
        enc_rest = []
        for _ in range(L - 1):
            enc_rest.append((refs[idx], refs[idx + 1], refs[idx + 2])); idx += 3
        dec0_Wh, dec0_b, dec0_Wf, dec0_bf = (refs[idx], refs[idx + 1],
                                             refs[idx + 2], refs[idx + 3]); idx += 4
        dec_rest = []
        for _ in range(L - 1):
            dec_rest.append((refs[idx], refs[idx + 1], refs[idx + 2])); idx += 3
        fc_w_ref, fc_b_ref = refs[idx], refs[idx + 1]; idx += 2
        out_ref = refs[idx]                               # (B, T*O) lane-flattened output

        def gates(z, c_prev):
            # i/f/o pre-activation columns are pre-scaled by 0.5 offline, so
            # sigmoid(x) = 0.5*tanh(x/2) + 0.5 -> a single tanh over the full
            # (B, 4H) vreg covers i/f/g/o (2 EUP pushes/cell total).
            zt = jnp.tanh(z)
            i_g = zt[:, 0:H] * 0.5 + 0.5
            f_g = zt[:, H:2 * H] * 0.5 + 0.5
            g_g = zt[:, 2 * H:3 * H]
            o_g = zt[:, 3 * H:4 * H] * 0.5 + 0.5
            c_new = f_g * c_prev + i_g * g_g
            h_new = o_g * jnp.tanh(c_new)
            return h_new, c_new

        # ---- Hoisted bias broadcasts (one broadcast_in_dim each, not 32).
        enc_rest_b = [jnp.broadcast_to(b[...], (B, H4)) for (_, _, b) in enc_rest]
        dec0_b_b = jnp.broadcast_to(dec0_b[...], (B, H4))      # step-0 (zero-input) bias
        dec0_bf_b = jnp.broadcast_to(dec0_bf[...], (B, H4))    # fused feedback bias
        dec_rest_b = [jnp.broadcast_to(b[...], (B, H4)) for (_, _, b) in dec_rest]
        fc_b_b = jnp.broadcast_to(fc_b_ref[...], (B, O))

        # ---- Encoder layer-0 input pre-activations for ALL T in one MXU pass
        # (off the recurrence chain; bias folded in here).
        zx_all = (jnp.dot(x_ref[...], enc0_Wx[...], preferred_element_type=jnp.float32)
                  + jnp.broadcast_to(enc0_b[...], (T * B, H4)))

        h = [jnp.zeros((B, H), jnp.float32) for _ in range(L)]
        c = [jnp.zeros((B, H), jnp.float32) for _ in range(L)]

        # ----- Encoder: consume the input sequence (fully unrolled, static T).
        for t in range(T):
            z0 = zx_all[t * B:(t + 1) * B, :] + jnp.dot(
                h[0], enc0_Wh[...], preferred_element_type=jnp.float32)
            h[0], c[0] = gates(z0, c[0])
            inp = h[0]
            for l in range(1, L):
                Wx, Wh, _ = enc_rest[l - 1]
                z = (jnp.dot(inp, Wx[...], preferred_element_type=jnp.float32)
                     + jnp.dot(h[l], Wh[...], preferred_element_type=jnp.float32)
                     + enc_rest_b[l - 1])
                h[l], c[l] = gates(z, c[l])
                inp = h[l]

        # ----- Decoder: FC head folded into layer-0's input weights, so the
        # feedback chain is h_top -> z0 directly (no FC matmul, no concat).
        h_top = h[L - 1]
        for s in range(T):
            if s == 0:
                # First input is torch.zeros -> no input-matmul contribution.
                z0 = jnp.dot(h[0], dec0_Wh[...],
                             preferred_element_type=jnp.float32) + dec0_b_b
            else:
                z0 = (jnp.dot(h_top, dec0_Wf[...], preferred_element_type=jnp.float32)
                      + jnp.dot(h[0], dec0_Wh[...], preferred_element_type=jnp.float32)
                      + dec0_bf_b)
            h[0], c[0] = gates(z0, c[0])
            inp = h[0]
            for l in range(1, L):
                Wx, Wh, _ = dec_rest[l - 1]
                z = (jnp.dot(inp, Wx[...], preferred_element_type=jnp.float32)
                     + jnp.dot(h[l], Wh[...], preferred_element_type=jnp.float32)
                     + dec_rest_b[l - 1])
                h[l], c[l] = gates(z, c[l])
                inp = h[l]
            h_top = h[L - 1]

            # Visible prediction: off the recurrence chain; store straight to the
            # time-reversed (inv_idx) lane slice of the output.
            pred = jnp.dot(h_top, fc_w_ref[...],
                           preferred_element_type=jnp.float32) + fc_b_b
            out_ref[:, (T - 1 - s) * O:(T - s) * O] = pred

    return kernel


# --------------------- offline weight preparation -------------------
def prepare_params(enc_raw, dec_raw, fc_w, fc_b, H):
    """Pre-transpose, pre-scale (sigmoid-via-tanh) and pre-fuse (FC into decoder
    layer-0) the PyTorch-style LSTM parameters. Done offline, zero runtime cost.

    enc_raw/dec_raw: list per layer of (w_ih (4H,din), w_hh (4H,H), b_ih, b_hh).
    Returns a flat tuple in the kernel's ref order (x excluded).
    """
    # Columns 0:2H (i, f) and 3H:4H (o) scaled by 0.5; g columns untouched.
    scale = jnp.concatenate([jnp.full((2 * H,), 0.5, jnp.float32),
                             jnp.ones((H,), jnp.float32),
                             jnp.full((H,), 0.5, jnp.float32)])

    def prep_layer(w_ih, w_hh, b_ih, b_hh):
        Wx = w_ih.T * scale[None, :]            # (din, 4H)
        Wh = w_hh.T * scale[None, :]            # (H,   4H)
        b = ((b_ih + b_hh) * scale)[None, :]    # (1,   4H)
        return Wx, Wh, b

    fc_wT = fc_w.T.astype(jnp.float32)          # (H, O)
    fc_b2 = fc_b[None, :].astype(jnp.float32)   # (1, O)

    params = []
    # Encoder.
    for layer in enc_raw:
        Wx, Wh, b = prep_layer(*layer)
        params += [Wx, Wh, b]
    # Decoder layer 0: fuse the FC head into the input weights.
    Wx_d0, Wh_d0, b_d0 = prep_layer(*dec_raw[0])
    Wf = fc_wT @ Wx_d0                          # (H, 4H)
    bf = b_d0 + fc_b2 @ Wx_d0                   # (1, 4H)
    params += [Wh_d0, b_d0, Wf, bf]
    # Decoder layers 1..L-1.
    for layer in dec_raw[1:]:
        Wx, Wh, b = prep_layer(*layer)
        params += [Wx, Wh, b]
    params += [fc_wT, fc_b2]
    return tuple(params)


# --------------------------- wrapper -------------------------------
def lstm_autoencoder_forward(x, params, L):
    """x: (B, T, input_size) float32, batch_first like the PyTorch module.
    params: output of prepare_params (flat tuple of pre-processed weights)."""
    B, T, I = x.shape
    fc_wT = params[-2]
    H, O = fc_wT.shape

    # Time-major (T*B, I) view so the encoder layer-0 pre-activations for all T
    # are a single contiguous MXU pass in the kernel (layout plumbing only).
    x_tm = jnp.transpose(x, (1, 0, 2)).reshape(T * B, I)

    flat = [x_tm, *params]
    out2d = pl.pallas_call(
        make_fused_kernel(L, T, B, H, I, O),
        in_specs=[pl.BlockSpec(memory_space=pltpu.MemorySpace.VMEM) for _ in flat],
        out_specs=pl.BlockSpec(memory_space=pltpu.MemorySpace.VMEM),
        out_shape=jax.ShapeDtypeStruct((B, T * O), jnp.float32),
        # TODO(synk): for large-batch deployments add grid=(num_batch_tiles,)
        # with dimension_semantics=("parallel",) to use v7x's second TensorCore.
    )(*flat)
    return out2d.reshape(B, T, O)               # contiguous reshape = bitcast


# ---------------------- pure-JAX reference -------------------------
def _cell_ref(x, h, c, w_ih, w_hh, b_ih, b_hh, H):
    z = x @ w_ih.T + h @ w_hh.T + b_ih + b_hh
    i = jax.nn.sigmoid(z[:, 0:H])
    f = jax.nn.sigmoid(z[:, H:2 * H])
    g = jnp.tanh(z[:, 2 * H:3 * H])
    o = jax.nn.sigmoid(z[:, 3 * H:4 * H])
    c2 = f * c + i * g
    return o * jnp.tanh(c2), c2


def reference_forward(x, enc_raw, dec_raw, fc_w, fc_b, L, H):
    B, T, I = x.shape
    h = [jnp.zeros((B, H), jnp.float32) for _ in range(L)]
    c = [jnp.zeros((B, H), jnp.float32) for _ in range(L)]
    for t in range(T):
        inp = x[:, t, :]
        for l in range(L):
            h[l], c[l] = _cell_ref(inp, h[l], c[l], *enc_raw[l], H)
            inp = h[l]
    temp = jnp.zeros((B, I), jnp.float32)
    outs = []
    for _ in range(T):
        inp = temp
        for l in range(L):
            h[l], c[l] = _cell_ref(inp, h[l], c[l], *dec_raw[l], H)
            inp = h[l]
        pred = inp @ fc_w.T + fc_b
        temp = pred
        outs.append(pred)
    rec = jnp.stack(outs, axis=1)
    return rec[:, ::-1, :]


# ------------------------------ main -------------------------------
def _make_raw_lstm_params(key, L, din0, H):
    """PyTorch-style uniform(-1/sqrt(H), 1/sqrt(H)) raw LSTM parameters."""
    k = 1.0 / math.sqrt(H)
    params = []
    din = din0
    for _ in range(L):
        key, k1, k2, k3, k4 = jax.random.split(key, 5)
        w_ih = jax.random.uniform(k1, (4 * H, din), jnp.float32, -k, k)
        w_hh = jax.random.uniform(k2, (4 * H, H), jnp.float32, -k, k)
        b_ih = jax.random.uniform(k3, (4 * H,), jnp.float32, -k, k)
        b_hh = jax.random.uniform(k4, (4 * H,), jnp.float32, -k, k)
        params.append((w_ih, w_hh, b_ih, b_hh))
        din = H
    return key, params


if __name__ == "__main__":
    assert INPUT_SIZE == OUTPUT_SIZE, "decoder feeds its prediction back as the next input"
    key = jax.random.PRNGKey(0)

    key, enc_raw = _make_raw_lstm_params(key, NUM_LAYERS, INPUT_SIZE, HIDDEN)
    key, dec_raw = _make_raw_lstm_params(key, NUM_LAYERS, INPUT_SIZE, HIDDEN)
    key, kfc1, kfc2, kx = jax.random.split(key, 4)
    kf = 1.0 / math.sqrt(HIDDEN)
    fc_w = jax.random.uniform(kfc1, (OUTPUT_SIZE, HIDDEN), jnp.float32, -kf, kf)
    fc_b = jax.random.uniform(kfc2, (OUTPUT_SIZE,), jnp.float32, -kf, kf)

    x = jax.random.normal(kx, (BATCH, SEQ, INPUT_SIZE), jnp.float32)

    # Offline weight pre-composition (transpose, gate pre-scale, FC fusion).
    params = prepare_params(enc_raw, dec_raw, fc_w, fc_b, HIDDEN)

    fwd = jax.jit(lstm_autoencoder_forward, static_argnums=(2,))
    out = jax.block_until_ready(fwd(x, params, NUM_LAYERS))

    ref = reference_forward(x, enc_raw, dec_raw, fc_w, fc_b, NUM_LAYERS, HIDDEN)
    np.testing.assert_allclose(np.asarray(out), np.asarray(ref), rtol=1e-3, atol=1e-3)
    assert out.shape == (BATCH, SEQ, OUTPUT_SIZE)

    print("KERNEL_OK")
</pallas_src>

<mosaic_0001>
module attributes {stable_mosaic.version = 11 : i64} {
  func.func @kernel(%arg0: memref<16x8xf32, #tpu.memory_space<vmem>>, %arg1: memref<8x128xf32, #tpu.memory_space<vmem>>, %arg2: memref<32x128xf32, #tpu.memory_space<vmem>>, %arg3: memref<1x128xf32, #tpu.memory_space<vmem>>, %arg4: memref<32x128xf32, #tpu.memory_space<vmem>>, %arg5: memref<32x128xf32, #tpu.memory_space<vmem>>, %arg6: memref<1x128xf32, #tpu.memory_space<vmem>>, %arg7: memref<32x128xf32, #tpu.memory_space<vmem>>, %arg8: memref<1x128xf32, #tpu.memory_space<vmem>>, %arg9: memref<32x128xf32, #tpu.memory_space<vmem>>, %arg10: memref<1x128xf32, #tpu.memory_space<vmem>>, %arg11: memref<32x128xf32, #tpu.memory_space<vmem>>, %arg12: memref<32x128xf32, #tpu.memory_space<vmem>>, %arg13: memref<1x128xf32, #tpu.memory_space<vmem>>, %arg14: memref<32x8xf32, #tpu.memory_space<vmem>>, %arg15: memref<1x8xf32, #tpu.memory_space<vmem>>, %arg16: memref<2x64xf32, #tpu.memory_space<vmem>>) attributes {dimension_semantics = [], scalar_prefetch = 0 : i64, scratch_operands = 0 : i64, tpu.core_type = #tpu.core_type<tc>} {
    %c0 = arith.constant 0 : index
    %c0_0 = arith.constant 0 : index
    %0 = vector.load %arg6[%c0, %c0_0] : memref<1x128xf32, #tpu.memory_space<vmem>>, vector<1x128xf32>
    %1 = vector.shape_cast %0 : vector<1x128xf32> to vector<1x128xf32>
    %2 = vector.broadcast %1 : vector<1x128xf32> to vector<2x128xf32>
    %c0_1 = arith.constant 0 : index
    %c0_2 = arith.constant 0 : index
    %3 = vector.load %arg8[%c0_1, %c0_2] : memref<1x128xf32, #tpu.memory_space<vmem>>, vector<1x128xf32>
    %4 = vector.shape_cast %3 : vector<1x128xf32> to vector<1x128xf32>
    %5 = vector.broadcast %4 : vector<1x128xf32> to vector<2x128xf32>
    %c0_3 = arith.constant 0 : index
    %c0_4 = arith.constant 0 : index
    %6 = vector.load %arg10[%c0_3, %c0_4] : memref<1x128xf32, #tpu.memory_space<vmem>>, vector<1x128xf32>
    %7 = vector.shape_cast %6 : vector<1x128xf32> to vector<1x128xf32>
    %8 = vector.broadcast %7 : vector<1x128xf32> to vector<2x128xf32>
    %c0_5 = arith.constant 0 : index
    %c0_6 = arith.constant 0 : index
    %9 = vector.load %arg13[%c0_5, %c0_6] : memref<1x128xf32, #tpu.memory_space<vmem>>, vector<1x128xf32>
    %10 = vector.shape_cast %9 : vector<1x128xf32> to vector<1x128xf32>
    %11 = vector.broadcast %10 : vector<1x128xf32> to vector<2x128xf32>
    %c0_7 = arith.constant 0 : index
    %c0_8 = arith.constant 0 : index
    %12 = vector.load %arg15[%c0_7, %c0_8] : memref<1x8xf32, #tpu.memory_space<vmem>>, vector<1x8xf32>
    %13 = vector.shape_cast %12 : vector<1x8xf32> to vector<1x8xf32>
    %14 = vector.broadcast %13 : vector<1x8xf32> to vector<2x8xf32>
    %c0_9 = arith.constant 0 : index
    %c0_10 = arith.constant 0 : index
    %15 = vector.load %arg0[%c0_9, %c0_10] : memref<16x8xf32, #tpu.memory_space<vmem>>, vector<16x8xf32>
    %c0_11 = arith.constant 0 : index
    %c0_12 = arith.constant 0 : index
    %16 = vector.load %arg1[%c0_11, %c0_12] : memref<8x128xf32, #tpu.memory_space<vmem>>, vector<8x128xf32>
    %cst = arith.constant dense<0.000000e+00> : vector<16x128xf32>
    %17 = tpu.matmul %15, %16, %cst {dimension_numbers = #tpu.dot_dimension_numbers<[1], [0], [0], [1], [0, 0, 1, 1], [], []>} : vector<16x8xf32>, vector<8x128xf32>, vector<16x128xf32> -> vector<16x128xf32>
    %c0_13 = arith.constant 0 : index
    %c0_14 = arith.constant 0 : index
    %18 = vector.load %arg3[%c0_13, %c0_14] : memref<1x128xf32, #tpu.memory_space<vmem>>, vector<1x128xf32>
    %19 = vector.shape_cast %18 : vector<1x128xf32> to vector<1x128xf32>
    %20 = vector.broadcast %19 : vector<1x128xf32> to vector<16x128xf32>
    %21 = arith.addf %17, %20 : vector<16x128xf32>
    %cst_15 = arith.constant 0.000000e+00 : f32
    %22 = vector.broadcast %cst_15 : f32 to vector<2x32xf32>
    %cst_16 = arith.constant 0.000000e+00 : f32
    %23 = vector.broadcast %cst_16 : f32 to vector<2x32xf32>
    %cst_17 = arith.constant 0.000000e+00 : f32
    %24 = vector.broadcast %cst_17 : f32 to vector<2x32xf32>
    %cst_18 = arith.constant 0.000000e+00 : f32
    %25 = vector.broadcast %cst_18 : f32 to vector<2x32xf32>
    %26 = vector.extract_strided_slice %21 {offsets = [0, 0], sizes = [2, 128], strides = [1, 1]} : vector<16x128xf32> to vector<2x128xf32>
    %c0_19 = arith.constant 0 : index
    %c0_20 = arith.constant 0 : index
    %27 = vector.load %arg2[%c0_19, %c0_20] : memref<32x128xf32, #tpu.memory_space<vmem>>, vector<32x128xf32>
    %cst_21 = arith.constant dense<0.000000e+00> : vector<2x128xf32>
    %28 = tpu.matmul %22, %27, %cst_21 {dimension_numbers = #tpu.dot_dimension_numbers<[1], [0], [0], [1], [0, 0, 1, 1], [], []>} : vector<2x32xf32>, vector<32x128xf32>, vector<2x128xf32> -> vector<2x128xf32>
    %29 = arith.addf %26, %28 : vector<2x128xf32>
    %30 = math.tanh %29 : vector<2x128xf32>
    %31 = vector.extract_strided_slice %30 {offsets = [0, 0], sizes = [2, 32], strides = [1, 1]} : vector<2x128xf32> to vector<2x32xf32>
    %cst_22 = arith.constant 5.000000e-01 : f32
    %32 = vector.broadcast %cst_22 : f32 to vector<2x32xf32>
    %33 = arith.mulf %31, %32 : vector<2x32xf32>
    %cst_23 = arith.constant 5.000000e-01 : f32
    %34 = vector.broadcast %cst_23 : f32 to vector<2x32xf32>
    %35 = arith.addf %33, %34 : vector<2x32xf32>
    %36 = vector.extract_strided_slice %30 {offsets = [0, 32], sizes = [2, 32], strides = [1, 1]} : vector<2x128xf32> to vector<2x32xf32>
    %cst_24 = arith.constant 5.000000e-01 : f32
    %37 = vector.broadcast %cst_24 : f32 to vector<2x32xf32>
    %38 = arith.mulf %36, %37 : vector<2x32xf32>
    %cst_25 = arith.constant 5.000000e-01 : f32
    %39 = vector.broadcast %cst_25 : f32 to vector<2x32xf32>
    %40 = arith.addf %38, %39 : vector<2x32xf32>
    %41 = vector.extract_strided_slice %30 {offsets = [0, 64], sizes = [2, 32], strides = [1, 1]} : vector<2x128xf32> to vector<2x32xf32>
    %42 = vector.extract_strided_slice %30 {offsets = [0, 96], sizes = [2, 32], strides = [1, 1]} : vector<2x128xf32> to vector<2x32xf32>
    %cst_26 = arith.constant 5.000000e-01 : f32
    %43 = vector.broadcast %cst_26 : f32 to vector<2x32xf32>
    %44 = arith.mulf %42, %43 : vector<2x32xf32>
    %cst_27 = arith.constant 5.000000e-01 : f32
    %45 = vector.broadcast %cst_27 : f32 to vector<2x32xf32>
    %46 = arith.addf %44, %45 : vector<2x32xf32>
    %47 = arith.mulf %40, %24 : vector<2x32xf32>
    %48 = arith.mulf %35, %41 : vector<2x32xf32>
    %49 = arith.addf %47, %48 : vector<2x32xf32>
    %50 = math.tanh %49 : vector<2x32xf32>
    %51 = arith.mulf %46, %50 : vector<2x32xf32>
    %c0_28 = arith.constant 0 : index
    %c0_29 = arith.constant 0 : index
    %52 = vector.load %arg4[%c0_28, %c0_29] : memref<32x128xf32, #tpu.memory_space<vmem>>, vector<32x128xf32>
    %cst_30 = arith.constant dense<0.000000e+00> : vector<2x128xf32>
    %53 = tpu.matmul %51, %52, %cst_30 {dimension_numbers = #tpu.dot_dimension_numbers<[1], [0], [0], [1], [0, 0, 1, 1], [], []>} : vector<2x32xf32>, vector<32x128xf32>, vector<2x128xf32> -> vector<2x128xf32>
    %c0_31 = arith.constant 0 : index
    %c0_32 = arith.constant 0 : index
    %54 = vector.load %arg5[%c0_31, %c0_32] : memref<32x128xf32, #tpu.memory_space<vmem>>, vector<32x128xf32>
    %cst_33 = arith.constant dense<0.000000e+00> : vector<2x128xf32>
    %55 = tpu.matmul %23, %54, %cst_33 {dimension_numbers = #tpu.dot_dimension_numbers<[1], [0], [0], [1], [0, 0, 1, 1], [], []>} : vector<2x32xf32>, vector<32x128xf32>, vector<2x128xf32> -> vector<2x128xf32>
    %56 = arith.addf %53, %55 : vector<2x128xf32>
    %57 = arith.addf %56, %2 : vector<2x128xf32>
    %58 = math.tanh %57 : vector<2x128xf32>
    %59 = vector.extract_strided_slice %58 {offsets = [0, 0], sizes = [2, 32], strides = [1, 1]} : vector<2x128xf32> to vector<2x32xf32>
    %cst_34 = arith.constant 5.000000e-01 : f32
    %60 = vector.broadcast %cst_34 : f32 to vector<2x32xf32>
    %61 = arith.mulf %59, %60 : vector<2x32xf32>
    %cst_35 = arith.constant 5.000000e-01 : f32
    %62 = vector.broadcast %cst_35 : f32 to vector<2x32xf32>
    %63 = arith.addf %61, %62 : vector<2x32xf32>
    %64 = vector.extract_strided_slice %58 {offsets = [0, 32], sizes = [2, 32], strides = [1, 1]} : vector<2x128xf32> to vector<2x32xf32>
    %cst_36 = arith.constant 5.000000e-01 : f32
    %65 = vector.broadcast %cst_36 : f32 to vector<2x32xf32>
    %66 = arith.mulf %64, %65 : vector<2x32xf32>
    %cst_37 = arith.constant 5.000000e-01 : f32
    %67 = vector.broadcast %cst_37 : f32 to vector<2x32xf32>
    %68 = arith.addf %66, %67 : vector<2x32xf32>
    %69 = vector.extract_strided_slice %58 {offsets = [0, 64], sizes = [2, 32], strides = [1, 1]} : vector<2x128xf32> to vector<2x32xf32>
    %70 = vector.extract_strided_slice %58 {offsets = [0, 96], sizes = [2, 32], strides = [1, 1]} : vector<2x128xf32> to vector<2x32xf32>
    %cst_38 = arith.constant 5.000000e-01 : f32
    %71 = vector.broadcast %cst_38 : f32 to vector<2x32xf32>
    %72 = arith.mulf %70, %71 : vector<2x32xf32>
    %cst_39 = arith.constant 5.000000e-01 : f32
    %73 = vector.broadcast %cst_39 : f32 to vector<2x32xf32>
    %74 = arith.addf %72, %73 : vector<2x32xf32>
    %75 = arith.mulf %68, %25 : vector<2x32xf32>
    %76 = arith.mulf %63, %69 : vector<2x32xf32>
    %77 = arith.addf %75, %76 : vector<2x32xf32>
    %78 = math.tanh %77 : vector<2x32xf32>
    %79 = arith.mulf %74, %78 : vector<2x32xf32>
    %80 = vector.extract_strided_slice %21 {offsets = [2, 0], sizes = [2, 128], strides = [1, 1]} : vector<16x128xf32> to vector<2x128xf32>
    %c0_40 = arith.constant 0 : index
    %c0_41 = arith.constant 0 : index
    %81 = vector.load %arg2[%c0_40, %c0_41] : memref<32x128xf32, #tpu.memory_space<vmem>>, vector<32x128xf32>
    %cst_42 = arith.constant dense<0.000000e+00> : vector<2x128xf32>
    %82 = tpu.matmul %51, %81, %cst_42 {dimension_numbers = #tpu.dot_dimension_numbers<[1], [0], [0], [1], [0, 0, 1, 1], [], []>} : vector<2x32xf32>, vector<32x128xf32>, vector<2x128xf32> -> vector<2x128xf32>
    %83 = arith.addf %80, %82 : vector<2x128xf32>
    %84 = math.tanh %83 : vector<2x128xf32>
    %85 = vector.extract_strided_slice %84 {offsets = [0, 0], sizes = [2, 32], strides = [1, 1]} : vector<2x128xf32> to vector<2x32xf32>
    %cst_43 = arith.constant 5.000000e-01 : f32
    %86 = vector.broadcast %cst_43 : f32 to vector<2x32xf32>
    %87 = arith.mulf %85, %86 : vector<2x32xf32>
    %cst_44 = arith.constant 5.000000e-01 : f32
    %88 = vector.broadcast %cst_44 : f32 to vector<2x32xf32>
    %89 = arith.addf %87, %88 : vector<2x32xf32>
    %90 = vector.extract_strided_slice %84 {offsets = [0, 32], sizes = [2, 32], strides = [1, 1]} : vector<2x128xf32> to vector<2x32xf32>
    %cst_45 = arith.constant 5.000000e-01 : f32
    %91 = vector.broadcast %cst_45 : f32 to vector<2x32xf32>
    %92 = arith.mulf %90, %91 : vector<2x32xf32>
    %cst_46 = arith.constant 5.000000e-01 : f32
    %93 = vector.broadcast %cst_46 : f32 to vector<2x32xf32>
    %94 = arith.addf %92, %93 : vector<2x32xf32>
    %95 = vector.extract_strided_slice %84 {offsets = [0, 64], sizes = [2, 32], strides = [1, 1]} : vector<2x128xf32> to vector<2x32xf32>
    %96 = vector.extract_strided_slice %84 {offsets = [0, 96], sizes = [2, 32], strides = [1, 1]} : vector<2x128xf32> to vector<2x32xf32>
    %cst_47 = arith.constant 5.000000e-01 : f32
    %97 = vector.broadcast %cst_47 : f32 to vector<2x32xf32>
    %98 = arith.mulf %96, %97 : vector<2x32xf32>
    %cst_48 = arith.constant 5.000000e-01 : f32
    %99 = vector.broadcast %cst_48 : f32 to vector<2x32xf32>
    %100 = arith.addf %98, %99 : vector<2x32xf32>
    %101 = arith.mulf %94, %49 : vector<2x32xf32>
    %102 = arith.mulf %89, %95 : vector<2x32xf32>
    %103 = arith.addf %101, %102 : vector<2x32xf32>
    %104 = math.tanh %103 : vector<2x32xf32>
    %105 = arith.mulf %100, %104 : vector<2x32xf32>
    %c0_49 = arith.constant 0 : index
    %c0_50 = arith.constant 0 : index
    %106 = vector.load %arg4[%c0_49, %c0_50] : memref<32x128xf32, #tpu.memory_space<vmem>>, vector<32x128xf32>
    %cst_51 = arith.constant dense<0.000000e+00> : vector<2x128xf32>
    %107 = tpu.matmul %105, %106, %cst_51 {dimension_numbers = #tpu.dot_dimension_numbers<[1], [0], [0], [1], [0, 0, 1, 1], [], []>} : vector<2x32xf32>, vector<32x128xf32>, vector<2x128xf32> -> vector<2x128xf32>
    %c0_52 = arith.constant 0 : index
    %c0_53 = arith.constant 0 : index
    %108 = vector.load %arg5[%c0_52, %c0_53] : memref<32x128xf32, #tpu.memory_space<vmem>>, vector<32x128xf32>
    %cst_54 = arith.constant dense<0.000000e+00> : vector<2x128xf32>
    %109 = tpu.matmul %79, %108, %cst_54 {dimension_numbers = #tpu.dot_dimension_numbers<[1], [0], [0], [1], [0, 0, 1, 1], [], []>} : vector<2x32xf32>, vector<32x128xf32>, vector<2x128xf32> -> vector<2x128xf32>
    %110 = arith.addf %107, %109 : vector<2x128xf32>
    %111 = arith.addf %110, %2 : vector<2x128xf32>
    %112 = math.tanh %111 : vector<2x128xf32>
    %113 = vector.extract_strided_slice %112 {offsets = [0, 0], sizes = [2, 32], strides = [1, 1]} : vector<2x128xf32> to vector<2x32xf32>
    %cst_55 = arith.constant 5.000000e-01 : f32
    %114 = vector.broadcast %cst_55 : f32 to vector<2x32xf32>
    %115 = arith.mulf %113, %114 : vector<2x32xf32>
    %cst_56 = arith.constant 5.000000e-01 : f32
    %116 = vector.broadcast %cst_56 : f32 to vector<2x32xf32>
    %117 = arith.addf %115, %116 : vector<2x32xf32>
    %118 = vector.extract_strided_slice %112 {offsets = [0, 32], sizes = [2, 32], strides = [1, 1]} : vector<2x128xf32> to vector<2x32xf32>
    %cst_57 = arith.constant 5.000000e-01 : f32
    %119 = vector.broadcast %cst_57 : f32 to vector<2x32xf32>
    %120 = arith.mulf %118, %119 : vector<2x32xf32>
    %cst_58 = arith.constant 5.000000e-01 : f32
    %121 = vector.broadcast %cst_58 : f32 to vector<2x32xf32>
    %122 = arith.addf %120, %121 : vector<2x32xf32>
    %123 = vector.extract_strided_slice %112 {offsets = [0, 64], sizes = [2, 32], strides = [1, 1]} : vector<2x128xf32> to vector<2x32xf32>
    %124 = vector.extract_strided_slice %112 {offsets = [0, 96], sizes = [2, 32], strides = [1, 1]} : vector<2x128xf32> to vector<2x32xf32>
    %cst_59 = arith.constant 5.000000e-01 : f32
    %125 = vector.broadcast %cst_59 : f32 to vector<2x32xf32>
    %126 = arith.mulf %124, %125 : vector<2x32xf32>
    %cst_60 = arith.constant 5.000000e-01 : f32
    %127 = vector.broadcast %cst_60 : f32 to vector<2x32xf32>
    %128 = arith.addf %126, %127 : vector<2x32xf32>
    %129 = arith.mulf %122, %77 : vector<2x32xf32>
    %130 = arith.mulf %117, %123 : vector<2x32xf32>
    %131 = arith.addf %129, %130 : vector<2x32xf32>
    %132 = math.tanh %131 : vector<2x32xf32>
    %133 = arith.mulf %128, %132 : vector<2x32xf32>
    %134 = vector.extract_strided_slice %21 {offsets = [4, 0], sizes = [2, 128], strides = [1, 1]} : vector<16x128xf32> to vector<2x128xf32>
    %c0_61 = arith.constant 0 : index
    %c0_62 = arith.constant 0 : index
    %135 = vector.load %arg2[%c0_61, %c0_62] : memref<32x128xf32, #tpu.memory_space<vmem>>, vector<32x128xf32>
    %cst_63 = arith.constant dense<0.000000e+00> : vector<2x128xf32>
    %136 = tpu.matmul %105, %135, %cst_63 {dimension_numbers = #tpu.dot_dimension_numbers<[1], [0], [0], [1], [0, 0, 1, 1], [], []>} : vector<2x32xf32>, vector<32x128xf32>, vector<2x128xf32> -> vector<2x128xf32>
    %137 = arith.addf %134, %136 : vector<2x128xf32>
    %138 = math.tanh %137 : vector<2x128xf32>
    %139 = vector.extract_strided_slice %138 {offsets = [0, 0], sizes = [2, 32], strides = [1, 1]} : vector<2x128xf32> to vector<2x32xf32>
    %cst_64 = arith.constant 5.000000e-01 : f32
    %140 = vector.broadcast %cst_64 : f32 to vector<2x32xf32>
    %141 = arith.mulf %139, %140 : vector<2x32xf32>
    %cst_65 = arith.constant 5.000000e-01 : f32
    %142 = vector.broadcast %cst_65 : f32 to vector<2x32xf32>
    %143 = arith.addf %141, %142 : vector<2x32xf32>
    %144 = vector.extract_strided_slice %138 {offsets = [0, 32], sizes = [2, 32], strides = [1, 1]} : vector<2x128xf32> to vector<2x32xf32>
    %cst_66 = arith.constant 5.000000e-01 : f32
    %145 = vector.broadcast %cst_66 : f32 to vector<2x32xf32>
    %146 = arith.mulf %144, %145 : vector<2x32xf32>
    %cst_67 = arith.constant 5.000000e-01 : f32
    %147 = vector.broadcast %cst_67 : f32 to vector<2x32xf32>
    %148 = arith.addf %146, %147 : vector<2x32xf32>
    %149 = vector.extract_strided_slice %138 {offsets = [0, 64], sizes = [2, 32], strides = [1, 1]} : vector<2x128xf32> to vector<2x32xf32>
    %150 = vector.extract_strided_slice %138 {offsets = [0, 96], sizes = [2, 32], strides = [1, 1]} : vector<2x128xf32> to vector<2x32xf32>
    %cst_68 = arith.constant 5.000000e-01 : f32
    %151 = vector.broadcast %cst_68 : f32 to vector<2x32xf32>
    %152 = arith.mulf %150, %151 : vector<2x32xf32>
    %cst_69 = arith.constant 5.000000e-01 : f32
    %153 = vector.broadcast %cst_69 : f32 to vector<2x32xf32>
    %154 = arith.addf %152, %153 : vector<2x32xf32>
    %155 = arith.mulf %148, %103 : vector<2x32xf32>
    %156 = arith.mulf %143, %149 : vector<2x32xf32>
    %157 = arith.addf %155, %156 : vector<2x32xf32>
    %158 = math.tanh %157 : vector<2x32xf32>
    %159 = arith.mulf %154, %158 : vector<2x32xf32>
    %c0_70 = arith.constant 0 : index
    %c0_71 = arith.constant 0 : index
    %160 = vector.load %arg4[%c0_70, %c0_71] : memref<32x128xf32, #tpu.memory_space<vmem>>, vector<32x128xf32>
    %cst_72 = arith.constant dense<0.000000e+00> : vector<2x128xf32>
    %161 = tpu.matmul %159, %160, %cst_72 {dimension_numbers = #tpu.dot_dimension_numbers<[1], [0], [0], [1], [0, 0, 1, 1], [], []>} : vector<2x32xf32>, vector<32x128xf32>, vector<2x128xf32> -> vector<2x128xf32>
    %c0_73 = arith.constant 0 : index
    %c0_74 = arith.constant 0 : index
    %162 = vector.load %arg5[%c0_73, %c0_74] : memref<32x128xf32, #tpu.memory_space<vmem>>, vector<32x128xf32>
    %cst_75 = arith.constant dense<0.000000e+00> : vector<2x128xf32>
    %163 = tpu.matmul %133, %162, %cst_75 {dimension_numbers = #tpu.dot_dimension_numbers<[1], [0], [0], [1], [0, 0, 1, 1], [], []>} : vector<2x32xf32>, vector<32x128xf32>, vector<2x128xf32> -> vector<2x128xf32>
    %164 = arith.addf %161, %163 : vector<2x128xf32>
    %165 = arith.addf %164, %2 : vector<2x128xf32>
    %166 = math.tanh %165 : vector<2x128xf32>
    %167 = vector.extract_strided_slice %166 {offsets = [0, 0], sizes = [2, 32], strides = [1, 1]} : vector<2x128xf32> to vector<2x32xf32>
    %cst_76 = arith.constant 5.000000e-01 : f32
    %168 = vector.broadcast %cst_76 : f32 to vector<2x32xf32>
    %169 = arith.mulf %167, %168 : vector<2x32xf32>
    %cst_77 = arith.constant 5.000000e-01 : f32
    %170 = vector.broadcast %cst_77 : f32 to vector<2x32xf32>
    %171 = arith.addf %169, %170 : vector<2x32xf32>
    %172 = vector.extract_strided_slice %166 {offsets = [0, 32], sizes = [2, 32], strides = [1, 1]} : vector<2x128xf32> to vector<2x32xf32>
    %cst_78 = arith.constant 5.000000e-01 : f32
    %173 = vector.broadcast %cst_78 : f32 to vector<2x32xf32>
    %174 = arith.mulf %172, %173 : vector<2x32xf32>
    %cst_79 = arith.constant 5.000000e-01 : f32
    %175 = vector.broadcast %cst_79 : f32 to vector<2x32xf32>
    %176 = arith.addf %174, %175 : vector<2x32xf32>
    %177 = vector.extract_strided_slice %166 {offsets = [0, 64], sizes = [2, 32], strides = [1, 1]} : vector<2x128xf32> to vector<2x32xf32>
    %178 = vector.extract_strided_slice %166 {offsets = [0, 96], sizes = [2, 32], strides = [1, 1]} : vector<2x128xf32> to vector<2x32xf32>
    %cst_80 = arith.constant 5.000000e-01 : f32
    %179 = vector.broadcast %cst_80 : f32 to vector<2x32xf32>
    %180 = arith.mulf %178, %179 : vector<2x32xf32>
    %cst_81 = arith.constant 5.000000e-01 : f32
    %181 = vector.broadcast %cst_81 : f32 to vector<2x32xf32>
    %182 = arith.addf %180, %181 : vector<2x32xf32>
    %183 = arith.mulf %176, %131 : vector<2x32xf32>
    %184 = arith.mulf %171, %177 : vector<2x32xf32>
    %185 = arith.addf %183, %184 : vector<2x32xf32>
    %186 = math.tanh %185 : vector<2x32xf32>
    %187 = arith.mulf %182, %186 : vector<2x32xf32>
    %188 = vector.extract_strided_slice %21 {offsets = [6, 0], sizes = [2, 128], strides = [1, 1]} : vector<16x128xf32> to vector<2x128xf32>
    %c0_82 = arith.constant 0 : index
    %c0_83 = arith.constant 0 : index
    %189 = vector.load %arg2[%c0_82, %c0_83] : memref<32x128xf32, #tpu.memory_space<vmem>>, vector<32x128xf32>
    %cst_84 = arith.constant dense<0.000000e+00> : vector<2x128xf32>
    %190 = tpu.matmul %159, %189, %cst_84 {dimension_numbers = #tpu.dot_dimension_numbers<[1], [0], [0], [1], [0, 0, 1, 1], [], []>} : vector<2x32xf32>, vector<32x128xf32>, vector<2x128xf32> -> vector<2x128xf32>
    %191 = arith.addf %188, %190 : vector<2x128xf32>
    %192 = math.tanh %191 : vector<2x128xf32>
    %193 = vector.extract_strided_slice %192 {offsets = [0, 0], sizes = [2, 32], strides = [1, 1]} : vector<2x128xf32> to vector<2x32xf32>
    %cst_85 = arith.constant 5.000000e-01 : f32
    %194 = vector.broadcast %cst_85 : f32 to vector<2x32xf32>
    %195 = arith.mulf %193, %194 : vector<2x32xf32>
    %cst_86 = arith.constant 5.000000e-01 : f32
    %196 = vector.broadcast %cst_86 : f32 to vector<2x32xf32>
    %197 = arith.addf %195, %196 : vector<2x32xf32>
    %198 = vector.extract_strided_slice %192 {offsets = [0, 32], sizes = [2, 32], strides = [1, 1]} : vector<2x128xf32> to vector<2x32xf32>
    %cst_87 = arith.constant 5.000000e-01 : f32
    %199 = vector.broadcast %cst_87 : f32 to vector<2x32xf32>
    %200 = arith.mulf %198, %199 : vector<2x32xf32>
    %cst_88 = arith.constant 5.000000e-01 : f32
    %201 = vector.broadcast %cst_88 : f32 to vector<2x32xf32>
    %202 = arith.addf %200, %201 : vector<2x32xf32>
    %203 = vector.extract_strided_slice %192 {offsets = [0, 64], sizes = [2, 32], strides = [1, 1]} : vector<2x128xf32> to vector<2x32xf32>
    %204 = vector.extract_strided_slice %192 {offsets = [0, 96], sizes = [2, 32], strides = [1, 1]} : vector<2x128xf32> to vector<2x32xf32>
    %cst_89 = arith.constant 5.000000e-01 : f32
    %205 = vector.broadcast %cst_89 : f32 to vector<2x32xf32>
    %206 = arith.mulf %204, %205 : vector<2x32xf32>
    %cst_90 = arith.constant 5.000000e-01 : f32
    %207 = vector.broadcast %cst_90 : f32 to vector<2x32xf32>
    %208 = arith.addf %206, %207 : vector<2x32xf32>
    %209 = arith.mulf %202, %157 : vector<2x32xf32>
    %210 = arith.mulf %197, %203 : vector<2x32xf32>
    %211 = arith.addf %209, %210 : vector<2x32xf32>
    %212 = math.tanh %211 : vector<2x32xf32>
    %213 = arith.mulf %208, %212 : vector<2x32xf32>
    %c0_91 = arith.constant 0 : index
    %c0_92 = arith.constant 0 : index
    %214 = vector.load %arg4[%c0_91, %c0_92] : memref<32x128xf32, #tpu.memory_space<vmem>>, vector<32x128xf32>
    %cst_93 = arith.constant dense<0.000000e+00> : vector<2x128xf32>
    %215 = tpu.matmul %213, %214, %cst_93 {dimension_numbers = #tpu.dot_dimension_numbers<[1], [0], [0], [1], [0, 0, 1, 1], [], []>} : vector<2x32xf32>, vector<32x128xf32>, vector<2x128xf32> -> vector<2x128xf32>
    %c0_94 = arith.constant 0 : index
    %c0_95 = arith.constant 0 : index
    %216 = vector.load %arg5[%c0_94, %c0_95] : memref<32x128xf32, #tpu.memory_space<vmem>>, vector<32x128xf32>
    %cst_96 = arith.constant dense<0.000000e+00> : vector<2x128xf32>
    %217 = tpu.matmul %187, %216, %cst_96 {dimension_numbers = #tpu.dot_dimension_numbers<[1], [0], [0], [1], [0, 0, 1, 1], [], []>} : vector<2x32xf32>, vector<32x128xf32>, vector<2x128xf32> -> vector<2x128xf32>
    %218 = arith.addf %215, %217 : vector<2x128xf32>
    %219 = arith.addf %218, %2 : vector<2x128xf32>
    %220 = math.tanh %219 : vector<2x128xf32>
    %221 = vector.extract_strided_slice %220 {offsets = [0, 0], sizes = [2, 32], strides = [1, 1]} : vector<2x128xf32> to vector<2x32xf32>
    %cst_97 = arith.constant 5.000000e-01 : f32
    %222 = vector.broadcast %cst_97 : f32 to vector<2x32xf32>
    %223 = arith.mulf %221, %222 : vector<2x32xf32>
    %cst_98 = arith.constant 5.000000e-01 : f32
    %224 = vector.broadcast %cst_98 : f32 to vector<2x32xf32>
    %225 = arith.addf %223, %224 : vector<2x32xf32>
    %226 = vector.extract_strided_slice %220 {offsets = [0, 32], sizes = [2, 32], strides = [1, 1]} : vector<2x128xf32> to vector<2x32xf32>
    %cst_99 = arith.constant 5.000000e-01 : f32
    %227 = vector.broadcast %cst_99 : f32 to vector<2x32xf32>
    %228 = arith.mulf %226, %227 : vector<2x32xf32>
    %cst_100 = arith.constant 5.000000e-01 : f32
    %229 = vector.broadcast %cst_100 : f32 to vector<2x32xf32>
    %230 = arith.addf %228, %229 : vector<2x32xf32>
    %231 = vector.extract_strided_slice %220 {offsets = [0, 64], sizes = [2, 32], strides = [1, 1]} : vector<2x128xf32> to vector<2x32xf32>
    %232 = vector.extract_strided_slice %220 {offsets = [0, 96], sizes = [2, 32], strides = [1, 1]} : vector<2x128xf32> to vector<2x32xf32>
    %cst_101 = arith.constant 5.000000e-01 : f32
    %233 = vector.broadcast %cst_101 : f32 to vector<2x32xf32>
    %234 = arith.mulf %232, %233 : vector<2x32xf32>
    %cst_102 = arith.constant 5.000000e-01 : f32
    %235 = vector.broadcast %cst_102 : f32 to vector<2x32xf32>
    %236 = arith.addf %234, %235 : vector<2x32xf32>
    %237 = arith.mulf %230, %185 : vector<2x32xf32>
    %238 = arith.mulf %225, %231 : vector<2x32xf32>
    %239 = arith.addf %237, %238 : vector<2x32xf32>
    %240 = math.tanh %239 : vector<2x32xf32>
    %241 = arith.mulf %236, %240 : vector<2x32xf32>
    %242 = vector.extract_strided_slice %21 {offsets = [8, 0], sizes = [2, 128], strides = [1, 1]} : vector<16x128xf32> to vector<2x128xf32>
    %c0_103 = arith.constant 0 : index
    %c0_104 = arith.constant 0 : index
    %243 = vector.load %arg2[%c0_103, %c0_104] : memref<32x128xf32, #tpu.memory_space<vmem>>, vector<32x128xf32>
    %cst_105 = arith.constant dense<0.000000e+00> : vector<2x128xf32>
    %244 = tpu.matmul %213, %243, %cst_105 {dimension_numbers = #tpu.dot_dimension_numbers<[1], [0], [0], [1], [0, 0, 1, 1], [], []>} : vector<2x32xf32>, vector<32x128xf32>, vector<2x128xf32> -> vector<2x128xf32>
    %245 = arith.addf %242, %244 : vector<2x128xf32>
    %246 = math.tanh %245 : vector<2x128xf32>
    %247 = vector.extract_strided_slice %246 {offsets = [0, 0], sizes = [2, 32], strides = [1, 1]} : vector<2x128xf32> to vector<2x32xf32>
    %cst_106 = arith.constant 5.000000e-01 : f32
    %248 = vector.broadcast %cst_106 : f32 to vector<2x32xf32>
    %249 = arith.mulf %247, %248 : vector<2x32xf32>
    %cst_107 = arith.constant 5.000000e-01 : f32
    %250 = vector.broadcast %cst_107 : f32 to vector<2x32xf32>
    %251 = arith.addf %249, %250 : vector<2x32xf32>
    %252 = vector.extract_strided_slice %246 {offsets = [0, 32], sizes = [2, 32], strides = [1, 1]} : vector<2x128xf32> to vector<2x32xf32>
    %cst_108 = arith.constant 5.000000e-01 : f32
    %253 = vector.broadcast %cst_108 : f32 to vector<2x32xf32>
    %254 = arith.mulf %252, %253 : vector<2x32xf32>
    %cst_109 = arith.constant 5.000000e-01 : f32
    %255 = vector.broadcast %cst_109 : f32 to vector<2x32xf32>
    %256 = arith.addf %254, %255 : vector<2x32xf32>
    %257 = vector.extract_strided_slice %246 {offsets = [0, 64], sizes = [2, 32], strides = [1, 1]} : vector<2x128xf32> to vector<2x32xf32>
    %258 = vector.extract_strided_slice %246 {offsets = [0, 96], sizes = [2, 32], strides = [1, 1]} : vector<2x128xf32> to vector<2x32xf32>
    %cst_110 = arith.constant 5.000000e-01 : f32
    %259 = vector.broadcast %cst_110 : f32 to vector<2x32xf32>
    %260 = arith.mulf %258, %259 : vector<2x32xf32>
    %cst_111 = arith.constant 5.000000e-01 : f32
    %261 = vector.broadcast %cst_111 : f32 to vector<2x32xf32>
    %262 = arith.addf %260, %261 : vector<2x32xf32>
    %263 = arith.mulf %256, %211 : vector<2x32xf32>
    %264 = arith.mulf %251, %257 : vector<2x32xf32>
    %265 = arith.addf %263, %264 : vector<2x32xf32>
    %266 = math.tanh %265 : vector<2x32xf32>
    %267 = arith.mulf %262, %266 : vector<2x32xf32>
    %c0_112 = arith.constant 0 : index
    %c0_113 = arith.constant 0 : index
    %268 = vector.load %arg4[%c0_112, %c0_113] : memref<32x128xf32, #tpu.memory_space<vmem>>, vector<32x128xf32>
    %cst_114 = arith.constant dense<0.000000e+00> : vector<2x128xf32>
    %269 = tpu.matmul %267, %268, %cst_114 {dimension_numbers = #tpu.dot_dimension_numbers<[1], [0], [0], [1], [0, 0, 1, 1], [], []>} : vector<2x32xf32>, vector<32x128xf32>, vector<2x128xf32> -> vector<2x128xf32>
    %c0_115 = arith.constant 0 : index
    %c0_116 = arith.constant 0 : index
    %270 = vector.load %arg5[%c0_115, %c0_116] : memref<32x128xf32, #tpu.memory_space<vmem>>, vector<32x128xf32>
    %cst_117 = arith.constant dense<0.000000e+00> : vector<2x128xf32>
    %271 = tpu.matmul %241, %270, %cst_117 {dimension_numbers = #tpu.dot_dimension_numbers<[1], [0], [0], [1], [0, 0, 1, 1], [], []>} : vector<2x32xf32>, vector<32x128xf32>, vector<2x128xf32> -> vector<2x128xf32>
    %272 = arith.addf %269, %271 : vector<2x128xf32>
    %273 = arith.addf %272, %2 : vector<2x128xf32>
    %274 = math.tanh %273 : vector<2x128xf32>
    %275 = vector.extract_strided_slice %274 {offsets = [0, 0], sizes = [2, 32], strides = [1, 1]} : vector<2x128xf32> to vector<2x32xf32>
    %cst_118 = arith.constant 5.000000e-01 : f32
    %276 = vector.broadcast %cst_118 : f32 to vector<2x32xf32>
    %277 = arith.mulf %275, %276 : vector<2x32xf32>
    %cst_119 = arith.constant 5.000000e-01 : f32
    %278 = vector.broadcast %cst_119 : f32 to vector<2x32xf32>
    %279 = arith.addf %277, %278 : vector<2x32xf32>
    %280 = vector.extract_strided_slice %274 {offsets = [0, 32], sizes = [2, 32], strides = [1, 1]} : vector<2x128xf32> to vector<2x32xf32>
    %cst_120 = arith.constant 5.000000e-01 : f32
    %281 = vector.broadcast %cst_120 : f32 to vector<2x32xf32>
    %282 = arith.mulf %280, %281 : vector<2x32xf32>
    %cst_121 = arith.constant 5.000000e-01 : f32
    %283 = vector.broadcast %cst_121 : f32 to vector<2x32xf32>
    %284 = arith.addf %282, %283 : vector<2x32xf32>
    %285 = vector.extract_strided_slice %274 {offsets = [0, 64], sizes = [2, 32], strides = [1, 1]} : vector<2x128xf32> to vector<2x32xf32>
    %286 = vector.extract_strided_slice %274 {offsets = [0, 96], sizes = [2, 32], strides = [1, 1]} : vector<2x128xf32> to vector<2x32xf32>
    %cst_122 = arith.constant 5.000000e-01 : f32
    %287 = vector.broadcast %cst_122 : f32 to vector<2x32xf32>
    %288 = arith.mulf %286, %287 : vector<2x32xf32>
    %cst_123 = arith.constant 5.000000e-01 : f32
    %289 = vector.broadcast %cst_123 : f32 to vector<2x32xf32>
    %290 = arith.addf %288, %289 : vector<2x32xf32>
    %291 = arith.mulf %284, %239 : vector<2x32xf32>
    %292 = arith.mulf %279, %285 : vector<2x32xf32>
    %293 = arith.addf %291, %292 : vector<2x32xf32>
    %294 = math.tanh %293 : vector<2x32xf32>
    %295 = arith.mulf %290, %294 : vector<2x32xf32>
    %296 = vector.extract_strided_slice %21 {offsets = [10, 0], sizes = [2, 128], strides = [1, 1]} : vector<16x128xf32> to vector<2x128xf32>
    %c0_124 = arith.constant 0 : index
    %c0_125 = arith.constant 0 : index
    %297 = vector.load %arg2[%c0_124, %c0_125] : memref<32x128xf32, #tpu.memory_space<vmem>>, vector<32x128xf32>
    %cst_126 = arith.constant dense<0.000000e+00> : vector<2x128xf32>
    %298 = tpu.matmul %267, %297, %cst_126 {dimension_numbers = #tpu.dot_dimension_numbers<[1], [0], [0], [1], [0, 0, 1, 1], [], []>} : vector<2x32xf32>, vector<32x128xf32>, vector<2x128xf32> -> vector<2x128xf32>
    %299 = arith.addf %296, %298 : vector<2x128xf32>
    %300 = math.tanh %299 : vector<2x128xf32>
    %301 = vector.extract_strided_slice %300 {offsets = [0, 0], sizes = [2, 32], strides = [1, 1]} : vector<2x128xf32> to vector<2x32xf32>
    %cst_127 = arith.constant 5.000000e-01 : f32
    %302 = vector.broadcast %cst_127 : f32 to vector<2x32xf32>
    %303 = arith.mulf %301, %302 : vector<2x32xf32>
    %cst_128 = arith.constant 5.000000e-01 : f32
    %304 = vector.broadcast %cst_128 : f32 to vector<2x32xf32>
    %305 = arith.addf %303, %304 : vector<2x32xf32>
    %306 = vector.extract_strided_slice %300 {offsets = [0, 32], sizes = [2, 32], strides = [1, 1]} : vector<2x128xf32> to vector<2x32xf32>
    %cst_129 = arith.constant 5.000000e-01 : f32
    %307 = vector.broadcast %cst_129 : f32 to vector<2x32xf32>
    %308 = arith.mulf %306, %307 : vector<2x32xf32>
    %cst_130 = arith.constant 5.000000e-01 : f32
    %309 = vector.broadcast %cst_130 : f32 to vector<2x32xf32>
    %310 = arith.addf %308, %309 : vector<2x32xf32>
    %311 = vector.extract_strided_slice %300 {offsets = [0, 64], sizes = [2, 32], strides = [1, 1]} : vector<2x128xf32> to vector<2x32xf32>
    %312 = vector.extract_strided_slice %300 {offsets = [0, 96], sizes = [2, 32], strides = [1, 1]} : vector<2x128xf32> to vector<2x32xf32>
    %cst_131 = arith.constant 5.000000e-01 : f32
    %313 = vector.broadcast %cst_131 : f32 to vector<2x32xf32>
    %314 = arith.mulf %312, %313 : vector<2x32xf32>
    %cst_132 = arith.constant 5.000000e-01 : f32
    %315 = vector.broadcast %cst_132 : f32 to vector<2x32xf32>
    %316 = arith.addf %314, %315 : vector<2x32xf32>
    %317 = arith.mulf %310, %265 : vector<2x32xf32>
    %318 = arith.mulf %305, %311 : vector<2x32xf32>
    %319 = arith.addf %317, %318 : vector<2x32xf32>
    %320 = math.tanh %319 : vector<2x32xf32>
    %321 = arith.mulf %316, %320 : vector<2x32xf32>
    %c0_133 = arith.constant 0 : index
    %c0_134 = arith.constant 0 : index
    %322 = vector.load %arg4[%c0_133, %c0_134] : memref<32x128xf32, #tpu.memory_space<vmem>>, vector<32x128xf32>
    %cst_135 = arith.constant dense<0.000000e+00> : vector<2x128xf32>
    %323 = tpu.matmul %321, %322, %cst_135 {dimension_numbers = #tpu.dot_dimension_numbers<[1], [0], [0], [1], [0, 0, 1, 1], [], []>} : vector<2x32xf32>, vector<32x128xf32>, vector<2x128xf32> -> vector<2x128xf32>
    %c0_136 = arith.constant 0 : index
    %c0_137 = arith.constant 0 : index
    %324 = vector.load %arg5[%c0_136, %c0_137] : memref<32x128xf32, #tpu.memory_space<vmem>>, vector<32x128xf32>
    %cst_138 = arith.constant dense<0.000000e+00> : vector<2x128xf32>
    %325 = tpu.matmul %295, %324, %cst_138 {dimension_numbers = #tpu.dot_dimension_numbers<[1], [0], [0], [1], [0, 0, 1, 1], [], []>} : vector<2x32xf32>, vector<32x128xf32>, vector<2x128xf32> -> vector<2x128xf32>
    %326 = arith.addf %323, %325 : vector<2x128xf32>
    %327 = arith.addf %326, %2 : vector<2x128xf32>
    %328 = math.tanh %327 : vector<2x128xf32>
    %329 = vector.extract_strided_slice %328 {offsets = [0, 0], sizes = [2, 32], strides = [1, 1]} : vector<2x128xf32> to vector<2x32xf32>
    %cst_139 = arith.constant 5.000000e-01 : f32
    %330 = vector.broadcast %cst_139 : f32 to vector<2x32xf32>
    %331 = arith.mulf %329, %330 : vector<2x32xf32>
    %cst_140 = arith.constant 5.000000e-01 : f32
    %332 = vector.broadcast %cst_140 : f32 to vector<2x32xf32>
    %333 = arith.addf %331, %332 : vector<2x32xf32>
    %334 = vector.extract_strided_slice %328 {offsets = [0, 32], sizes = [2, 32], strides = [1, 1]} : vector<2x128xf32> to vector<2x32xf32>
    %cst_141 = arith.constant 5.000000e-01 : f32
    %335 = vector.broadcast %cst_141 : f32 to vector<2x32xf32>
    %336 = arith.mulf %334, %335 : vector<2x32xf32>
    %cst_142 = arith.constant 5.000000e-01 : f32
    %337 = vector.broadcast %cst_142 : f32 to vector<2x32xf32>
    %338 = arith.addf %336, %337 : vector<2x32xf32>
    %339 = vector.extract_strided_slice %328 {offsets = [0, 64], sizes = [2, 32], strides = [1, 1]} : vector<2x128xf32> to vector<2x32xf32>
    %340 = vector.extract_strided_slice %328 {offsets = [0, 96], sizes = [2, 32], strides = [1, 1]} : vector<2x128xf32> to vector<2x32xf32>
    %cst_143 = arith.constant 5.000000e-01 : f32
    %341 = vector.broadcast %cst_143 : f32 to vector<2x32xf32>
    %342 = arith.mulf %340, %341 : vector<2x32xf32>
    %cst_144 = arith.constant 5.000000e-01 : f32
    %343 = vector.broadcast %cst_144 : f32 to vector<2x32xf32>
    %344 = arith.addf %342, %343 : vector<2x32xf32>
    %345 = arith.mulf %338, %293 : vector<2x32xf32>
    %346 = arith.mulf %333, %339 : vector<2x32xf32>
    %347 = arith.addf %345, %346 : vector<2x32xf32>
    %348 = math.tanh %347 : vector<2x32xf32>
    %349 = arith.mulf %344, %348 : vector<2x32xf32>
    %350 = vector.extract_strided_slice %21 {offsets = [12, 0], sizes = [2, 128], strides = [1, 1]} : vector<16x128xf32> to vector<2x128xf32>
    %c0_145 = arith.constant 0 : index
    %c0_146 = arith.constant 0 : index
    %351 = vector.load %arg2[%c0_145, %c0_146] : memref<32x128xf32, #tpu.memory_space<vmem>>, vector<32x128xf32>
    %cst_147 = arith.constant dense<0.000000e+00> : vector<2x128xf32>
    %352 = tpu.matmul %321, %351, %cst_147 {dimension_numbers = #tpu.dot_dimension_numbers<[1], [0], [0], [1], [0, 0, 1, 1], [], []>} : vector<2x32xf32>, vector<32x128xf32>, vector<2x128xf32> -> vector<2x128xf32>
    %353 = arith.addf %350, %352 : vector<2x128xf32>
    %354 = math.tanh %353 : vector<2x128xf32>
    %355 = vector.extract_strided_slice %354 {offsets = [0, 0], sizes = [2, 32], strides = [1, 1]} : vector<2x128xf32> to vector<2x32xf32>
    %cst_148 = arith.constant 5.000000e-01 : f32
    %356 = vector.broadcast %cst_148 : f32 to vector<2x32xf32>
    %357 = arith.mulf %355, %356 : vector<2x32xf32>
    %cst_149 = arith.constant 5.000000e-01 : f32
    %358 = vector.broadcast %cst_149 : f32 to vector<2x32xf32>
    %359 = arith.addf %357, %358 : vector<2x32xf32>
    %360 = vector.extract_strided_slice %354 {offsets = [0, 32], sizes = [2, 32], strides = [1, 1]} : vector<2x128xf32> to vector<2x32xf32>
    %cst_150 = arith.constant 5.000000e-01 : f32
    %361 = vector.broadcast %cst_150 : f32 to vector<2x32xf32>
    %362 = arith.mulf %360, %361 : vector<2x32xf32>
    %cst_151 = arith.constant 5.000000e-01 : f32
    %363 = vector.broadcast %cst_151 : f32 to vector<2x32xf32>
    %364 = arith.addf %362, %363 : vector<2x32xf32>
    %365 = vector.extract_strided_slice %354 {offsets = [0, 64], sizes = [2, 32], strides = [1, 1]} : vector<2x128xf32> to vector<2x32xf32>
    %366 = vector.extract_strided_slice %354 {offsets = [0, 96], sizes = [2, 32], strides = [1, 1]} : vector<2x128xf32> to vector<2x32xf32>
    %cst_152 = arith.constant 5.000000e-01 : f32
    %367 = vector.broadcast %cst_152 : f32 to vector<2x32xf32>
    %368 = arith.mulf %366, %367 : vector<2x32xf32>
    %cst_153 = arith.constant 5.000000e-01 : f32
    %369 = vector.broadcast %cst_153 : f32 to vector<2x32xf32>
    %370 = arith.addf %368, %369 : vector<2x32xf32>
    %371 = arith.mulf %364, %319 : vector<2x32xf32>
    %372 = arith.mulf %359, %365 : vector<2x32xf32>
    %373 = arith.addf %371, %372 : vector<2x32xf32>
    %374 = math.tanh %373 : vector<2x32xf32>
    %375 = arith.mulf %370, %374 : vector<2x32xf32>
    %c0_154 = arith.constant 0 : index
    %c0_155 = arith.constant 0 : index
    %376 = vector.load %arg4[%c0_154, %c0_155] : memref<32x128xf32, #tpu.memory_space<vmem>>, vector<32x128xf32>
    %cst_156 = arith.constant dense<0.000000e+00> : vector<2x128xf32>
    %377 = tpu.matmul %375, %376, %cst_156 {dimension_numbers = #tpu.dot_dimension_numbers<[1], [0], [0], [1], [0, 0, 1, 1], [], []>} : vector<2x32xf32>, vector<32x128xf32>, vector<2x128xf32> -> vector<2x128xf32>
    %c0_157 = arith.constant 0 : index
    %c0_158 = arith.constant 0 : index
    %378 = vector.load %arg5[%c0_157, %c0_158] : memref<32x128xf32, #tpu.memory_space<vmem>>, vector<32x128xf32>
    %cst_159 = arith.constant dense<0.000000e+00> : vector<2x128xf32>
    %379 = tpu.matmul %349, %378, %cst_159 {dimension_numbers = #tpu.dot_dimension_numbers<[1], [0], [0], [1], [0, 0, 1, 1], [], []>} : vector<2x32xf32>, vector<32x128xf32>, vector<2x128xf32> -> vector<2x128xf32>
    %380 = arith.addf %377, %379 : vector<2x128xf32>
    %381 = arith.addf %380, %2 : vector<2x128xf32>
    %382 = math.tanh %381 : vector<2x128xf32>
    %383 = vector.extract_strided_slice %382 {offsets = [0, 0], sizes = [2, 32], strides = [1, 1]} : vector<2x128xf32> to vector<2x32xf32>
    %cst_160 = arith.constant 5.000000e-01 : f32
    %384 = vector.broadcast %cst_160 : f32 to vector<2x32xf32>
    %385 = arith.mulf %383, %384 : vector<2x32xf32>
    %cst_161 = arith.constant 5.000000e-01 : f32
    %386 = vector.broadcast %cst_161 : f32 to vector<2x32xf32>
    %387 = arith.addf %385, %386 : vector<2x32xf32>
    %388 = vector.extract_strided_slice %382 {offsets = [0, 32], sizes = [2, 32], strides = [1, 1]} : vector<2x128xf32> to vector<2x32xf32>
    %cst_162 = arith.constant 5.000000e-01 : f32
    %389 = vector.broadcast %cst_162 : f32 to vector<2x32xf32>
    %390 = arith.mulf %388, %389 : vector<2x32xf32>
    %cst_163 = arith.constant 5.000000e-01 : f32
    %391 = vector.broadcast %cst_163 : f32 to vector<2x32xf32>
    %392 = arith.addf %390, %391 : vector<2x32xf32>
    %393 = vector.extract_strided_slice %382 {offsets = [0, 64], sizes = [2, 32], strides = [1, 1]} : vector<2x128xf32> to vector<2x32xf32>
    %394 = vector.extract_strided_slice %382 {offsets = [0, 96], sizes = [2, 32], strides = [1, 1]} : vector<2x128xf32> to vector<2x32xf32>
    %cst_164 = arith.constant 5.000000e-01 : f32
    %395 = vector.broadcast %cst_164 : f32 to vector<2x32xf32>
    %396 = arith.mulf %394, %395 : vector<2x32xf32>
    %cst_165 = arith.constant 5.000000e-01 : f32
    %397 = vector.broadcast %cst_165 : f32 to vector<2x32xf32>
    %398 = arith.addf %396, %397 : vector<2x32xf32>
    %399 = arith.mulf %392, %347 : vector<2x32xf32>
    %400 = arith.mulf %387, %393 : vector<2x32xf32>
    %401 = arith.addf %399, %400 : vector<2x32xf32>
    %402 = math.tanh %401 : vector<2x32xf32>
    %403 = arith.mulf %398, %402 : vector<2x32xf32>
    %404 = vector.extract_strided_slice %21 {offsets = [14, 0], sizes = [2, 128], strides = [1, 1]} : vector<16x128xf32> to vector<2x128xf32>
    %c0_166 = arith.constant 0 : index
    %c0_167 = arith.constant 0 : index
    %405 = vector.load %arg2[%c0_166, %c0_167] : memref<32x128xf32, #tpu.memory_space<vmem>>, vector<32x128xf32>
    %cst_168 = arith.constant dense<0.000000e+00> : vector<2x128xf32>
    %406 = tpu.matmul %375, %405, %cst_168 {dimension_numbers = #tpu.dot_dimension_numbers<[1], [0], [0], [1], [0, 0, 1, 1], [], []>} : vector<2x32xf32>, vector<32x128xf32>, vector<2x128xf32> -> vector<2x128xf32>
    %407 = arith.addf %404, %406 : vector<2x128xf32>
    %408 = math.tanh %407 : vector<2x128xf32>
    %409 = vector.extract_strided_slice %408 {offsets = [0, 0], sizes = [2, 32], strides = [1, 1]} : vector<2x128xf32> to vector<2x32xf32>
    %cst_169 = arith.constant 5.000000e-01 : f32
    %410 = vector.broadcast %cst_169 : f32 to vector<2x32xf32>
    %411 = arith.mulf %409, %410 : vector<2x32xf32>
    %cst_170 = arith.constant 5.000000e-01 : f32
    %412 = vector.broadcast %cst_170 : f32 to vector<2x32xf32>
    %413 = arith.addf %411, %412 : vector<2x32xf32>
    %414 = vector.extract_strided_slice %408 {offsets = [0, 32], sizes = [2, 32], strides = [1, 1]} : vector<2x128xf32> to vector<2x32xf32>
    %cst_171 = arith.constant 5.000000e-01 : f32
    %415 = vector.broadcast %cst_171 : f32 to vector<2x32xf32>
    %416 = arith.mulf %414, %415 : vector<2x32xf32>
    %cst_172 = arith.constant 5.000000e-01 : f32
    %417 = vector.broadcast %cst_172 : f32 to vector<2x32xf32>
    %418 = arith.addf %416, %417 : vector<2x32xf32>
    %419 = vector.extract_strided_slice %408 {offsets = [0, 64], sizes = [2, 32], strides = [1, 1]} : vector<2x128xf32> to vector<2x32xf32>
    %420 = vector.extract_strided_slice %408 {offsets = [0, 96], sizes = [2, 32], strides = [1, 1]} : vector<2x128xf32> to vector<2x32xf32>
    %cst_173 = arith.constant 5.000000e-01 : f32
    %421 = vector.broadcast %cst_173 : f32 to vector<2x32xf32>
    %422 = arith.mulf %420, %421 : vector<2x32xf32>
    %cst_174 = arith.constant 5.000000e-01 : f32
    %423 = vector.broadcast %cst_174 : f32 to vector<2x32xf32>
    %424 = arith.addf %422, %423 : vector<2x32xf32>
    %425 = arith.mulf %418, %373 : vector<2x32xf32>
    %426 = arith.mulf %413, %419 : vector<2x32xf32>
    %427 = arith.addf %425, %426 : vector<2x32xf32>
    %428 = math.tanh %427 : vector<2x32xf32>
    %429 = arith.mulf %424, %428 : vector<2x32xf32>
    %c0_175 = arith.constant 0 : index
    %c0_176 = arith.constant 0 : index
    %430 = vector.load %arg4[%c0_175, %c0_176] : memref<32x128xf32, #tpu.memory_space<vmem>>, vector<32x128xf32>
    %cst_177 = arith.constant dense<0.000000e+00> : vector<2x128xf32>
    %431 = tpu.matmul %429, %430, %cst_177 {dimension_numbers = #tpu.dot_dimension_numbers<[1], [0], [0], [1], [0, 0, 1, 1], [], []>} : vector<2x32xf32>, vector<32x128xf32>, vector<2x128xf32> -> vector<2x128xf32>
    %c0_178 = arith.constant 0 : index
    %c0_179 = arith.constant 0 : index
    %432 = vector.load %arg5[%c0_178, %c0_179] : memref<32x128xf32, #tpu.memory_space<vmem>>, vector<32x128xf32>
    %cst_180 = arith.constant dense<0.000000e+00> : vector<2x128xf32>
    %433 = tpu.matmul %403, %432, %cst_180 {dimension_numbers = #tpu.dot_dimension_numbers<[1], [0], [0], [1], [0, 0, 1, 1], [], []>} : vector<2x32xf32>, vector<32x128xf32>, vector<2x128xf32> -> vector<2x128xf32>
    %434 = arith.addf %431, %433 : vector<2x128xf32>
    %435 = arith.addf %434, %2 : vector<2x128xf32>
    %436 = math.tanh %435 : vector<2x128xf32>
    %437 = vector.extract_strided_slice %436 {offsets = [0, 0], sizes = [2, 32], strides = [1, 1]} : vector<2x128xf32> to vector<2x32xf32>
    %cst_181 = arith.constant 5.000000e-01 : f32
    %438 = vector.broadcast %cst_181 : f32 to vector<2x32xf32>
    %439 = arith.mulf %437, %438 : vector<2x32xf32>
    %cst_182 = arith.constant 5.000000e-01 : f32
    %440 = vector.broadcast %cst_182 : f32 to vector<2x32xf32>
    %441 = arith.addf %439, %440 : vector<2x32xf32>
    %442 = vector.extract_strided_slice %436 {offsets = [0, 32], sizes = [2, 32], strides = [1, 1]} : vector<2x128xf32> to vector<2x32xf32>
    %cst_183 = arith.constant 5.000000e-01 : f32
    %443 = vector.broadcast %cst_183 : f32 to vector<2x32xf32>
    %444 = arith.mulf %442, %443 : vector<2x32xf32>
    %cst_184 = arith.constant 5.000000e-01 : f32
    %445 = vector.broadcast %cst_184 : f32 to vector<2x32xf32>
    %446 = arith.addf %444, %445 : vector<2x32xf32>
    %447 = vector.extract_strided_slice %436 {offsets = [0, 64], sizes = [2, 32], strides = [1, 1]} : vector<2x128xf32> to vector<2x32xf32>
    %448 = vector.extract_strided_slice %436 {offsets = [0, 96], sizes = [2, 32], strides = [1, 1]} : vector<2x128xf32> to vector<2x32xf32>
    %cst_185 = arith.constant 5.000000e-01 : f32
    %449 = vector.broadcast %cst_185 : f32 to vector<2x32xf32>
    %450 = arith.mulf %448, %449 : vector<2x32xf32>
    %cst_186 = arith.constant 5.000000e-01 : f32
    %451 = vector.broadcast %cst_186 : f32 to vector<2x32xf32>
    %452 = arith.addf %450, %451 : vector<2x32xf32>
    %453 = arith.mulf %446, %401 : vector<2x32xf32>
    %454 = arith.mulf %441, %447 : vector<2x32xf32>
    %455 = arith.addf %453, %454 : vector<2x32xf32>
    %456 = math.tanh %455 : vector<2x32xf32>
    %457 = arith.mulf %452, %456 : vector<2x32xf32>
    %c0_187 = arith.constant 0 : index
    %c0_188 = arith.constant 0 : index
    %458 = vector.load %arg7[%c0_187, %c0_188] : memref<32x128xf32, #tpu.memory_space<vmem>>, vector<32x128xf32>
    %cst_189 = arith.constant dense<0.000000e+00> : vector<2x128xf32>
    %459 = tpu.matmul %429, %458, %cst_189 {dimension_numbers = #tpu.dot_dimension_numbers<[1], [0], [0], [1], [0, 0, 1, 1], [], []>} : vector<2x32xf32>, vector<32x128xf32>, vector<2x128xf32> -> vector<2x128xf32>
    %460 = arith.addf %459, %5 : vector<2x128xf32>
    %461 = math.tanh %460 : vector<2x128xf32>
    %462 = vector.extract_strided_slice %461 {offsets = [0, 0], sizes = [2, 32], strides = [1, 1]} : vector<2x128xf32> to vector<2x32xf32>
    %cst_190 = arith.constant 5.000000e-01 : f32
    %463 = vector.broadcast %cst_190 : f32 to vector<2x32xf32>
    %464 = arith.mulf %462, %463 : vector<2x32xf32>
    %cst_191 = arith.constant 5.000000e-01 : f32
    %465 = vector.broadcast %cst_191 : f32 to vector<2x32xf32>
    %466 = arith.addf %464, %465 : vector<2x32xf32>
    %467 = vector.extract_strided_slice %461 {offsets = [0, 32], sizes = [2, 32], strides = [1, 1]} : vector<2x128xf32> to vector<2x32xf32>
    %cst_192 = arith.constant 5.000000e-01 : f32
    %468 = vector.broadcast %cst_192 : f32 to vector<2x32xf32>
    %469 = arith.mulf %467, %468 : vector<2x32xf32>
    %cst_193 = arith.constant 5.000000e-01 : f32
    %470 = vector.broadcast %cst_193 : f32 to vector<2x32xf32>
    %471 = arith.addf %469, %470 : vector<2x32xf32>
    %472 = vector.extract_strided_slice %461 {offsets = [0, 64], sizes = [2, 32], strides = [1, 1]} : vector<2x128xf32> to vector<2x32xf32>
    %473 = vector.extract_strided_slice %461 {offsets = [0, 96], sizes = [2, 32], strides = [1, 1]} : vector<2x128xf32> to vector<2x32xf32>
    %cst_194 = arith.constant 5.000000e-01 : f32
    %474 = vector.broadcast %cst_194 : f32 to vector<2x32xf32>
    %475 = arith.mulf %473, %474 : vector<2x32xf32>
    %cst_195 = arith.constant 5.000000e-01 : f32
    %476 = vector.broadcast %cst_195 : f32 to vector<2x32xf32>
    %477 = arith.addf %475, %476 : vector<2x32xf32>
    %478 = arith.mulf %471, %427 : vector<2x32xf32>
    %479 = arith.mulf %466, %472 : vector<2x32xf32>
    %480 = arith.addf %478, %479 : vector<2x32xf32>
    %481 = math.tanh %480 : vector<2x32xf32>
    %482 = arith.mulf %477, %481 : vector<2x32xf32>
    %c0_196 = arith.constant 0 : index
    %c0_197 = arith.constant 0 : index
    %483 = vector.load %arg11[%c0_196, %c0_197] : memref<32x128xf32, #tpu.memory_space<vmem>>, vector<32x128xf32>
    %cst_198 = arith.constant dense<0.000000e+00> : vector<2x128xf32>
    %484 = tpu.matmul %482, %483, %cst_198 {dimension_numbers = #tpu.dot_dimension_numbers<[1], [0], [0], [1], [0, 0, 1, 1], [], []>} : vector<2x32xf32>, vector<32x128xf32>, vector<2x128xf32> -> vector<2x128xf32>
    %c0_199 = arith.constant 0 : index
    %c0_200 = arith.constant 0 : index
    %485 = vector.load %arg12[%c0_199, %c0_200] : memref<32x128xf32, #tpu.memory_space<vmem>>, vector<32x128xf32>
    %cst_201 = arith.constant dense<0.000000e+00> : vector<2x128xf32>
    %486 = tpu.matmul %457, %485, %cst_201 {dimension_numbers = #tpu.dot_dimension_numbers<[1], [0], [0], [1], [0, 0, 1, 1], [], []>} : vector<2x32xf32>, vector<32x128xf32>, vector<2x128xf32> -> vector<2x128xf32>
    %487 = arith.addf %484, %486 : vector<2x128xf32>
    %488 = arith.addf %487, %11 : vector<2x128xf32>
    %489 = math.tanh %488 : vector<2x128xf32>
    %490 = vector.extract_strided_slice %489 {offsets = [0, 0], sizes = [2, 32], strides = [1, 1]} : vector<2x128xf32> to vector<2x32xf32>
    %cst_202 = arith.constant 5.000000e-01 : f32
    %491 = vector.broadcast %cst_202 : f32 to vector<2x32xf32>
    %492 = arith.mulf %490, %491 : vector<2x32xf32>
    %cst_203 = arith.constant 5.000000e-01 : f32
    %493 = vector.broadcast %cst_203 : f32 to vector<2x32xf32>
    %494 = arith.addf %492, %493 : vector<2x32xf32>
    %495 = vector.extract_strided_slice %489 {offsets = [0, 32], sizes = [2, 32], strides = [1, 1]} : vector<2x128xf32> to vector<2x32xf32>
    %cst_204 = arith.constant 5.000000e-01 : f32
    %496 = vector.broadcast %cst_204 : f32 to vector<2x32xf32>
    %497 = arith.mulf %495, %496 : vector<2x32xf32>
    %cst_205 = arith.constant 5.000000e-01 : f32
    %498 = vector.broadcast %cst_205 : f32 to vector<2x32xf32>
    %499 = arith.addf %497, %498 : vector<2x32xf32>
    %500 = vector.extract_strided_slice %489 {offsets = [0, 64], sizes = [2, 32], strides = [1, 1]} : vector<2x128xf32> to vector<2x32xf32>
    %501 = vector.extract_strided_slice %489 {offsets = [0, 96], sizes = [2, 32], strides = [1, 1]} : vector<2x128xf32> to vector<2x32xf32>
    %cst_206 = arith.constant 5.000000e-01 : f32
    %502 = vector.broadcast %cst_206 : f32 to vector<2x32xf32>
    %503 = arith.mulf %501, %502 : vector<2x32xf32>
    %cst_207 = arith.constant 5.000000e-01 : f32
    %504 = vector.broadcast %cst_207 : f32 to vector<2x32xf32>
    %505 = arith.addf %503, %504 : vector<2x32xf32>
    %506 = arith.mulf %499, %455 : vector<2x32xf32>
    %507 = arith.mulf %494, %500 : vector<2x32xf32>
    %508 = arith.addf %506, %507 : vector<2x32xf32>
    %509 = math.tanh %508 : vector<2x32xf32>
    %510 = arith.mulf %505, %509 : vector<2x32xf32>
    %c0_208 = arith.constant 0 : index
    %c0_209 = arith.constant 0 : index
    %511 = vector.load %arg14[%c0_208, %c0_209] : memref<32x8xf32, #tpu.memory_space<vmem>>, vector<32x8xf32>
    %cst_210 = arith.constant dense<0.000000e+00> : vector<2x8xf32>
    %512 = tpu.matmul %510, %511, %cst_210 {dimension_numbers = #tpu.dot_dimension_numbers<[1], [0], [0], [1], [0, 0, 1, 1], [], []>} : vector<2x32xf32>, vector<32x8xf32>, vector<2x8xf32> -> vector<2x8xf32>
    %513 = arith.addf %512, %14 : vector<2x8xf32>
    %c0_211 = arith.constant 0 : index
    %c56 = arith.constant 56 : index
    %514 = vector.load %arg16[%c0_211, %c56] : memref<2x64xf32, #tpu.memory_space<vmem>>, vector<2x8xf32>
    tpu.vector_store %arg16[%c0_211, %c56], %513 {strides = array<i32>} : memref<2x64xf32, #tpu.memory_space<vmem>>, vector<2x8xf32>,
    %c0_212 = arith.constant 0 : index
    %c0_213 = arith.constant 0 : index
    %515 = vector.load %arg9[%c0_212, %c0_213] : memref<32x128xf32, #tpu.memory_space<vmem>>, vector<32x128xf32>
    %cst_214 = arith.constant dense<0.000000e+00> : vector<2x128xf32>
    %516 = tpu.matmul %510, %515, %cst_214 {dimension_numbers = #tpu.dot_dimension_numbers<[1], [0], [0], [1], [0, 0, 1, 1], [], []>} : vector<2x32xf32>, vector<32x128xf32>, vector<2x128xf32> -> vector<2x128xf32>
    %c0_215 = arith.constant 0 : index
    %c0_216 = arith.constant 0 : index
    %517 = vector.load %arg7[%c0_215, %c0_216] : memref<32x128xf32, #tpu.memory_space<vmem>>, vector<32x128xf32>
    %cst_217 = arith.constant dense<0.000000e+00> : vector<2x128xf32>
    %518 = tpu.matmul %482, %517, %cst_217 {dimension_numbers = #tpu.dot_dimension_numbers<[1], [0], [0], [1], [0, 0, 1, 1], [], []>} : vector<2x32xf32>, vector<32x128xf32>, vector<2x128xf32> -> vector<2x128xf32>
    %519 = arith.addf %516, %518 : vector<2x128xf32>
    %520 = arith.addf %519, %8 : vector<2x128xf32>
    %521 = math.tanh %520 : vector<2x128xf32>
    %522 = vector.extract_strided_slice %521 {offsets = [0, 0], sizes = [2, 32], strides = [1, 1]} : vector<2x128xf32> to vector<2x32xf32>
    %cst_218 = arith.constant 5.000000e-01 : f32
    %523 = vector.broadcast %cst_218 : f32 to vector<2x32xf32>
    %524 = arith.mulf %522, %523 : vector<2x32xf32>
    %cst_219 = arith.constant 5.000000e-01 : f32
    %525 = vector.broadcast %cst_219 : f32 to vector<2x32xf32>
    %526 = arith.addf %524, %525 : vector<2x32xf32>
    %527 = vector.extract_strided_slice %521 {offsets = [0, 32], sizes = [2, 32], strides = [1, 1]} : vector<2x128xf32> to vector<2x32xf32>
    %cst_220 = arith.constant 5.000000e-01 : f32
    %528 = vector.broadcast %cst_220 : f32 to vector<2x32xf32>
    %529 = arith.mulf %527, %528 : vector<2x32xf32>
    %cst_221 = arith.constant 5.000000e-01 : f32
    %530 = vector.broadcast %cst_221 : f32 to vector<2x32xf32>
    %531 = arith.addf %529, %530 : vector<2x32xf32>
    %532 = vector.extract_strided_slice %521 {offsets = [0, 64], sizes = [2, 32], strides = [1, 1]} : vector<2x128xf32> to vector<2x32xf32>
    %533 = vector.extract_strided_slice %521 {offsets = [0, 96], sizes = [2, 32], strides = [1, 1]} : vector<2x128xf32> to vector<2x32xf32>
    %cst_222 = arith.constant 5.000000e-01 : f32
    %534 = vector.broadcast %cst_222 : f32 to vector<2x32xf32>
    %535 = arith.mulf %533, %534 : vector<2x32xf32>
    %cst_223 = arith.constant 5.000000e-01 : f32
    %536 = vector.broadcast %cst_223 : f32 to vector<2x32xf32>
    %537 = arith.addf %535, %536 : vector<2x32xf32>
    %538 = arith.mulf %531, %480 : vector<2x32xf32>
    %539 = arith.mulf %526, %532 : vector<2x32xf32>
    %540 = arith.addf %538, %539 : vector<2x32xf32>
    %541 = math.tanh %540 : vector<2x32xf32>
    %542 = arith.mulf %537, %541 : vector<2x32xf32>
    %c0_224 = arith.constant 0 : index
    %c0_225 = arith.constant 0 : index
    %543 = vector.load %arg11[%c0_224, %c0_225] : memref<32x128xf32, #tpu.memory_space<vmem>>, vector<32x128xf32>
    %cst_226 = arith.constant dense<0.000000e+00> : vector<2x128xf32>
    %544 = tpu.matmul %542, %543, %cst_226 {dimension_numbers = #tpu.dot_dimension_numbers<[1], [0], [0], [1], [0, 0, 1, 1], [], []>} : vector<2x32xf32>, vector<32x128xf32>, vector<2x128xf32> -> vector<2x128xf32>
    %c0_227 = arith.constant 0 : index
    %c0_228 = arith.constant 0 : index
    %545 = vector.load %arg12[%c0_227, %c0_228] : memref<32x128xf32, #tpu.memory_space<vmem>>, vector<32x128xf32>
    %cst_229 = arith.constant dense<0.000000e+00> : vector<2x128xf32>
    %546 = tpu.matmul %510, %545, %cst_229 {dimension_numbers = #tpu.dot_dimension_numbers<[1], [0], [0], [1], [0, 0, 1, 1], [], []>} : vector<2x32xf32>, vector<32x128xf32>, vector<2x128xf32> -> vector<2x128xf32>
    %547 = arith.addf %544, %546 : vector<2x128xf32>
    %548 = arith.addf %547, %11 : vector<2x128xf32>
    %549 = math.tanh %548 : vector<2x128xf32>
    %550 = vector.extract_strided_slice %549 {offsets = [0, 0], sizes = [2, 32], strides = [1, 1]} : vector<2x128xf32> to vector<2x32xf32>
    %cst_230 = arith.constant 5.000000e-01 : f32
    %551 = vector.broadcast %cst_230 : f32 to vector<2x32xf32>
    %552 = arith.mulf %550, %551 : vector<2x32xf32>
    %cst_231 = arith.constant 5.000000e-01 : f32
    %553 = vector.broadcast %cst_231 : f32 to vector<2x32xf32>
    %554 = arith.addf %552, %553 : vector<2x32xf32>
    %555 = vector.extract_strided_slice %549 {offsets = [0, 32], sizes = [2, 32], strides = [1, 1]} : vector<2x128xf32> to vector<2x32xf32>
    %cst_232 = arith.constant 5.000000e-01 : f32
    %556 = vector.broadcast %cst_232 : f32 to vector<2x32xf32>
    %557 = arith.mulf %555, %556 : vector<2x32xf32>
    %cst_233 = arith.constant 5.000000e-01 : f32
    %558 = vector.broadcast %cst_233 : f32 to vector<2x32xf32>
    %559 = arith.addf %557, %558 : vector<2x32xf32>
    %560 = vector.extract_strided_slice %549 {offsets = [0, 64], sizes = [2, 32], strides = [1, 1]} : vector<2x128xf32> to vector<2x32xf32>
    %561 = vector.extract_strided_slice %549 {offsets = [0, 96], sizes = [2, 32], strides = [1, 1]} : vector<2x128xf32> to vector<2x32xf32>
    %cst_234 = arith.constant 5.000000e-01 : f32
    %562 = vector.broadcast %cst_234 : f32 to vector<2x32xf32>
    %563 = arith.mulf %561, %562 : vector<2x32xf32>
    %cst_235 = arith.constant 5.000000e-01 : f32
    %564 = vector.broadcast %cst_235 : f32 to vector<2x32xf32>
    %565 = arith.addf %563, %564 : vector<2x32xf32>
    %566 = arith.mulf %559, %508 : vector<2x32xf32>
    %567 = arith.mulf %554, %560 : vector<2x32xf32>
    %568 = arith.addf %566, %567 : vector<2x32xf32>
    %569 = math.tanh %568 : vector<2x32xf32>
    %570 = arith.mulf %565, %569 : vector<2x32xf32>
    %c0_236 = arith.constant 0 : index
    %c0_237 = arith.constant 0 : index
    %571 = vector.load %arg14[%c0_236, %c0_237] : memref<32x8xf32, #tpu.memory_space<vmem>>, vector<32x8xf32>
    %cst_238 = arith.constant dense<0.000000e+00> : vector<2x8xf32>
    %572 = tpu.matmul %570, %571, %cst_238 {dimension_numbers = #tpu.dot_dimension_numbers<[1], [0], [0], [1], [0, 0, 1, 1], [], []>} : vector<2x32xf32>, vector<32x8xf32>, vector<2x8xf32> -> vector<2x8xf32>
    %573 = arith.addf %572, %14 : vector<2x8xf32>
    %c0_239 = arith.constant 0 : index
    %c48 = arith.constant 48 : index
    %574 = vector.load %arg16[%c0_239, %c48] : memref<2x64xf32, #tpu.memory_space<vmem>>, vector<2x8xf32>
    tpu.vector_store %arg16[%c0_239, %c48], %573 {strides = array<i32>} : memref<2x64xf32, #tpu.memory_space<vmem>>, vector<2x8xf32>,
    %c0_240 = arith.constant 0 : index
    %c0_241 = arith.constant 0 : index
    %575 = vector.load %arg9[%c0_240, %c0_241] : memref<32x128xf32, #tpu.memory_space<vmem>>, vector<32x128xf32>
    %cst_242 = arith.constant dense<0.000000e+00> : vector<2x128xf32>
    %576 = tpu.matmul %570, %575, %cst_242 {dimension_numbers = #tpu.dot_dimension_numbers<[1], [0], [0], [1], [0, 0, 1, 1], [], []>} : vector<2x32xf32>, vector<32x128xf32>, vector<2x128xf32> -> vector<2x128xf32>
    %c0_243 = arith.constant 0 : index
    %c0_244 = arith.constant 0 : index
    %577 = vector.load %arg7[%c0_243, %c0_244] : memref<32x128xf32, #tpu.memory_space<vmem>>, vector<32x128xf32>
    %cst_245 = arith.constant dense<0.000000e+00> : vector<2x128xf32>
    %578 = tpu.matmul %542, %577, %cst_245 {dimension_numbers = #tpu.dot_dimension_numbers<[1], [0], [0], [1], [0, 0, 1, 1], [], []>} : vector<2x32xf32>, vector<32x128xf32>, vector<2x128xf32> -> vector<2x128xf32>
    %579 = arith.addf %576, %578 : vector<2x128xf32>
    %580 = arith.addf %579, %8 : vector<2x128xf32>
    %581 = math.tanh %580 : vector<2x128xf32>
    %582 = vector.extract_strided_slice %581 {offsets = [0, 0], sizes = [2, 32], strides = [1, 1]} : vector<2x128xf32> to vector<2x32xf32>
    %cst_246 = arith.constant 5.000000e-01 : f32
    %583 = vector.broadcast %cst_246 : f32 to vector<2x32xf32>
    %584 = arith.mulf %582, %583 : vector<2x32xf32>
    %cst_247 = arith.constant 5.000000e-01 : f32
    %585 = vector.broadcast %cst_247 : f32 to vector<2x32xf32>
    %586 = arith.addf %584, %585 : vector<2x32xf32>
    %587 = vector.extract_strided_slice %581 {offsets = [0, 32], sizes = [2, 32], strides = [1, 1]} : vector<2x128xf32> to vector<2x32xf32>
    %cst_248 = arith.constant 5.000000e-01 : f32
    %588 = vector.broadcast %cst_248 : f32 to vector<2x32xf32>
    %589 = arith.mulf %587, %588 : vector<2x32xf32>
    %cst_249 = arith.constant 5.000000e-01 : f32
    %590 = vector.broadcast %cst_249 : f32 to vector<2x32xf32>
    %591 = arith.addf %589, %590 : vector<2x32xf32>
    %592 = vector.extract_strided_slice %581 {offsets = [0, 64], sizes = [2, 32], strides = [1, 1]} : vector<2x128xf32> to vector<2x32xf32>
    %593 = vector.extract_strided_slice %581 {offsets = [0, 96], sizes = [2, 32], strides = [1, 1]} : vector<2x128xf32> to vector<2x32xf32>
    %cst_250 = arith.constant 5.000000e-01 : f32
    %594 = vector.broadcast %cst_250 : f32 to vector<2x32xf32>
    %595 = arith.mulf %593, %594 : vector<2x32xf32>
    %cst_251 = arith.constant 5.000000e-01 : f32
    %596 = vector.broadcast %cst_251 : f32 to vector<2x32xf32>
    %597 = arith.addf %595, %596 : vector<2x32xf32>
    %598 = arith.mulf %591, %540 : vector<2x32xf32>
    %599 = arith.mulf %586, %592 : vector<2x32xf32>
    %600 = arith.addf %598, %599 : vector<2x32xf32>
    %601 = math.tanh %600 : vector<2x32xf32>
    %602 = arith.mulf %597, %601 : vector<2x32xf32>
    %c0_252 = arith.constant 0 : index
    %c0_253 = arith.constant 0 : index
    %603 = vector.load %arg11[%c0_252, %c0_253] : memref<32x128xf32, #tpu.memory_space<vmem>>, vector<32x128xf32>
    %cst_254 = arith.constant dense<0.000000e+00> : vector<2x128xf32>
    %604 = tpu.matmul %602, %603, %cst_254 {dimension_numbers = #tpu.dot_dimension_numbers<[1], [0], [0], [1], [0, 0, 1, 1], [], []>} : vector<2x32xf32>, vector<32x128xf32>, vector<2x128xf32> -> vector<2x128xf32>
    %c0_255 = arith.constant 0 : index
    %c0_256 = arith.constant 0 : index
    %605 = vector.load %arg12[%c0_255, %c0_256] : memref<32x128xf32, #tpu.memory_space<vmem>>, vector<32x128xf32>
    %cst_257 = arith.constant dense<0.000000e+00> : vector<2x128xf32>
    %606 = tpu.matmul %570, %605, %cst_257 {dimension_numbers = #tpu.dot_dimension_numbers<[1], [0], [0], [1], [0, 0, 1, 1], [], []>} : vector<2x32xf32>, vector<32x128xf32>, vector<2x128xf32> -> vector<2x128xf32>
    %607 = arith.addf %604, %606 : vector<2x128xf32>
    %608 = arith.addf %607, %11 : vector<2x128xf32>
    %609 = math.tanh %608 : vector<2x128xf32>
    %610 = vector.extract_strided_slice %609 {offsets = [0, 0], sizes = [2, 32], strides = [1, 1]} : vector<2x128xf32> to vector<2x32xf32>
    %cst_258 = arith.constant 5.000000e-01 : f32
    %611 = vector.broadcast %cst_258 : f32 to vector<2x32xf32>
    %612 = arith.mulf %610, %611 : vector<2x32xf32>
    %cst_259 = arith.constant 5.000000e-01 : f32
    %613 = vector.broadcast %cst_259 : f32 to vector<2x32xf32>
    %614 = arith.addf %612, %613 : vector<2x32xf32>
    %615 = vector.extract_strided_slice %609 {offsets = [0, 32], sizes = [2, 32], strides = [1, 1]} : vector<2x128xf32> to vector<2x32xf32>
    %cst_260 = arith.constant 5.000000e-01 : f32
    %616 = vector.broadcast %cst_260 : f32 to vector<2x32xf32>
    %617 = arith.mulf %615, %616 : vector<2x32xf32>
    %cst_261 = arith.constant 5.000000e-01 : f32
    %618 = vector.broadcast %cst_261 : f32 to vector<2x32xf32>
    %619 = arith.addf %617, %618 : vector<2x32xf32>
    %620 = vector.extract_strided_slice %609 {offsets = [0, 64], sizes = [2, 32], strides = [1, 1]} : vector<2x128xf32> to vector<2x32xf32>
    %621 = vector.extract_strided_slice %609 {offsets = [0, 96], sizes = [2, 32], strides = [1, 1]} : vector<2x128xf32> to vector<2x32xf32>
    %cst_262 = arith.constant 5.000000e-01 : f32
    %622 = vector.broadcast %cst_262 : f32 to vector<2x32xf32>
    %623 = arith.mulf %621, %622 : vector<2x32xf32>
    %cst_263 = arith.constant 5.000000e-01 : f32
    %624 = vector.broadcast %cst_263 : f32 to vector<2x32xf32>
    %625 = arith.addf %623, %624 : vector<2x32xf32>
    %626 = arith.mulf %619, %568 : vector<2x32xf32>
    %627 = arith.mulf %614, %620 : vector<2x32xf32>
    %628 = arith.addf %626, %627 : vector<2x32xf32>
    %629 = math.tanh %628 : vector<2x32xf32>
    %630 = arith.mulf %625, %629 : vector<2x32xf32>
    %c0_264 = arith.constant 0 : index
    %c0_265 = arith.constant 0 : index
    %631 = vector.load %arg14[%c0_264, %c0_265] : memref<32x8xf32, #tpu.memory_space<vmem>>, vector<32x8xf32>
    %cst_266 = arith.constant dense<0.000000e+00> : vector<2x8xf32>
    %632 = tpu.matmul %630, %631, %cst_266 {dimension_numbers = #tpu.dot_dimension_numbers<[1], [0], [0], [1], [0, 0, 1, 1], [], []>} : vector<2x32xf32>, vector<32x8xf32>, vector<2x8xf32> -> vector<2x8xf32>
    %633 = arith.addf %632, %14 : vector<2x8xf32>
    %c0_267 = arith.constant 0 : index
    %c40 = arith.constant 40 : index
    %634 = vector.load %arg16[%c0_267, %c40] : memref<2x64xf32, #tpu.memory_space<vmem>>, vector<2x8xf32>
    tpu.vector_store %arg16[%c0_267, %c40], %633 {strides = array<i32>} : memref<2x64xf32, #tpu.memory_space<vmem>>, vector<2x8xf32>,
    %c0_268 = arith.constant 0 : index
    %c0_269 = arith.constant 0 : index
    %635 = vector.load %arg9[%c0_268, %c0_269] : memref<32x128xf32, #tpu.memory_space<vmem>>, vector<32x128xf32>
    %cst_270 = arith.constant dense<0.000000e+00> : vector<2x128xf32>
    %636 = tpu.matmul %630, %635, %cst_270 {dimension_numbers = #tpu.dot_dimension_numbers<[1], [0], [0], [1], [0, 0, 1, 1], [], []>} : vector<2x32xf32>, vector<32x128xf32>, vector<2x128xf32> -> vector<2x128xf32>
    %c0_271 = arith.constant 0 : index
    %c0_272 = arith.constant 0 : index
    %637 = vector.load %arg7[%c0_271, %c0_272] : memref<32x128xf32, #tpu.memory_space<vmem>>, vector<32x128xf32>
    %cst_273 = arith.constant dense<0.000000e+00> : vector<2x128xf32>
    %638 = tpu.matmul %602, %637, %cst_273 {dimension_numbers = #tpu.dot_dimension_numbers<[1], [0], [0], [1], [0, 0, 1, 1], [], []>} : vector<2x32xf32>, vector<32x128xf32>, vector<2x128xf32> -> vector<2x128xf32>
    %639 = arith.addf %636, %638 : vector<2x128xf32>
    %640 = arith.addf %639, %8 : vector<2x128xf32>
    %641 = math.tanh %640 : vector<2x128xf32>
    %642 = vector.extract_strided_slice %641 {offsets = [0, 0], sizes = [2, 32], strides = [1, 1]} : vector<2x128xf32> to vector<2x32xf32>
    %cst_274 = arith.constant 5.000000e-01 : f32
    %643 = vector.broadcast %cst_274 : f32 to vector<2x32xf32>
    %644 = arith.mulf %642, %643 : vector<2x32xf32>
    %cst_275 = arith.constant 5.000000e-01 : f32
    %645 = vector.broadcast %cst_275 : f32 to vector<2x32xf32>
    %646 = arith.addf %644, %645 : vector<2x32xf32>
    %647 = vector.extract_strided_slice %641 {offsets = [0, 32], sizes = [2, 32], strides = [1, 1]} : vector<2x128xf32> to vector<2x32xf32>
    %cst_276 = arith.constant 5.000000e-01 : f32
    %648 = vector.broadcast %cst_276 : f32 to vector<2x32xf32>
    %649 = arith.mulf %647, %648 : vector<2x32xf32>
    %cst_277 = arith.constant 5.000000e-01 : f32
    %650 = vector.broadcast %cst_277 : f32 to vector<2x32xf32>
    %651 = arith.addf %649, %650 : vector<2x32xf32>
    %652 = vector.extract_strided_slice %641 {offsets = [0, 64], sizes = [2, 32], strides = [1, 1]} : vector<2x128xf32> to vector<2x32xf32>
    %653 = vector.extract_strided_slice %641 {offsets = [0, 96], sizes = [2, 32], strides = [1, 1]} : vector<2x128xf32> to vector<2x32xf32>
    %cst_278 = arith.constant 5.000000e-01 : f32
    %654 = vector.broadcast %cst_278 : f32 to vector<2x32xf32>
    %655 = arith.mulf %653, %654 : vector<2x32xf32>
    %cst_279 = arith.constant 5.000000e-01 : f32
    %656 = vector.broadcast %cst_279 : f32 to vector<2x32xf32>
    %657 = arith.addf %655, %656 : vector<2x32xf32>
    %658 = arith.mulf %651, %600 : vector<2x32xf32>
    %659 = arith.mulf %646, %652 : vector<2x32xf32>
    %660 = arith.addf %658, %659 : vector<2x32xf32>
    %661 = math.tanh %660 : vector<2x32xf32>
    %662 = arith.mulf %657, %661 : vector<2x32xf32>
    %c0_280 = arith.constant 0 : index
    %c0_281 = arith.constant 0 : index
    %663 = vector.load %arg11[%c0_280, %c0_281] : memref<32x128xf32, #tpu.memory_space<vmem>>, vector<32x128xf32>
    %cst_282 = arith.constant dense<0.000000e+00> : vector<2x128xf32>
    %664 = tpu.matmul %662, %663, %cst_282 {dimension_numbers = #tpu.dot_dimension_numbers<[1], [0], [0], [1], [0, 0, 1, 1], [], []>} : vector<2x32xf32>, vector<32x128xf32>, vector<2x128xf32> -> vector<2x128xf32>
    %c0_283 = arith.constant 0 : index
    %c0_284 = arith.constant 0 : index
    %665 = vector.load %arg12[%c0_283, %c0_284] : memref<32x128xf32, #tpu.memory_space<vmem>>, vector<32x128xf32>
    %cst_285 = arith.constant dense<0.000000e+00> : vector<2x128xf32>
    %666 = tpu.matmul %630, %665, %cst_285 {dimension_numbers = #tpu.dot_dimension_numbers<[1], [0], [0], [1], [0, 0, 1, 1], [], []>} : vector<2x32xf32>, vector<32x128xf32>, vector<2x128xf32> -> vector<2x128xf32>
    %667 = arith.addf %664, %666 : vector<2x128xf32>
    %668 = arith.addf %667, %11 : vector<2x128xf32>
    %669 = math.tanh %668 : vector<2x128xf32>
    %670 = vector.extract_strided_slice %669 {offsets = [0, 0], sizes = [2, 32], strides = [1, 1]} : vector<2x128xf32> to vector<2x32xf32>
    %cst_286 = arith.constant 5.000000e-01 : f32
    %671 = vector.broadcast %cst_286 : f32 to vector<2x32xf32>
    %672 = arith.mulf %670, %671 : vector<2x32xf32>
    %cst_287 = arith.constant 5.000000e-01 : f32
    %673 = vector.broadcast %cst_287 : f32 to vector<2x32xf32>
    %674 = arith.addf %672, %673 : vector<2x32xf32>
    %675 = vector.extract_strided_slice %669 {offsets = [0, 32], sizes = [2, 32], strides = [1, 1]} : vector<2x128xf32> to vector<2x32xf32>
    %cst_288 = arith.constant 5.000000e-01 : f32
    %676 = vector.broadcast %cst_288 : f32 to vector<2x32xf32>
    %677 = arith.mulf %675, %676 : vector<2x32xf32>
    %cst_289 = arith.constant 5.000000e-01 : f32
    %678 = vector.broadcast %cst_289 : f32 to vector<2x32xf32>
    %679 = arith.addf %677, %678 : vector<2x32xf32>
    %680 = vector.extract_strided_slice %669 {offsets = [0, 64], sizes = [2, 32], strides = [1, 1]} : vector<2x128xf32> to vector<2x32xf32>
    %681 = vector.extract_strided_slice %669 {offsets = [0, 96], sizes = [2, 32], strides = [1, 1]} : vector<2x128xf32> to vector<2x32xf32>
    %cst_290 = arith.constant 5.000000e-01 : f32
    %682 = vector.broadcast %cst_290 : f32 to vector<2x32xf32>
    %683 = arith.mulf %681, %682 : vector<2x32xf32>
    %cst_291 = arith.constant 5.000000e-01 : f32
    %684 = vector.broadcast %cst_291 : f32 to vector<2x32xf32>
    %685 = arith.addf %683, %684 : vector<2x32xf32>
    %686 = arith.mulf %679, %628 : vector<2x32xf32>
    %687 = arith.mulf %674, %680 : vector<2x32xf32>
    %688 = arith.addf %686, %687 : vector<2x32xf32>
    %689 = math.tanh %688 : vector<2x32xf32>
    %690 = arith.mulf %685, %689 : vector<2x32xf32>
    %c0_292 = arith.constant 0 : index
    %c0_293 = arith.constant 0 : index
    %691 = vector.load %arg14[%c0_292, %c0_293] : memref<32x8xf32, #tpu.memory_space<vmem>>, vector<32x8xf32>
    %cst_294 = arith.constant dense<0.000000e+00> : vector<2x8xf32>
    %692 = tpu.matmul %690, %691, %cst_294 {dimension_numbers = #tpu.dot_dimension_numbers<[1], [0], [0], [1], [0, 0, 1, 1], [], []>} : vector<2x32xf32>, vector<32x8xf32>, vector<2x8xf32> -> vector<2x8xf32>
    %693 = arith.addf %692, %14 : vector<2x8xf32>
    %c0_295 = arith.constant 0 : index
    %c32 = arith.constant 32 : index
    %694 = vector.load %arg16[%c0_295, %c32] : memref<2x64xf32, #tpu.memory_space<vmem>>, vector<2x8xf32>
    tpu.vector_store %arg16[%c0_295, %c32], %693 {strides = array<i32>} : memref<2x64xf32, #tpu.memory_space<vmem>>, vector<2x8xf32>,
    %c0_296 = arith.constant 0 : index
    %c0_297 = arith.constant 0 : index
    %695 = vector.load %arg9[%c0_296, %c0_297] : memref<32x128xf32, #tpu.memory_space<vmem>>, vector<32x128xf32>
    %cst_298 = arith.constant dense<0.000000e+00> : vector<2x128xf32>
    %696 = tpu.matmul %690, %695, %cst_298 {dimension_numbers = #tpu.dot_dimension_numbers<[1], [0], [0], [1], [0, 0, 1, 1], [], []>} : vector<2x32xf32>, vector<32x128xf32>, vector<2x128xf32> -> vector<2x128xf32>
    %c0_299 = arith.constant 0 : index
    %c0_300 = arith.constant 0 : index
    %697 = vector.load %arg7[%c0_299, %c0_300] : memref<32x128xf32, #tpu.memory_space<vmem>>, vector<32x128xf32>
    %cst_301 = arith.constant dense<0.000000e+00> : vector<2x128xf32>
    %698 = tpu.matmul %662, %697, %cst_301 {dimension_numbers = #tpu.dot_dimension_numbers<[1], [0], [0], [1], [0, 0, 1, 1], [], []>} : vector<2x32xf32>, vector<32x128xf32>, vector<2x128xf32> -> vector<2x128xf32>
    %699 = arith.addf %696, %698 : vector<2x128xf32>
    %700 = arith.addf %699, %8 : vector<2x128xf32>
    %701 = math.tanh %700 : vector<2x128xf32>
    %702 = vector.extract_strided_slice %701 {offsets = [0, 0], sizes = [2, 32], strides = [1, 1]} : vector<2x128xf32> to vector<2x32xf32>
    %cst_302 = arith.constant 5.000000e-01 : f32
    %703 = vector.broadcast %cst_302 : f32 to vector<2x32xf32>
    %704 = arith.mulf %702, %703 : vector<2x32xf32>
    %cst_303 = arith.constant 5.000000e-01 : f32
    %705 = vector.broadcast %cst_303 : f32 to vector<2x32xf32>
    %706 = arith.addf %704, %705 : vector<2x32xf32>
    %707 = vector.extract_strided_slice %701 {offsets = [0, 32], sizes = [2, 32], strides = [1, 1]} : vector<2x128xf32> to vector<2x32xf32>
    %cst_304 = arith.constant 5.000000e-01 : f32
    %708 = vector.broadcast %cst_304 : f32 to vector<2x32xf32>
    %709 = arith.mulf %707, %708 : vector<2x32xf32>
    %cst_305 = arith.constant 5.000000e-01 : f32
    %710 = vector.broadcast %cst_305 : f32 to vector<2x32xf32>
    %711 = arith.addf %709, %710 : vector<2x32xf32>
    %712 = vector.extract_strided_slice %701 {offsets = [0, 64], sizes = [2, 32], strides = [1, 1]} : vector<2x128xf32> to vector<2x32xf32>
    %713 = vector.extract_strided_slice %701 {offsets = [0, 96], sizes = [2, 32], strides = [1, 1]} : vector<2x128xf32> to vector<2x32xf32>
    %cst_306 = arith.constant 5.000000e-01 : f32
    %714 = vector.broadcast %cst_306 : f32 to vector<2x32xf32>
    %715 = arith.mulf %713, %714 : vector<2x32xf32>
    %cst_307 = arith.constant 5.000000e-01 : f32
    %716 = vector.broadcast %cst_307 : f32 to vector<2x32xf32>
    %717 = arith.addf %715, %716 : vector<2x32xf32>
    %718 = arith.mulf %711, %660 : vector<2x32xf32>
    %719 = arith.mulf %706, %712 : vector<2x32xf32>
    %720 = arith.addf %718, %719 : vector<2x32xf32>
    %721 = math.tanh %720 : vector<2x32xf32>
    %722 = arith.mulf %717, %721 : vector<2x32xf32>
    %c0_308 = arith.constant 0 : index
    %c0_309 = arith.constant 0 : index
    %723 = vector.load %arg11[%c0_308, %c0_309] : memref<32x128xf32, #tpu.memory_space<vmem>>, vector<32x128xf32>
    %cst_310 = arith.constant dense<0.000000e+00> : vector<2x128xf32>
    %724 = tpu.matmul %722, %723, %cst_310 {dimension_numbers = #tpu.dot_dimension_numbers<[1], [0], [0], [1], [0, 0, 1, 1], [], []>} : vector<2x32xf32>, vector<32x128xf32>, vector<2x128xf32> -> vector<2x128xf32>
    %c0_311 = arith.constant 0 : index
    %c0_312 = arith.constant 0 : index
    %725 = vector.load %arg12[%c0_311, %c0_312] : memref<32x128xf32, #tpu.memory_space<vmem>>, vector<32x128xf32>
    %cst_313 = arith.constant dense<0.000000e+00> : vector<2x128xf32>
    %726 = tpu.matmul %690, %725, %cst_313 {dimension_numbers = #tpu.dot_dimension_numbers<[1], [0], [0], [1], [0, 0, 1, 1], [], []>} : vector<2x32xf32>, vector<32x128xf32>, vector<2x128xf32> -> vector<2x128xf32>
    %727 = arith.addf %724, %726 : vector<2x128xf32>
    %728 = arith.addf %727, %11 : vector<2x128xf32>
    %729 = math.tanh %728 : vector<2x128xf32>
    %730 = vector.extract_strided_slice %729 {offsets = [0, 0], sizes = [2, 32], strides = [1, 1]} : vector<2x128xf32> to vector<2x32xf32>
    %cst_314 = arith.constant 5.000000e-01 : f32
    %731 = vector.broadcast %cst_314 : f32 to vector<2x32xf32>
    %732 = arith.mulf %730, %731 : vector<2x32xf32>
    %cst_315 = arith.constant 5.000000e-01 : f32
    %733 = vector.broadcast %cst_315 : f32 to vector<2x32xf32>
    %734 = arith.addf %732, %733 : vector<2x32xf32>
    %735 = vector.extract_strided_slice %729 {offsets = [0, 32], sizes = [2, 32], strides = [1, 1]} : vector<2x128xf32> to vector<2x32xf32>
    %cst_316 = arith.constant 5.000000e-01 : f32
    %736 = vector.broadcast %cst_316 : f32 to vector<2x32xf32>
    %737 = arith.mulf %735, %736 : vector<2x32xf32>
    %cst_317 = arith.constant 5.000000e-01 : f32
    %738 = vector.broadcast %cst_317 : f32 to vector<2x32xf32>
    %739 = arith.addf %737, %738 : vector<2x32xf32>
    %740 = vector.extract_strided_slice %729 {offsets = [0, 64], sizes = [2, 32], strides = [1, 1]} : vector<2x128xf32> to vector<2x32xf32>
    %741 = vector.extract_strided_slice %729 {offsets = [0, 96], sizes = [2, 32], strides = [1, 1]} : vector<2x128xf32> to vector<2x32xf32>
    %cst_318 = arith.constant 5.000000e-01 : f32
    %742 = vector.broadcast %cst_318 : f32 to vector<2x32xf32>
    %743 = arith.mulf %741, %742 : vector<2x32xf32>
    %cst_319 = arith.constant 5.000000e-01 : f32
    %744 = vector.broadcast %cst_319 : f32 to vector<2x32xf32>
    %745 = arith.addf %743, %744 : vector<2x32xf32>
    %746 = arith.mulf %739, %688 : vector<2x32xf32>
    %747 = arith.mulf %734, %740 : vector<2x32xf32>
    %748 = arith.addf %746, %747 : vector<2x32xf32>
    %749 = math.tanh %748 : vector<2x32xf32>
    %750 = arith.mulf %745, %749 : vector<2x32xf32>
    %c0_320 = arith.constant 0 : index
    %c0_321 = arith.constant 0 : index
    %751 = vector.load %arg14[%c0_320, %c0_321] : memref<32x8xf32, #tpu.memory_space<vmem>>, vector<32x8xf32>
    %cst_322 = arith.constant dense<0.000000e+00> : vector<2x8xf32>
    %752 = tpu.matmul %750, %751, %cst_322 {dimension_numbers = #tpu.dot_dimension_numbers<[1], [0], [0], [1], [0, 0, 1, 1], [], []>} : vector<2x32xf32>, vector<32x8xf32>, vector<2x8xf32> -> vector<2x8xf32>
    %753 = arith.addf %752, %14 : vector<2x8xf32>
    %c0_323 = arith.constant 0 : index
    %c24 = arith.constant 24 : index
    %754 = vector.load %arg16[%c0_323, %c24] : memref<2x64xf32, #tpu.memory_space<vmem>>, vector<2x8xf32>
    tpu.vector_store %arg16[%c0_323, %c24], %753 {strides = array<i32>} : memref<2x64xf32, #tpu.memory_space<vmem>>, vector<2x8xf32>,
    %c0_324 = arith.constant 0 : index
    %c0_325 = arith.constant 0 : index
    %755 = vector.load %arg9[%c0_324, %c0_325] : memref<32x128xf32, #tpu.memory_space<vmem>>, vector<32x128xf32>
    %cst_326 = arith.constant dense<0.000000e+00> : vector<2x128xf32>
    %756 = tpu.matmul %750, %755, %cst_326 {dimension_numbers = #tpu.dot_dimension_numbers<[1], [0], [0], [1], [0, 0, 1, 1], [], []>} : vector<2x32xf32>, vector<32x128xf32>, vector<2x128xf32> -> vector<2x128xf32>
    %c0_327 = arith.constant 0 : index
    %c0_328 = arith.constant 0 : index
    %757 = vector.load %arg7[%c0_327, %c0_328] : memref<32x128xf32, #tpu.memory_space<vmem>>, vector<32x128xf32>
    %cst_329 = arith.constant dense<0.000000e+00> : vector<2x128xf32>
    %758 = tpu.matmul %722, %757, %cst_329 {dimension_numbers = #tpu.dot_dimension_numbers<[1], [0], [0], [1], [0, 0, 1, 1], [], []>} : vector<2x32xf32>, vector<32x128xf32>, vector<2x128xf32> -> vector<2x128xf32>
    %759 = arith.addf %756, %758 : vector<2x128xf32>
    %760 = arith.addf %759, %8 : vector<2x128xf32>
    %761 = math.tanh %760 : vector<2x128xf32>
    %762 = vector.extract_strided_slice %761 {offsets = [0, 0], sizes = [2, 32], strides = [1, 1]} : vector<2x128xf32> to vector<2x32xf32>
    %cst_330 = arith.constant 5.000000e-01 : f32
    %763 = vector.broadcast %cst_330 : f32 to vector<2x32xf32>
    %764 = arith.mulf %762, %763 : vector<2x32xf32>
    %cst_331 = arith.constant 5.000000e-01 : f32
    %765 = vector.broadcast %cst_331 : f32 to vector<2x32xf32>
    %766 = arith.addf %764, %765 : vector<2x32xf32>
    %767 = vector.extract_strided_slice %761 {offsets = [0, 32], sizes = [2, 32], strides = [1, 1]} : vector<2x128xf32> to vector<2x32xf32>
    %cst_332 = arith.constant 5.000000e-01 : f32
    %768 = vector.broadcast %cst_332 : f32 to vector<2x32xf32>
    %769 = arith.mulf %767, %768 : vector<2x32xf32>
    %cst_333 = arith.constant 5.000000e-01 : f32
    %770 = vector.broadcast %cst_333 : f32 to vector<2x32xf32>
    %771 = arith.addf %769, %770 : vector<2x32xf32>
    %772 = vector.extract_strided_slice %761 {offsets = [0, 64], sizes = [2, 32], strides = [1, 1]} : vector<2x128xf32> to vector<2x32xf32>
    %773 = vector.extract_strided_slice %761 {offsets = [0, 96], sizes = [2, 32], strides = [1, 1]} : vector<2x128xf32> to vector<2x32xf32>
    %cst_334 = arith.constant 5.000000e-01 : f32
    %774 = vector.broadcast %cst_334 : f32 to vector<2x32xf32>
    %775 = arith.mulf %773, %774 : vector<2x32xf32>
    %cst_335 = arith.constant 5.000000e-01 : f32
    %776 = vector.broadcast %cst_335 : f32 to vector<2x32xf32>
    %777 = arith.addf %775, %776 : vector<2x32xf32>
    %778 = arith.mulf %771, %720 : vector<2x32xf32>
    %779 = arith.mulf %766, %772 : vector<2x32xf32>
    %780 = arith.addf %778, %779 : vector<2x32xf32>
    %781 = math.tanh %780 : vector<2x32xf32>
    %782 = arith.mulf %777, %781 : vector<2x32xf32>
    %c0_336 = arith.constant 0 : index
    %c0_337 = arith.constant 0 : index
    %783 = vector.load %arg11[%c0_336, %c0_337] : memref<32x128xf32, #tpu.memory_space<vmem>>, vector<32x128xf32>
    %cst_338 = arith.constant dense<0.000000e+00> : vector<2x128xf32>
    %784 = tpu.matmul %782, %783, %cst_338 {dimension_numbers = #tpu.dot_dimension_numbers<[1], [0], [0], [1], [0, 0, 1, 1], [], []>} : vector<2x32xf32>, vector<32x128xf32>, vector<2x128xf32> -> vector<2x128xf32>
    %c0_339 = arith.constant 0 : index
    %c0_340 = arith.constant 0 : index
    %785 = vector.load %arg12[%c0_339, %c0_340] : memref<32x128xf32, #tpu.memory_space<vmem>>, vector<32x128xf32>
    %cst_341 = arith.constant dense<0.000000e+00> : vector<2x128xf32>
    %786 = tpu.matmul %750, %785, %cst_341 {dimension_numbers = #tpu.dot_dimension_numbers<[1], [0], [0], [1], [0, 0, 1, 1], [], []>} : vector<2x32xf32>, vector<32x128xf32>, vector<2x128xf32> -> vector<2x128xf32>
    %787 = arith.addf %784, %786 : vector<2x128xf32>
    %788 = arith.addf %787, %11 : vector<2x128xf32>
    %789 = math.tanh %788 : vector<2x128xf32>
    %790 = vector.extract_strided_slice %789 {offsets = [0, 0], sizes = [2, 32], strides = [1, 1]} : vector<2x128xf32> to vector<2x32xf32>
    %cst_342 = arith.constant 5.000000e-01 : f32
    %791 = vector.broadcast %cst_342 : f32 to vector<2x32xf32>
    %792 = arith.mulf %790, %791 : vector<2x32xf32>
    %cst_343 = arith.constant 5.000000e-01 : f32
    %793 = vector.broadcast %cst_343 : f32 to vector<2x32xf32>
    %794 = arith.addf %792, %793 : vector<2x32xf32>
    %795 = vector.extract_strided_slice %789 {offsets = [0, 32], sizes = [2, 32], strides = [1, 1]} : vector<2x128xf32> to vector<2x32xf32>
    %cst_344 = arith.constant 5.000000e-01 : f32
    %796 = vector.broadcast %cst_344 : f32 to vector<2x32xf32>
    %797 = arith.mulf %795, %796 : vector<2x32xf32>
    %cst_345 = arith.constant 5.000000e-01 : f32
    %798 = vector.broadcast %cst_345 : f32 to vector<2x32xf32>
    %799 = arith.addf %797, %798 : vector<2x32xf32>
    %800 = vector.extract_strided_slice %789 {offsets = [0, 64], sizes = [2, 32], strides = [1, 1]} : vector<2x128xf32> to vector<2x32xf32>
    %801 = vector.extract_strided_slice %789 {offsets = [0, 96], sizes = [2, 32], strides = [1, 1]} : vector<2x128xf32> to vector<2x32xf32>
    %cst_346 = arith.constant 5.000000e-01 : f32
    %802 = vector.broadcast %cst_346 : f32 to vector<2x32xf32>
    %803 = arith.mulf %801, %802 : vector<2x32xf32>
    %cst_347 = arith.constant 5.000000e-01 : f32
    %804 = vector.broadcast %cst_347 : f32 to vector<2x32xf32>
    %805 = arith.addf %803, %804 : vector<2x32xf32>
    %806 = arith.mulf %799, %748 : vector<2x32xf32>
    %807 = arith.mulf %794, %800 : vector<2x32xf32>
    %808 = arith.addf %806, %807 : vector<2x32xf32>
    %809 = math.tanh %808 : vector<2x32xf32>
    %810 = arith.mulf %805, %809 : vector<2x32xf32>
    %c0_348 = arith.constant 0 : index
    %c0_349 = arith.constant 0 : index
    %811 = vector.load %arg14[%c0_348, %c0_349] : memref<32x8xf32, #tpu.memory_space<vmem>>, vector<32x8xf32>
    %cst_350 = arith.constant dense<0.000000e+00> : vector<2x8xf32>
    %812 = tpu.matmul %810, %811, %cst_350 {dimension_numbers = #tpu.dot_dimension_numbers<[1], [0], [0], [1], [0, 0, 1, 1], [], []>} : vector<2x32xf32>, vector<32x8xf32>, vector<2x8xf32> -> vector<2x8xf32>
    %813 = arith.addf %812, %14 : vector<2x8xf32>
    %c0_351 = arith.constant 0 : index
    %c16 = arith.constant 16 : index
    %814 = vector.load %arg16[%c0_351, %c16] : memref<2x64xf32, #tpu.memory_space<vmem>>, vector<2x8xf32>
    tpu.vector_store %arg16[%c0_351, %c16], %813 {strides = array<i32>} : memref<2x64xf32, #tpu.memory_space<vmem>>, vector<2x8xf32>,
    %c0_352 = arith.constant 0 : index
    %c0_353 = arith.constant 0 : index
    %815 = vector.load %arg9[%c0_352, %c0_353] : memref<32x128xf32, #tpu.memory_space<vmem>>, vector<32x128xf32>
    %cst_354 = arith.constant dense<0.000000e+00> : vector<2x128xf32>
    %816 = tpu.matmul %810, %815, %cst_354 {dimension_numbers = #tpu.dot_dimension_numbers<[1], [0], [0], [1], [0, 0, 1, 1], [], []>} : vector<2x32xf32>, vector<32x128xf32>, vector<2x128xf32> -> vector<2x128xf32>
    %c0_355 = arith.constant 0 : index
    %c0_356 = arith.constant 0 : index
    %817 = vector.load %arg7[%c0_355, %c0_356] : memref<32x128xf32, #tpu.memory_space<vmem>>, vector<32x128xf32>
    %cst_357 = arith.constant dense<0.000000e+00> : vector<2x128xf32>
    %818 = tpu.matmul %782, %817, %cst_357 {dimension_numbers = #tpu.dot_dimension_numbers<[1], [0], [0], [1], [0, 0, 1, 1], [], []>} : vector<2x32xf32>, vector<32x128xf32>, vector<2x128xf32> -> vector<2x128xf32>
    %819 = arith.addf %816, %818 : vector<2x128xf32>
    %820 = arith.addf %819, %8 : vector<2x128xf32>
    %821 = math.tanh %820 : vector<2x128xf32>
    %822 = vector.extract_strided_slice %821 {offsets = [0, 0], sizes = [2, 32], strides = [1, 1]} : vector<2x128xf32> to vector<2x32xf32>
    %cst_358 = arith.constant 5.000000e-01 : f32
    %823 = vector.broadcast %cst_358 : f32 to vector<2x32xf32>
    %824 = arith.mulf %822, %823 : vector<2x32xf32>
    %cst_359 = arith.constant 5.000000e-01 : f32
    %825 = vector.broadcast %cst_359 : f32 to vector<2x32xf32>
    %826 = arith.addf %824, %825 : vector<2x32xf32>
    %827 = vector.extract_strided_slice %821 {offsets = [0, 32], sizes = [2, 32], strides = [1, 1]} : vector<2x128xf32> to vector<2x32xf32>
    %cst_360 = arith.constant 5.000000e-01 : f32
    %828 = vector.broadcast %cst_360 : f32 to vector<2x32xf32>
    %829 = arith.mulf %827, %828 : vector<2x32xf32>
    %cst_361 = arith.constant 5.000000e-01 : f32
    %830 = vector.broadcast %cst_361 : f32 to vector<2x32xf32>
    %831 = arith.addf %829, %830 : vector<2x32xf32>
    %832 = vector.extract_strided_slice %821 {offsets = [0, 64], sizes = [2, 32], strides = [1, 1]} : vector<2x128xf32> to vector<2x32xf32>
    %833 = vector.extract_strided_slice %821 {offsets = [0, 96], sizes = [2, 32], strides = [1, 1]} : vector<2x128xf32> to vector<2x32xf32>
    %cst_362 = arith.constant 5.000000e-01 : f32
    %834 = vector.broadcast %cst_362 : f32 to vector<2x32xf32>
    %835 = arith.mulf %833, %834 : vector<2x32xf32>
    %cst_363 = arith.constant 5.000000e-01 : f32
    %836 = vector.broadcast %cst_363 : f32 to vector<2x32xf32>
    %837 = arith.addf %835, %836 : vector<2x32xf32>
    %838 = arith.mulf %831, %780 : vector<2x32xf32>
    %839 = arith.mulf %826, %832 : vector<2x32xf32>
    %840 = arith.addf %838, %839 : vector<2x32xf32>
    %841 = math.tanh %840 : vector<2x32xf32>
    %842 = arith.mulf %837, %841 : vector<2x32xf32>
    %c0_364 = arith.constant 0 : index
    %c0_365 = arith.constant 0 : index
    %843 = vector.load %arg11[%c0_364, %c0_365] : memref<32x128xf32, #tpu.memory_space<vmem>>, vector<32x128xf32>
    %cst_366 = arith.constant dense<0.000000e+00> : vector<2x128xf32>
    %844 = tpu.matmul %842, %843, %cst_366 {dimension_numbers = #tpu.dot_dimension_numbers<[1], [0], [0], [1], [0, 0, 1, 1], [], []>} : vector<2x32xf32>, vector<32x128xf32>, vector<2x128xf32> -> vector<2x128xf32>
    %c0_367 = arith.constant 0 : index
    %c0_368 = arith.constant 0 : index
    %845 = vector.load %arg12[%c0_367, %c0_368] : memref<32x128xf32, #tpu.memory_space<vmem>>, vector<32x128xf32>
    %cst_369 = arith.constant dense<0.000000e+00> : vector<2x128xf32>
    %846 = tpu.matmul %810, %845, %cst_369 {dimension_numbers = #tpu.dot_dimension_numbers<[1], [0], [0], [1], [0, 0, 1, 1], [], []>} : vector<2x32xf32>, vector<32x128xf32>, vector<2x128xf32> -> vector<2x128xf32>
    %847 = arith.addf %844, %846 : vector<2x128xf32>
    %848 = arith.addf %847, %11 : vector<2x128xf32>
    %849 = math.tanh %848 : vector<2x128xf32>
    %850 = vector.extract_strided_slice %849 {offsets = [0, 0], sizes = [2, 32], strides = [1, 1]} : vector<2x128xf32> to vector<2x32xf32>
    %cst_370 = arith.constant 5.000000e-01 : f32
    %851 = vector.broadcast %cst_370 : f32 to vector<2x32xf32>
    %852 = arith.mulf %850, %851 : vector<2x32xf32>
    %cst_371 = arith.constant 5.000000e-01 : f32
    %853 = vector.broadcast %cst_371 : f32 to vector<2x32xf32>
    %854 = arith.addf %852, %853 : vector<2x32xf32>
    %855 = vector.extract_strided_slice %849 {offsets = [0, 32], sizes = [2, 32], strides = [1, 1]} : vector<2x128xf32> to vector<2x32xf32>
    %cst_372 = arith.constant 5.000000e-01 : f32
    %856 = vector.broadcast %cst_372 : f32 to vector<2x32xf32>
    %857 = arith.mulf %855, %856 : vector<2x32xf32>
    %cst_373 = arith.constant 5.000000e-01 : f32
    %858 = vector.broadcast %cst_373 : f32 to vector<2x32xf32>
    %859 = arith.addf %857, %858 : vector<2x32xf32>
    %860 = vector.extract_strided_slice %849 {offsets = [0, 64], sizes = [2, 32], strides = [1, 1]} : vector<2x128xf32> to vector<2x32xf32>
    %861 = vector.extract_strided_slice %849 {offsets = [0, 96], sizes = [2, 32], strides = [1, 1]} : vector<2x128xf32> to vector<2x32xf32>
    %cst_374 = arith.constant 5.000000e-01 : f32
    %862 = vector.broadcast %cst_374 : f32 to vector<2x32xf32>
    %863 = arith.mulf %861, %862 : vector<2x32xf32>
    %cst_375 = arith.constant 5.000000e-01 : f32
    %864 = vector.broadcast %cst_375 : f32 to vector<2x32xf32>
    %865 = arith.addf %863, %864 : vector<2x32xf32>
    %866 = arith.mulf %859, %808 : vector<2x32xf32>
    %867 = arith.mulf %854, %860 : vector<2x32xf32>
    %868 = arith.addf %866, %867 : vector<2x32xf32>
    %869 = math.tanh %868 : vector<2x32xf32>
    %870 = arith.mulf %865, %869 : vector<2x32xf32>
    %c0_376 = arith.constant 0 : index
    %c0_377 = arith.constant 0 : index
    %871 = vector.load %arg14[%c0_376, %c0_377] : memref<32x8xf32, #tpu.memory_space<vmem>>, vector<32x8xf32>
    %cst_378 = arith.constant dense<0.000000e+00> : vector<2x8xf32>
    %872 = tpu.matmul %870, %871, %cst_378 {dimension_numbers = #tpu.dot_dimension_numbers<[1], [0], [0], [1], [0, 0, 1, 1], [], []>} : vector<2x32xf32>, vector<32x8xf32>, vector<2x8xf32> -> vector<2x8xf32>
    %873 = arith.addf %872, %14 : vector<2x8xf32>
    %c0_379 = arith.constant 0 : index
    %c8 = arith.constant 8 : index
    %874 = vector.load %arg16[%c0_379, %c8] : memref<2x64xf32, #tpu.memory_space<vmem>>, vector<2x8xf32>
    tpu.vector_store %arg16[%c0_379, %c8], %873 {strides = array<i32>} : memref<2x64xf32, #tpu.memory_space<vmem>>, vector<2x8xf32>,
    %c0_380 = arith.constant 0 : index
    %c0_381 = arith.constant 0 : index
    %875 = vector.load %arg9[%c0_380, %c0_381] : memref<32x128xf32, #tpu.memory_space<vmem>>, vector<32x128xf32>
    %cst_382 = arith.constant dense<0.000000e+00> : vector<2x128xf32>
    %876 = tpu.matmul %870, %875, %cst_382 {dimension_numbers = #tpu.dot_dimension_numbers<[1], [0], [0], [1], [0, 0, 1, 1], [], []>} : vector<2x32xf32>, vector<32x128xf32>, vector<2x128xf32> -> vector<2x128xf32>
    %c0_383 = arith.constant 0 : index
    %c0_384 = arith.constant 0 : index
    %877 = vector.load %arg7[%c0_383, %c0_384] : memref<32x128xf32, #tpu.memory_space<vmem>>, vector<32x128xf32>
    %cst_385 = arith.constant dense<0.000000e+00> : vector<2x128xf32>
    %878 = tpu.matmul %842, %877, %cst_385 {dimension_numbers = #tpu.dot_dimension_numbers<[1], [0], [0], [1], [0, 0, 1, 1], [], []>} : vector<2x32xf32>, vector<32x128xf32>, vector<2x128xf32> -> vector<2x128xf32>
    %879 = arith.addf %876, %878 : vector<2x128xf32>
    %880 = arith.addf %879, %8 : vector<2x128xf32>
    %881 = math.tanh %880 : vector<2x128xf32>
    %882 = vector.extract_strided_slice %881 {offsets = [0, 0], sizes = [2, 32], strides = [1, 1]} : vector<2x128xf32> to vector<2x32xf32>
    %cst_386 = arith.constant 5.000000e-01 : f32
    %883 = vector.broadcast %cst_386 : f32 to vector<2x32xf32>
    %884 = arith.mulf %882, %883 : vector<2x32xf32>
    %cst_387 = arith.constant 5.000000e-01 : f32
    %885 = vector.broadcast %cst_387 : f32 to vector<2x32xf32>
    %886 = arith.addf %884, %885 : vector<2x32xf32>
    %887 = vector.extract_strided_slice %881 {offsets = [0, 32], sizes = [2, 32], strides = [1, 1]} : vector<2x128xf32> to vector<2x32xf32>
    %cst_388 = arith.constant 5.000000e-01 : f32
    %888 = vector.broadcast %cst_388 : f32 to vector<2x32xf32>
    %889 = arith.mulf %887, %888 : vector<2x32xf32>
    %cst_389 = arith.constant 5.000000e-01 : f32
    %890 = vector.broadcast %cst_389 : f32 to vector<2x32xf32>
    %891 = arith.addf %889, %890 : vector<2x32xf32>
    %892 = vector.extract_strided_slice %881 {offsets = [0, 64], sizes = [2, 32], strides = [1, 1]} : vector<2x128xf32> to vector<2x32xf32>
    %893 = vector.extract_strided_slice %881 {offsets = [0, 96], sizes = [2, 32], strides = [1, 1]} : vector<2x128xf32> to vector<2x32xf32>
    %cst_390 = arith.constant 5.000000e-01 : f32
    %894 = vector.broadcast %cst_390 : f32 to vector<2x32xf32>
    %895 = arith.mulf %893, %894 : vector<2x32xf32>
    %cst_391 = arith.constant 5.000000e-01 : f32
    %896 = vector.broadcast %cst_391 : f32 to vector<2x32xf32>
    %897 = arith.addf %895, %896 : vector<2x32xf32>
    %898 = arith.mulf %891, %840 : vector<2x32xf32>
    %899 = arith.mulf %886, %892 : vector<2x32xf32>
    %900 = arith.addf %898, %899 : vector<2x32xf32>
    %901 = math.tanh %900 : vector<2x32xf32>
    %902 = arith.mulf %897, %901 : vector<2x32xf32>
    %c0_392 = arith.constant 0 : index
    %c0_393 = arith.constant 0 : index
    %903 = vector.load %arg11[%c0_392, %c0_393] : memref<32x128xf32, #tpu.memory_space<vmem>>, vector<32x128xf32>
    %cst_394 = arith.constant dense<0.000000e+00> : vector<2x128xf32>
    %904 = tpu.matmul %902, %903, %cst_394 {dimension_numbers = #tpu.dot_dimension_numbers<[1], [0], [0], [1], [0, 0, 1, 1], [], []>} : vector<2x32xf32>, vector<32x128xf32>, vector<2x128xf32> -> vector<2x128xf32>
    %c0_395 = arith.constant 0 : index
    %c0_396 = arith.constant 0 : index
    %905 = vector.load %arg12[%c0_395, %c0_396] : memref<32x128xf32, #tpu.memory_space<vmem>>, vector<32x128xf32>
    %cst_397 = arith.constant dense<0.000000e+00> : vector<2x128xf32>
    %906 = tpu.matmul %870, %905, %cst_397 {dimension_numbers = #tpu.dot_dimension_numbers<[1], [0], [0], [1], [0, 0, 1, 1], [], []>} : vector<2x32xf32>, vector<32x128xf32>, vector<2x128xf32> -> vector<2x128xf32>
    %907 = arith.addf %904, %906 : vector<2x128xf32>
    %908 = arith.addf %907, %11 : vector<2x128xf32>
    %909 = math.tanh %908 : vector<2x128xf32>
    %910 = vector.extract_strided_slice %909 {offsets = [0, 0], sizes = [2, 32], strides = [1, 1]} : vector<2x128xf32> to vector<2x32xf32>
    %cst_398 = arith.constant 5.000000e-01 : f32
    %911 = vector.broadcast %cst_398 : f32 to vector<2x32xf32>
    %912 = arith.mulf %910, %911 : vector<2x32xf32>
    %cst_399 = arith.constant 5.000000e-01 : f32
    %913 = vector.broadcast %cst_399 : f32 to vector<2x32xf32>
    %914 = arith.addf %912, %913 : vector<2x32xf32>
    %915 = vector.extract_strided_slice %909 {offsets = [0, 32], sizes = [2, 32], strides = [1, 1]} : vector<2x128xf32> to vector<2x32xf32>
    %cst_400 = arith.constant 5.000000e-01 : f32
    %916 = vector.broadcast %cst_400 : f32 to vector<2x32xf32>
    %917 = arith.mulf %915, %916 : vector<2x32xf32>
    %cst_401 = arith.constant 5.000000e-01 : f32
    %918 = vector.broadcast %cst_401 : f32 to vector<2x32xf32>
    %919 = arith.addf %917, %918 : vector<2x32xf32>
    %920 = vector.extract_strided_slice %909 {offsets = [0, 64], sizes = [2, 32], strides = [1, 1]} : vector<2x128xf32> to vector<2x32xf32>
    %921 = vector.extract_strided_slice %909 {offsets = [0, 96], sizes = [2, 32], strides = [1, 1]} : vector<2x128xf32> to vector<2x32xf32>
    %cst_402 = arith.constant 5.000000e-01 : f32
    %922 = vector.broadcast %cst_402 : f32 to vector<2x32xf32>
    %923 = arith.mulf %921, %922 : vector<2x32xf32>
    %cst_403 = arith.constant 5.000000e-01 : f32
    %924 = vector.broadcast %cst_403 : f32 to vector<2x32xf32>
    %925 = arith.addf %923, %924 : vector<2x32xf32>
    %926 = arith.mulf %919, %868 : vector<2x32xf32>
    %927 = arith.mulf %914, %920 : vector<2x32xf32>
    %928 = arith.addf %926, %927 : vector<2x32xf32>
    %929 = math.tanh %928 : vector<2x32xf32>
    %930 = arith.mulf %925, %929 : vector<2x32xf32>
    %c0_404 = arith.constant 0 : index
    %c0_405 = arith.constant 0 : index
    %931 = vector.load %arg14[%c0_404, %c0_405] : memref<32x8xf32, #tpu.memory_space<vmem>>, vector<32x8xf32>
    %cst_406 = arith.constant dense<0.000000e+00> : vector<2x8xf32>
    %932 = tpu.matmul %930, %931, %cst_406 {dimension_numbers = #tpu.dot_dimension_numbers<[1], [0], [0], [1], [0, 0, 1, 1], [], []>} : vector<2x32xf32>, vector<32x8xf32>, vector<2x8xf32> -> vector<2x8xf32>
    %933 = arith.addf %932, %14 : vector<2x8xf32>
    %c0_407 = arith.constant 0 : index
    %c0_408 = arith.constant 0 : index
    %934 = vector.load %arg16[%c0_407, %c0_408] : memref<2x64xf32, #tpu.memory_space<vmem>>, vector<2x8xf32>
    tpu.vector_store %arg16[%c0_407, %c0_408], %933 {strides = array<i32>} : memref<2x64xf32, #tpu.memory_space<vmem>>, vector<2x8xf32>,
    return
  }
}

</mosaic_0001>

<bundles_post_ra>
// kernel: lstm_autoencoder_forward.1
= control target key start
LH: loop header
LB: loop body
LE: loop exit
PB: predicated region body
PF: predicated region fallthrough
CT: control target
= control target key end

     0   :  { %s8586_s0 = inlined_call_operand.vmem [shape: f32[16,8], index: 0, kind: input, shape index: {}]   ;;  %s8587_s1 = inlined_call_operand.hbm [shape: f32[8,128], index: 1, kind: input, shape index: {}]   ;;  %s8588_s2 = inlined_call_operand.vmem [shape: f32[32,128], index: 2, kind: input, shape index: {}]   ;;  %s8589_s3 = inlined_call_operand.vmem [shape: f32[1,128], index: 3, kind: input, shape index: {}]   ;;  %s8590_s4 = inlined_call_operand.vmem [shape: f32[32,128], index: 4, kind: input, shape index: {}]   ;;  %s8591_s5 = inlined_call_operand.hbm [shape: f32[32,128], index: 5, kind: input, shape index: {}]   ;;  %s8592_s6 = inlined_call_operand.hbm [shape: f32[1,128], index: 6, kind: input, shape index: {}]   ;;  %s8593_s7 = inlined_call_operand.hbm [shape: f32[32,128], index: 7, kind: input, shape index: {}]   ;;  %s8594_s8 = inlined_call_operand.hbm [shape: f32[1,128], index: 8, kind: input, shape index: {}]   ;;  %s8595_s9 = inlined_call_operand.hbm [shape: f32[32,128], index: 9, kind: input, shape index: {}]   ;;  %s8596_s10 = inlined_call_operand.hbm [shape: f32[1,128], index: 10, kind: input, shape index: {}]   ;;  %s8597_s11 = inlined_call_operand.hbm [shape: f32[32,128], index: 11, kind: input, shape index: {}]   ;;  %s8598_s12 = inlined_call_operand.vmem [shape: f32[32,128], index: 12, kind: input, shape index: {}]   ;;  %s8599_s13 = inlined_call_operand.vmem [shape: f32[1,128], index: 13, kind: input, shape index: {}]   ;;  %s8600_s14 = inlined_call_operand.vmem [shape: f32[32,8], index: 14, kind: input, shape index: {}]   ;;  %s8601_s15 = inlined_call_operand.vmem [shape: f32[1,8], index: 15, kind: input, shape index: {}]   ;;  %s8602_s16 = inlined_call_operand.vmem [shape: f32[2,64], index: 16, kind: output, shape index: {}]  }
   0x1   :  { %8604 = sst [smem:[#allocation20_spill]] %s8586_s0 }
   0x2   :  { %21 = vsyncpa [#allocation3], 0 }
   0x3   :  { %22 = vsyncpa [#allocation5], 0 }
   0x4   :  { %23 = vsyncpa [#allocation8], 0 }
   0x5   :  { %24 = vsyncpa [#allocation11], 0 }
   0x6   :  { %25 = vsyncpa [#allocation14], 0  ;;  %s7207_s21 = smov [#allocation4]  }
   0x7   :  { %s49_s22 = sshll.u32 %s7207_s21, 4  ;;  %s50_s22 = int_to_ptr.vmem [resolvable:$true] %s49_s22 }
   0x8   :  { %s7045_s23 = scalar_lea.vmem %s50_s22, 512  ;;  %p7050_p1 = scmp.lt.s32.totalorder %s50_s22, %s50_s22 }
   0x9   :  { %p7046_p0 = scmp.ne.s32.totalorder %s50_s22, %s7045_s23  ;;  %p7051_p2 = scmp.lt.s32.totalorder %s7045_s23, %s7045_s23 }
   0xb   :  { %p7052_p3 = por %p7051_p2, %p7050_p1 }
   0xd   :  { %p7053_p4 = pnand %p7052_p3, %p7046_p0 }
   0xf   :  { %7056 = shalt.err (!%p7053_p4)
}
  0x10   :  { %s7208_s24 = smov 128   ;;  %s7209_s25 = smov 8  }
  0x11   :  { %55 = dma.hbm_to_vmem [thread:$0]  %s8591_s5, 512, %s50_s22, [#allocation5], %s7208_s24, %s7208_s24, %s7209_s25  }
  0x12   :  { %s7210_s28 = smov [#allocation7]   ;;  %s7211_s30 = smov [#allocation10]  }
  0x13   :  { %s71_s29 = sshll.u32 %s7210_s28, 4  ;;  %s93_s0 = sshll.u32 %s7211_s30, 4  ;;  %s72_s29 = int_to_ptr.vmem [resolvable:$true] %s71_s29  ;;  %s94_s0 = int_to_ptr.vmem [resolvable:$true] %s93_s0 }
  0x14   :  { %s7065_s17 = scalar_lea.vmem %s72_s29, 512  ;;  %p7070_p6 = scmp.lt.s32.totalorder %s72_s29, %s72_s29 }
  0x15   :  { %p7066_p5 = scmp.ne.s32.totalorder %s72_s29, %s7065_s17  ;;  %p7071_p7 = scmp.lt.s32.totalorder %s7065_s17, %s7065_s17 }
  0x17   :  { %p7072_p8 = por %p7071_p7, %p7070_p6 }
  0x19   :  { %p7073_p9 = pnand %p7072_p8, %p7066_p5 }
  0x1b   :  { %7076 = shalt.err (!%p7073_p9)
}
  0x1c   :  { %77 = dma.hbm_to_vmem [thread:$0]  %s8593_s7, 512, %s72_s29, [#allocation8], %s7208_s24, %s7208_s24, %s7209_s25  }
  0x1d   :  { %s7085_s5 = scalar_lea.vmem %s94_s0, 512  ;;  %p7090_p11 = scmp.lt.s32.totalorder %s94_s0, %s94_s0 }
  0x1e   :  { %p7086_p10 = scmp.ne.s32.totalorder %s94_s0, %s7085_s5  ;;  %p7091_p12 = scmp.lt.s32.totalorder %s7085_s5, %s7085_s5 }
  0x20   :  { %p7092_p13 = por %p7091_p12, %p7090_p11 }
  0x22   :  { %p7093_p0 = pnand %p7092_p13, %p7086_p10 }
  0x24   :  { %7096 = shalt.err (!%p7093_p0)
}
  0x25   :  { %99 = dma.hbm_to_vmem [thread:$0]  %s8595_s9, 512, %s94_s0, [#allocation11], %s7208_s24, %s7208_s24, %s7209_s25  }
  0x26   :  { %s7212_s22 = smov [#allocation2]   ;;  %s7213_s26 = smov [#allocation6]  }
  0x27   :  { %s34_s23 = sshll.u32 %s7212_s22, 4  ;;  %s62_s7 = sshll.u32 %s7213_s26, 4  ;;  %s35_s23 = int_to_ptr.vmem [resolvable:$true] %s34_s23  ;;  %s63_s7 = int_to_ptr.vmem [resolvable:$true] %s62_s7 }
  0x28   :  { %s7105_s27 = scalar_lea.vmem %s35_s23, 128  ;;  %p7110_p2 = scmp.lt.s32.totalorder %s35_s23, %s35_s23 }
  0x29   :  { %p7106_p1 = scmp.ne.s32.totalorder %s35_s23, %s7105_s27  ;;  %p7111_p3 = scmp.lt.s32.totalorder %s7105_s27, %s7105_s27 }
  0x2b   :  { %p7112_p4 = por %p7111_p3, %p7110_p2 }
  0x2d   :  { %p7113_p5 = pnand %p7112_p4, %p7106_p1 }
  0x2f   :  { %7116 = shalt.err (!%p7113_p5)
}
  0x30   :  { %37 = dma.hbm_to_vmem [thread:$0]  %s8587_s1, 128, %s35_s23, [#allocation3]  }
  0x31   :  { %s7125_s30 = scalar_lea.vmem %s63_s7, 16  ;;  %s7129_s9 = scalar_lea.vmem %s63_s7, 32 }
  0x32   :  { %p7126_p6 = scmp.ne.s32.totalorder %s63_s7, %s7125_s30  ;;  %p7130_p7 = scmp.lt.s32.totalorder %s63_s7, %s63_s7 }
  0x33   :  { %p7131_p8 = scmp.lt.s32.totalorder %s7129_s9, %s7125_s30 }
  0x35   :  { %p7132_p9 = por %p7131_p8, %p7130_p7 }
  0x37   :  { %p7133_p10 = pnand %p7132_p9, %p7126_p6 }
  0x39   :  { %7136 = shalt.err (!%p7133_p10)
}
  0x3a   :  { %65 = dma.hbm_to_vmem [thread:$0]  %s8592_s6, 16, %s63_s7, [#allocation5]  }
  0x3b   :  { %s7214_s18 = smov [#allocation9]   ;;  %s7215_s5 = smov [#allocation12]  }
  0x3c   :  { %s84_s19 = sshll.u32 %s7214_s18, 4  ;;  %s106_s20 = sshll.u32 %s7215_s5, 4  ;;  %s85_s19 = int_to_ptr.vmem [resolvable:$true] %s84_s19  ;;  %s107_s20 = int_to_ptr.vmem [resolvable:$true] %s106_s20 }
  0x3d   :  { %s7145_s21 = scalar_lea.vmem %s85_s19, 16  ;;  %s7149_s1 = scalar_lea.vmem %s85_s19, 32 }
  0x3e   :  { %p7146_p11 = scmp.ne.s32.totalorder %s85_s19, %s7145_s21  ;;  %p7150_p12 = scmp.lt.s32.totalorder %s85_s19, %s85_s19 }
  0x3f   :  { %p7151_p13 = scmp.lt.s32.totalorder %s7149_s1, %s7145_s21 }
  0x41   :  { %p7152_p0 = por %p7151_p13, %p7150_p12 }
  0x43   :  { %p7153_p1 = pnand %p7152_p0, %p7146_p11 }
  0x45   :  { %7156 = shalt.err (!%p7153_p1)
}
  0x46   :  { %87 = dma.hbm_to_vmem [thread:$0]  %s8594_s8, 16, %s85_s19, [#allocation8]  }
  0x47   :  { %s7165_s26 = scalar_lea.vmem %s107_s20, 16  ;;  %s7169_s6 = scalar_lea.vmem %s107_s20, 32 }
  0x48   :  { %p7166_p2 = scmp.ne.s32.totalorder %s107_s20, %s7165_s26  ;;  %p7170_p3 = scmp.lt.s32.totalorder %s107_s20, %s107_s20 }
  0x49   :  { %p7171_p4 = scmp.lt.s32.totalorder %s7169_s6, %s7165_s26 }
  0x4b   :  { %p7172_p5 = por %p7171_p4, %p7170_p3 }
  0x4d   :  { %p7173_p6 = pnand %p7172_p5, %p7166_p2 }
  0x4f   :  { %7176 = shalt.err (!%p7173_p6)
}
  0x50   :  { %109 = dma.hbm_to_vmem [thread:$0]  %s8596_s10, 16, %s107_s20, [#allocation11]  }
  0x51   :  { %s7216_s28 = smov [#allocation13]  }
  0x52   :  { %s115_s29 = sshll.u32 %s7216_s28, 4  ;;  %s116_s29 = int_to_ptr.vmem [resolvable:$true] %s115_s29 }
  0x53   :  { %s7185_s30 = scalar_lea.vmem %s116_s29, 512  ;;  %p7190_p8 = scmp.lt.s32.totalorder %s116_s29, %s116_s29 }
  0x54   :  { %p7186_p7 = scmp.ne.s32.totalorder %s116_s29, %s7185_s30  ;;  %p7191_p9 = scmp.lt.s32.totalorder %s7185_s30, %s7185_s30 }
  0x56   :  { %p7192_p10 = por %p7191_p9, %p7190_p8 }
  0x58   :  { %p7193_p11 = pnand %p7192_p10, %p7186_p7 }
  0x5a   :  { %7196 = shalt.err (!%p7193_p11)
}
  0x5b   :  { %121 = dma.hbm_to_vmem [thread:$0]  %s8597_s11, 512, %s116_s29, [#allocation14], %s7208_s24, %s7208_s24, %s7209_s25  }
  0x5c   :  { %7197 = dma.done.wait [#allocation3], 128  }
  0x5d   :  { %7198 = vsyncadd [#allocation3], 4294967168 }
  0x5e   :  { %7199 = dma.done.wait [#allocation5], 528  }
  0x5f   :  { %7200 = vsyncadd [#allocation5], 4294966768 }
  0x60   :  { %7201 = dma.done.wait [#allocation8], 528  }
  0x61   :  { %7202 = vsyncadd [#allocation8], 4294966768 }
  0x62   :  { %7203 = dma.done.wait [#allocation11], 528  }
  0x63   :  { %7204 = vsyncadd [#allocation11], 4294966768 }
  0x64   :  { %7205 = dma.done.wait [#allocation14], 512  }
  0x65   :  { %7206 = vsyncadd [#allocation14], 4294966784  ;;  %v7217_v0 = vmov 0.0   ;;  %vm7218_vm0 = vmmov 0   ;;  %vm199_vm1 = vcmask 64512   ;;  %v191_v1 = vld [vmem:[#allocation2] sm:$0xff] }
  0x66   :  { %6187 = vmatprep.subr.mxu1 %v7217_v0  ;;  %6195 = vmatprep.mubr.msk.f32.mxu1 %vm7218_vm0, %v7217_v0  ;;  %v7353_v2 = vld [vmem:[%s8588_s2 + $0x18] sm:$0xff]  ;;  %s8605_s17 = sld [smem:[#allocation20_spill]]  ;;  %v7365_v5 = vld [vmem:[%s8588_s2 + $0x10] sm:$0xff]  ;;  %v7371_v6 = vld [vmem:[%s8588_s2 + $0x8] sm:$0xff]  ;;  %s7219_s7 = smov 64   ;;  %vm285_vm2 = vcmask 261120  }
  0x67   :  { %6182 = vmatprep.subr.mxu0 %v191_v1  ;;  %6188 = vmatpush3.msra.mxu1 %v7353_v2  ;;  %v7379_v7 = vld [vmem:[%s8588_s2] sm:$0xff]  ;;  %v7405_v25 = vld [vmem:[#allocation4 + $0x10] sm:$0xff]  ;;  %v7416_v27 = vld [vmem:[%s8590_s4 + $0x10] sm:$0xff]  ;;  %s7221_s18 = smov 56   ;;  %s7222_s19 = smov 40   ;;  %vm2792_vm3 = vcmask 517568  }
  0x68   :  { %6183 = vmatpush3.msra.mxu0 %v191_v1  ;;  %6189 = vmatprep.subr.mxu1 %v7217_v0  ;;  %v5800_v8 = vld [vmem:[%s8589_s3] ss:$0 sm:$0xff]  ;;  %s7220_s3 = smov 32   ;;  %v7411_v26 = vld [vmem:[%s8590_s4 + $0x18] sm:$0xff]  ;;  %v7419_v28 = vld [vmem:[#allocation4 + $0x8] sm:$0xff]  ;;  %s7223_s5 = smov 24  }
  0x69   :  { %6190 = vmatpush3.msra.mxu1 %v7365_v5  ;;  %6198 = vmatprep.subr.mxu0 %v7217_v0  ;;  %v7403_v24 = vld [vmem:[#allocation4 + $0x18] sm:$0xff]  ;;  %v7427_v29 = vld [vmem:[%s8590_s4 + $0x8] sm:$0xff]  ;;  %s7224_s20 = smov 48   ;;  %vm3220_vm4 = vcmask 451968   ;;  %vm3648_vm5 = vcmask 386368   ;;  %vm4076_vm6 = vcmask 320768  }
  0x6a   :  { %6191 = vmatprep.subr.mxu1 %v7217_v0  ;;  %v7430_v30 = vld [vmem:[#allocation4] sm:$0xff]  ;;  %v7440_v31 = vld [vmem:[%s8590_s4] sm:$0xff]  ;;  %vm4504_vm7 = vcmask 255168   ;;  %vm4932_vm8 = vcmask 189568   ;;  %vm5360_vm9 = vcmask 123968   ;;  %vm5784_vm10 = vcmask 58368  }
  0x6b   :  { %6192 = vmatpush3.msra.mxu1 %v7371_v6  ;;  %v7482_v38 = vld [vmem:[#allocation6] ss:$0 sm:$0xff] }
  0x6c   :  { %v189_v3 = vld [vmem:[%s8605_s17] sm:$0xff]  ;;  %v190_v4 = vld [vmem:[%s8605_s17 + $0x8] sm:$0xff]  ;;  %6193 = vmatprep.subr.mxu1 %v7217_v0 }
  0x6d   :  { %6184 = vmatprep.mubr.msk.f32.mxu0 %vm199_vm1, %v189_v3  ;;  %6194 = vmatpush3.msra.mxu1 %v7379_v7 }
  0x6e   :  { %6185 = vmatmul.mubr.msk.f32.vlgmr.msra.gmra.mxu0 %vm199_vm1, %v190_v4  ;;  %6196 = vmatmul.mubr.f32.vlgmr.msra.gmra.mxu1 %v7217_v0 }
  0x6f   :  { %6206 = vmatprep.mubr.msk.f32.mxu0 %vm7218_vm0, %v7217_v0  ;;  %6209 = vmatprep.subr.mxu1 %v7217_v0 }
  0x70   :  { %6217 = vmatprep.mubr.msk.f32.mxu1 %vm7218_vm0, %v7217_v0  ;;  %6199 = vmatpush3.msra.mxu0 %v7403_v24 }
  0x71   :  { %6200 = vmatprep.subr.mxu0 %v7217_v0  ;;  %6210 = vmatpush3.msra.mxu1 %v7411_v26 }
  0x72   :  { %6201 = vmatpush3.msra.mxu0 %v7405_v25  ;;  %6211 = vmatprep.subr.mxu1 %v7217_v0 }
  0x73   :  { %6202 = vmatprep.subr.mxu0 %v7217_v0  ;;  %6212 = vmatpush3.msra.mxu1 %v7416_v27 }
  0x74   :  { %6203 = vmatpush3.msra.mxu0 %v7419_v28  ;;  %6213 = vmatprep.subr.mxu1 %v7217_v0 }
  0x75   :  { %6204 = vmatprep.subr.mxu0 %v7217_v0  ;;  %6214 = vmatpush3.msra.mxu1 %v7427_v29 }
  0x76   :  { %6205 = vmatpush3.msra.mxu0 %v7430_v30  ;;  %6215 = vmatprep.subr.mxu1 %v7217_v0 }
  0x77   :  { %6207 = vmatmul.mubr.f32.vlgmr.msra.gmra.mxu0 %v7217_v0  ;;  %6220 = vmatprep.subr.mxu0 %v7217_v0 }
  0x78   :  { %6221 = vmatpush3.msra.mxu0 %v7353_v2  ;;  %6216 = vmatpush3.msra.mxu1 %v7440_v31 }
  0x79   :  { %6222 = vmatprep.subr.mxu0 %v7217_v0  ;;  %6228 = vmatprep.mubr.msk.f32.mxu0 %vm7218_vm0, %v7217_v0 }
  0x7a   :  { %6223 = vmatpush3.msra.mxu0 %v7365_v5  ;;  %6231 = vmatprep.subr.mxu1 %v7217_v0 }
  0x7b   :  { %6224 = vmatprep.subr.mxu0 %v7217_v0 }
  0x7c   :  { %6225 = vmatpush3.msra.mxu0 %v7371_v6 }
  0x7d   :  { %6226 = vmatprep.subr.mxu0 %v7217_v0 }
  0x7e   :  { %6227 = vmatpush3.msra.mxu0 %v7379_v7 }
  0x7f   :  { %6242 = vmatprep.subr.mxu0 %v7217_v0 }
 0x12e   :  { %v6186_v9 = vpop.f32.mrf.mxu0  ;;  %v355_v13 = vpop.f32.mrf.mxu1 }
 0x12f   :  { %v7393_v10 = vadd.f32 %v6186_v9, %v5800_v8 }
 0x130   :  { %v272_v11 = vpop.f32.mrf.mxu0  ;;  %v6197_v15 = vpop.f32.mrf.mxu1 }
 0x131   :  { %v7395_v12 = vadd.f32 %v5800_v8, %v272_v11 }
 0x133   :  { %v359_v14 = vadd.f32 %v355_v13, %v7395_v12 }
 0x135   :  { %6899 = vtanh.f32 %v359_v14 }
 0x137   :  { %v454_v35 = vpop.f32.mrf.mxu0 }
 0x139   :  { %v6208_v36 = vpop.f32.mrf.mxu0 }
 0x142   :  { %v6900_v16 = vpop.eup %6899 }
 0x143   :  { %365 = vrot.lane.b32.xlu0 %v6900_v16, %s7219_s7  ;;  %v361_v17 = vmul.f32 0.5, %v6900_v16 }
 0x145   :  { %v362_v18 = vadd.f32 0.5, %v361_v17 }
 0x147   :  { %v363_v21 = vmul.f32 0.0, %v362_v18 }
 0x1b5   :  { %v366_v19 = vpop.permute.xlu0 %365 }
 0x1b6   :  { %v368_v20 = vmul.f32 %v366_v19, %v362_v18 }
 0x1b8   :  { %370 = vrot.lane.b32.xlu0 %v368_v20, %s7220_s3 }
 0x22a   :  { %v371_v22 = vpop.permute.xlu0 %370 }
 0x22b   :  { %v7400_v23 = vadd.f32 %v371_v22, %v363_v21 }
 0x22d   :  { %6901 = vtanh.f32 %v7400_v23  ;;  %v632_v57 = vrot.slane %v7400_v23, 6 }
 0x23a   :  { %v6902_v32 = vpop.eup %6901 }
 0x23b   :  { %376 = vrot.lane.b32.xlu1 %v6902_v32, %s7219_s7 }
 0x2ad   :  { %v377_v33 = vpop.permute.xlu1 %376 }
 0x2ae   :  { %v379_v34 = vmul.f32 %v377_v33, %v362_v18 }
 0x2b0   :  { %459 = vrot.lane.b32.xlu1 %v379_v34, %s7220_s3 }
 0x322   :  { %v460_v37 = vpop.permute.xlu1 %459 }
 0x323   :  { %6218 = vmatmul.mubr.msk.f32.vlgmr.msra.gmra.mxu1 %vm285_vm2, %v460_v37  ;;  %6229 = vmatmul.mubr.msk.f32.vlgmr.msra.gmra.mxu0 %vm285_vm2, %v460_v37 }
 0x324   :  { %6232 = vmatpush3.msra.mxu1 %v7403_v24  ;;  %6243 = vmatpush3.msra.mxu0 %v7411_v26 }
 0x325   :  { %6233 = vmatprep.subr.mxu1 %v7217_v0  ;;  %6244 = vmatprep.subr.mxu0 %v7217_v0 }
 0x326   :  { %6234 = vmatpush3.msra.mxu1 %v7405_v25  ;;  %6245 = vmatpush3.msra.mxu0 %v7416_v27 }
 0x327   :  { %6235 = vmatprep.subr.mxu1 %v7217_v0  ;;  %6246 = vmatprep.subr.mxu0 %v7217_v0 }
 0x328   :  { %6236 = vmatpush3.msra.mxu1 %v7419_v28  ;;  %6239 = vmatprep.mubr.msk.f32.mxu1 %vm7218_vm0, %v7217_v0 }
 0x329   :  { %6237 = vmatprep.subr.mxu1 %v7217_v0  ;;  %6247 = vmatpush3.msra.mxu0 %v7427_v29 }
 0x32a   :  { %6238 = vmatpush3.msra.mxu1 %v7430_v30  ;;  %6248 = vmatprep.subr.mxu0 %v7217_v0 }
 0x32b   :  { %6253 = vmatprep.subr.mxu1 %v7217_v0  ;;  %6249 = vmatpush3.msra.mxu0 %v7440_v31 }
 0x32c   :  { %6250 = vmatprep.mubr.msk.f32.mxu0 %vm7218_vm0, %v7217_v0  ;;  %6264 = vmatprep.subr.mxu0 %v7217_v0 }
 0x3e3   :  { %v529_v39 = vpop.f32.mrf.mxu1  ;;  %v620_v40 = vpop.f32.mrf.mxu0 }
 0x3e4   :  { %v530_v41 = vadd.f32 %v529_v39, %v454_v35  ;;  %v625_v42 = vrot.slane %v620_v40, 6 }
 0x3e5   :  { %v6219_v43 = vpop.f32.mrf.mxu1  ;;  %v6230_v44 = vpop.f32.mrf.mxu0 }
 0x3e6   :  { %v533_v45 = vadd.f32 %v7482_v38, %v530_v41  ;;  %v627_v46 = vadd.f32 %v625_v42, %v7395_v12 }
 0x3e8   :  { %6903 = vtanh.f32 %v533_v45 }
 0x3e9   :  { %6905 = vtanh.f32 %v627_v46 }
 0x3f5   :  { %v6904_v47 = vpop.eup %6903 }
 0x3f6   :  { %v6906_v48 = vpop.eup %6905  ;;  %539 = vrot.lane.b32.xlu0 %v6904_v47, %s7219_s7  ;;  %v535_v49 = vmul.f32 0.5, %v6904_v47 }
 0x3f7   :  { %636 = vrot.lane.b32.xlu1 %v6906_v48, %s7219_s7  ;;  %v629_v50 = vmul.f32 0.5, %v6906_v48 }
 0x3f8   :  { %v536_v51 = vadd.f32 0.5, %v535_v49 }
 0x3f9   :  { %v630_v52 = vadd.f32 0.5, %v629_v50 }
 0x3fa   :  { %v537_v58 = vmul.f32 0.0, %v536_v51 }
 0x3fb   :  { %v634_v59 = vmul.f32 %v632_v57, %v630_v52 }
 0x468   :  { %v540_v53 = vpop.permute.xlu0 %539 }
 0x469   :  { %v637_v54 = vpop.permute.xlu1 %636  ;;  %v542_v55 = vmul.f32 %v540_v53, %v536_v51 }
 0x46a   :  { %v639_v56 = vmul.f32 %v637_v54, %v630_v52 }
 0x46b   :  { %544 = vrot.lane.b32.xlu0 %v542_v55, %s7220_s3 }
 0x46c   :  { %641 = vrot.lane.b32.xlu1 %v639_v56, %s7220_s3 }
 0x4dd   :  { %v545_v60 = vpop.permute.xlu0 %544 }
 0x4de   :  { %v642_v61 = vpop.permute.xlu1 %641  ;;  %v7491_v62 = vadd.f32 %v545_v60, %v537_v58 }
 0x4df   :  { %v7493_v63 = vadd.f32 %v642_v61, %v634_v59 }
 0x4e0   :  { %6907 = vtanh.f32 %v7491_v62 }
 0x4e1   :  { %6909 = vtanh.f32 %v7493_v63  ;;  %v901_v48 = vrot.slane %v7493_v63, 6 }
 0x4ed   :  { %v6908_v1 = vpop.eup %6907 }
 0x4ee   :  { %v6910_v3 = vpop.eup %6909  ;;  %550 = vrot.lane.b32.xlu0 %v6908_v1, %s7219_s7 }
 0x4ef   :  { %647 = vrot.lane.b32.xlu1 %v6910_v3, %s7219_s7 }
 0x560   :  { %v551_v4 = vpop.permute.xlu0 %550 }
 0x561   :  { %v648_v8 = vpop.permute.xlu1 %647  ;;  %v553_v9 = vmul.f32 %v551_v4, %v536_v51 }
 0x562   :  { %v650_v11 = vmul.f32 %v648_v8, %v630_v52 }
 0x563   :  { %652 = vrot.lane.b32.xlu0 %v553_v9, %s7220_s3 }
 0x564   :  { %v727_v13 = vrot.slane %v650_v11, 2 }
 0x566   :  { %728 = vrot.lane.b32.xlu1 %v727_v13, %s7220_s3 }
 0x5d5   :  { %v653_v14 = vpop.permute.xlu0 %652 }
 0x5d6   :  { %6240 = vmatmul.mubr.msk.f32.vlgmr.msra.gmra.mxu1 %vm285_vm2, %v653_v14 }
 0x5d7   :  { %6254 = vmatpush3.msra.mxu1 %v7353_v2  ;;  %6261 = vmatprep.mubr.msk.f32.mxu1 %vm7218_vm0, %v7217_v0 }
 0x5d8   :  { %v729_v15 = vpop.permute.xlu1 %728  ;;  %6255 = vmatprep.subr.mxu1 %v7217_v0 }
 0x5d9   :  { %6251 = vmatmul.mubr.msk.f32.vlgmr.msra.gmra.mxu0 %vm285_vm2, %v729_v15  ;;  %6256 = vmatpush3.msra.mxu1 %v7365_v5 }
 0x5da   :  { %6257 = vmatprep.subr.mxu1 %v7217_v0  ;;  %6265 = vmatpush3.msra.mxu0 %v7403_v24 }
 0x5db   :  { %6258 = vmatpush3.msra.mxu1 %v7371_v6  ;;  %6266 = vmatprep.subr.mxu0 %v7217_v0 }
 0x5dc   :  { %6259 = vmatprep.subr.mxu1 %v7217_v0  ;;  %6267 = vmatpush3.msra.mxu0 %v7405_v25 }
 0x5dd   :  { %6260 = vmatpush3.msra.mxu1 %v7379_v7  ;;  %6268 = vmatprep.subr.mxu0 %v7217_v0 }
 0x5de   :  { %6262 = vmatmul.mubr.msk.f32.vlgmr.msra.gmra.mxu1 %vm285_vm2, %v729_v15  ;;  %6269 = vmatpush3.msra.mxu0 %v7419_v28 }
 0x5df   :  { %6270 = vmatprep.subr.mxu0 %v7217_v0  ;;  %6272 = vmatprep.mubr.msk.f32.mxu0 %vm7218_vm0, %v7217_v0 }
 0x5e0   :  { %6271 = vmatpush3.msra.mxu0 %v7430_v30  ;;  %6275 = vmatprep.subr.mxu1 %v7217_v0 }
 0x5e1   :  { %6286 = vmatprep.subr.mxu0 %v7217_v0  ;;  %6276 = vmatpush3.msra.mxu1 %v7411_v26 }
 0x5e2   :  { %6277 = vmatprep.subr.mxu1 %v7217_v0  ;;  %6283 = vmatprep.mubr.msk.f32.mxu1 %vm7218_vm0, %v7217_v0 }
 0x5e3   :  { %6278 = vmatpush3.msra.mxu1 %v7416_v27 }
 0x5e4   :  { %6279 = vmatprep.subr.mxu1 %v7217_v0 }
 0x5e5   :  { %6280 = vmatpush3.msra.mxu1 %v7427_v29 }
 0x5e6   :  { %6281 = vmatprep.subr.mxu1 %v7217_v0 }
 0x5e7   :  { %6282 = vmatpush3.msra.mxu1 %v7440_v31 }
 0x5e8   :  { %6297 = vmatprep.subr.mxu1 %v7217_v0 }
 0x696   :  { %v722_v16 = vpop.f32.mrf.mxu1 }
 0x698   :  { %v6241_v17 = vpop.f32.mrf.mxu1 }
 0x699   :  { %v798_v18 = vpop.f32.mrf.mxu0 }
 0x69a   :  { %v799_v19 = vadd.f32 %v798_v18, %v722_v16 }
 0x69b   :  { %v6252_v20 = vpop.f32.mrf.mxu0 }
 0x69c   :  { %v802_v21 = vadd.f32 %v7482_v38, %v799_v19 }
 0x69e   :  { %6911 = vtanh.f32 %v802_v21  ;;  %v889_v22 = vpop.f32.mrf.mxu1 }
 0x69f   :  { %v894_v23 = vrot.slane %v889_v22, 4 }
 0x6a0   :  { %v6263_v32 = vpop.f32.mrf.mxu1 }
 0x6a1   :  { %v896_v33 = vadd.f32 %v894_v23, %v7395_v12 }
 0x6a3   :  { %6913 = vtanh.f32 %v896_v33 }
 0x6ab   :  { %v6912_v34 = vpop.eup %6911 }
 0x6ac   :  { %808 = vrot.lane.b32.xlu0 %v6912_v34, %s7219_s7  ;;  %v804_v36 = vmul.f32 0.5, %v6912_v34 }
 0x6ae   :  { %v805_v37 = vadd.f32 0.5, %v804_v36 }
 0x6b0   :  { %v6914_v35 = vpop.eup %6913  ;;  %v806_v45 = vmul.f32 %v805_v37, %v7491_v62 }
 0x6b1   :  { %905 = vrot.lane.b32.xlu1 %v6914_v35, %s7219_s7  ;;  %v898_v40 = vmul.f32 0.5, %v6914_v35 }
 0x6b3   :  { %v899_v42 = vadd.f32 0.5, %v898_v40 }
 0x6b5   :  { %v903_v49 = vmul.f32 %v901_v48, %v899_v42 }
 0x71e   :  { %v809_v39 = vpop.permute.xlu0 %808 }
 0x71f   :  { %v811_v41 = vmul.f32 %v809_v39, %v805_v37 }
 0x721   :  { %813 = vrot.lane.b32.xlu0 %v811_v41, %s7220_s3 }
 0x723   :  { %v906_v43 = vpop.permute.xlu1 %905 }
 0x724   :  { %v908_v44 = vmul.f32 %v906_v43, %v899_v42 }
 0x726   :  { %910 = vrot.lane.b32.xlu1 %v908_v44, %s7220_s3 }
 0x793   :  { %v814_v46 = vpop.permute.xlu0 %813 }
 0x794   :  { %v7541_v47 = vadd.f32 %v814_v46, %v806_v45 }
 0x796   :  { %6915 = vtanh.f32 %v7541_v47 }
 0x798   :  { %v911_v50 = vpop.permute.xlu1 %910 }
 0x799   :  { %v7545_v51 = vadd.f32 %v911_v50, %v903_v49 }
 0x79b   :  { %6917 = vtanh.f32 %v7545_v51 }
 0x7a3   :  { %v6916_v52 = vpop.eup %6915 }
 0x7a4   :  { %819 = vrot.lane.b32.xlu0 %v6916_v52, %s7219_s7 }
 0x7a8   :  { %v6918_v53 = vpop.eup %6917 }
 0x7a9   :  { %916 = vrot.lane.b32.xlu1 %v6918_v53, %s7219_s7 }
 0x816   :  { %v820_v54 = vpop.permute.xlu0 %819 }
 0x817   :  { %v822_v55 = vmul.f32 %v820_v54, %v805_v37 }
 0x819   :  { %921 = vrot.lane.b32.xlu0 %v822_v55, %s7220_s3 }
 0x81b   :  { %v917_v56 = vpop.permute.xlu1 %916 }
 0x81c   :  { %v919_v57 = vmul.f32 %v917_v56, %v899_v42 }
 0x81e   :  { %v996_v58 = vrot.slane %v919_v57, 4 }
 0x820   :  { %997 = vrot.lane.b32.xlu1 %v996_v58, %s7220_s3 }
 0x88b   :  { %v922_v59 = vpop.permute.xlu0 %921 }
 0x88c   :  { %6273 = vmatmul.mubr.msk.f32.vlgmr.msra.gmra.mxu0 %vm285_vm2, %v922_v59 }
 0x88d   :  { %6287 = vmatpush3.msra.mxu0 %v7353_v2  ;;  %6294 = vmatprep.mubr.msk.f32.mxu0 %vm7218_vm0, %v7217_v0 }
 0x88e   :  { %6288 = vmatprep.subr.mxu0 %v7217_v0 }
 0x88f   :  { %6289 = vmatpush3.msra.mxu0 %v7365_v5 }
 0x890   :  { %6290 = vmatprep.subr.mxu0 %v7217_v0 }
 0x891   :  { %6291 = vmatpush3.msra.mxu0 %v7371_v6 }
 0x892   :  { %6292 = vmatprep.subr.mxu0 %v7217_v0  ;;  %v998_v60 = vpop.permute.xlu1 %997 }
 0x893   :  { %6293 = vmatpush3.msra.mxu0 %v7379_v7  ;;  %6284 = vmatmul.mubr.msk.f32.vlgmr.msra.gmra.mxu1 %vm285_vm2, %v998_v60 }
 0x894   :  { %6295 = vmatmul.mubr.msk.f32.vlgmr.msra.gmra.mxu0 %vm285_vm2, %v998_v60  ;;  %6298 = vmatpush3.msra.mxu1 %v7403_v24 }
 0x895   :  { %6299 = vmatprep.subr.mxu1 %v7217_v0  ;;  %6308 = vmatprep.subr.mxu0 %v7217_v0 }
 0x896   :  { %6300 = vmatpush3.msra.mxu1 %v7405_v25  ;;  %6309 = vmatpush3.msra.mxu0 %v7411_v26 }
 0x897   :  { %6301 = vmatprep.subr.mxu1 %v7217_v0  ;;  %6310 = vmatprep.subr.mxu0 %v7217_v0 }
 0x898   :  { %6302 = vmatpush3.msra.mxu1 %v7419_v28  ;;  %6311 = vmatpush3.msra.mxu0 %v7416_v27 }
 0x899   :  { %6303 = vmatprep.subr.mxu1 %v7217_v0  ;;  %6312 = vmatprep.subr.mxu0 %v7217_v0 }
 0x89a   :  { %6304 = vmatpush3.msra.mxu1 %v7430_v30  ;;  %6305 = vmatprep.mubr.msk.f32.mxu1 %vm7218_vm0, %v7217_v0 }
 0x89b   :  { %6313 = vmatpush3.msra.mxu0 %v7427_v29  ;;  %6319 = vmatprep.subr.mxu1 %v7217_v0 }
 0x89c   :  { %6314 = vmatprep.subr.mxu0 %v7217_v0  ;;  %6316 = vmatprep.mubr.msk.f32.mxu0 %vm7218_vm0, %v7217_v0 }
 0x89d   :  { %6315 = vmatpush3.msra.mxu0 %v7440_v31 }
 0x89e   :  { %6330 = vmatprep.subr.mxu0 %v7217_v0 }
 0x94c   :  { %v991_v61 = vpop.f32.mrf.mxu0 }
 0x94e   :  { %v6274_v62 = vpop.f32.mrf.mxu0 }
 0x953   :  { %v1067_v63 = vpop.f32.mrf.mxu1 }
 0x954   :  { %v1068_v1 = vadd.f32 %v1067_v63, %v991_v61  ;;  %v1158_v3 = vpop.f32.mrf.mxu0 }
 0x955   :  { %v1163_v4 = vrot.slane %v1158_v3, 2  ;;  %v6285_v8 = vpop.f32.mrf.mxu1 }
 0x956   :  { %v1071_v9 = vadd.f32 %v7482_v38, %v1068_v1  ;;  %v6296_v11 = vpop.f32.mrf.mxu0 }
 0x957   :  { %v1165_v13 = vadd.f32 %v1163_v4, %v7395_v12  ;;  %v1170_v12 = vrot.slane %v7545_v51, 6 }
 0x958   :  { %6919 = vtanh.f32 %v1071_v9 }
 0x959   :  { %6921 = vtanh.f32 %v1165_v13 }
 0x965   :  { %v6920_v14 = vpop.eup %6919 }
 0x966   :  { %v6922_v15 = vpop.eup %6921  ;;  %1077 = vrot.lane.b32.xlu1 %v6920_v14, %s7219_s7  ;;  %v1073_v16 = vmul.f32 0.5, %v6920_v14 }
 0x967   :  { %1174 = vrot.lane.b32.xlu0 %v6922_v15, %s7219_s7  ;;  %v1167_v17 = vmul.f32 0.5, %v6922_v15 }
 0x968   :  { %v1074_v18 = vadd.f32 0.5, %v1073_v16 }
 0x969   :  { %v1168_v19 = vadd.f32 0.5, %v1167_v17 }
 0x96a   :  { %v1075_v32 = vmul.f32 %v1074_v18, %v7541_v47 }
 0x96b   :  { %v1172_v33 = vmul.f32 %v1170_v12, %v1168_v19 }
 0x9d8   :  { %v1078_v20 = vpop.permute.xlu1 %1077 }
 0x9d9   :  { %v1175_v21 = vpop.permute.xlu0 %1174  ;;  %v1080_v22 = vmul.f32 %v1078_v20, %v1074_v18 }
 0x9da   :  { %v1177_v23 = vmul.f32 %v1175_v21, %v1168_v19 }
 0x9db   :  { %1082 = vrot.lane.b32.xlu1 %v1080_v22, %s7220_s3 }
 0x9dc   :  { %1179 = vrot.lane.b32.xlu0 %v1177_v23, %s7220_s3 }
 0xa4d   :  { %v1083_v34 = vpop.permute.xlu1 %1082 }
 0xa4e   :  { %v1180_v35 = vpop.permute.xlu0 %1179  ;;  %v7593_v36 = vadd.f32 %v1083_v34, %v1075_v32 }
 0xa4f   :  { %v7595_v37 = vadd.f32 %v1180_v35, %v1172_v33 }
 0xa50   :  { %6923 = vtanh.f32 %v7593_v36 }
 0xa51   :  { %6925 = vtanh.f32 %v7595_v37  ;;  %v1436_v9 = vrot.slane %v7595_v37, 6 }
 0xa5d   :  { %v6924_v39 = vpop.eup %6923 }
 0xa5e   :  { %v6926_v40 = vpop.eup %6925  ;;  %1088 = vrot.lane.b32.xlu1 %v6924_v39, %s7219_s7 }
 0xa5f   :  { %1185 = vrot.lane.b32.xlu0 %v6926_v40, %s7219_s7 }
 0xad0   :  { %v1089_v41 = vpop.permute.xlu1 %1088 }
 0xad1   :  { %v1186_v42 = vpop.permute.xlu0 %1185  ;;  %v1091_v43 = vmul.f32 %v1089_v41, %v1074_v18 }
 0xad2   :  { %v1188_v44 = vmul.f32 %v1186_v42, %v1168_v19 }
 0xad3   :  { %1190 = vrot.lane.b32.xlu0 %v1091_v43, %s7220_s3 }
 0xad4   :  { %v1265_v45 = vrot.slane %v1188_v44, 6 }
 0xad6   :  { %1266 = vrot.lane.b32.xlu1 %v1265_v45, %s7220_s3 }
 0xb45   :  { %v1191_v46 = vpop.permute.xlu0 %1190 }
 0xb46   :  { %6306 = vmatmul.mubr.msk.f32.vlgmr.msra.gmra.mxu1 %vm285_vm2, %v1191_v46 }
 0xb47   :  { %6320 = vmatpush3.msra.mxu1 %v7353_v2  ;;  %6327 = vmatprep.mubr.msk.f32.mxu1 %vm7218_vm0, %v7217_v0 }
 0xb48   :  { %6321 = vmatprep.subr.mxu1 %v7217_v0  ;;  %v1267_v47 = vpop.permute.xlu1 %1266 }
 0xb49   :  { %6317 = vmatmul.mubr.msk.f32.vlgmr.msra.gmra.mxu0 %vm285_vm2, %v1267_v47  ;;  %6322 = vmatpush3.msra.mxu1 %v7365_v5 }
 0xb4a   :  { %6323 = vmatprep.subr.mxu1 %v7217_v0  ;;  %6331 = vmatpush3.msra.mxu0 %v7403_v24 }
 0xb4b   :  { %6324 = vmatpush3.msra.mxu1 %v7371_v6  ;;  %6332 = vmatprep.subr.mxu0 %v7217_v0 }
 0xb4c   :  { %6325 = vmatprep.subr.mxu1 %v7217_v0  ;;  %6333 = vmatpush3.msra.mxu0 %v7405_v25 }
 0xb4d   :  { %6326 = vmatpush3.msra.mxu1 %v7379_v7  ;;  %6334 = vmatprep.subr.mxu0 %v7217_v0 }
 0xb4e   :  { %6328 = vmatmul.mubr.msk.f32.vlgmr.msra.gmra.mxu1 %vm285_vm2, %v1267_v47  ;;  %6341 = vmatprep.subr.mxu1 %v7217_v0 }
 0xb4f   :  { %6335 = vmatpush3.msra.mxu0 %v7419_v28  ;;  %6342 = vmatpush3.msra.mxu1 %v7411_v26 }
 0xb50   :  { %6336 = vmatprep.subr.mxu0 %v7217_v0  ;;  %6343 = vmatprep.subr.mxu1 %v7217_v0 }
 0xb51   :  { %6337 = vmatpush3.msra.mxu0 %v7430_v30  ;;  %6344 = vmatpush3.msra.mxu1 %v7416_v27 }
 0xb52   :  { %6338 = vmatprep.mubr.msk.f32.mxu0 %vm7218_vm0, %v7217_v0  ;;  %6345 = vmatprep.subr.mxu1 %v7217_v0 }
 0xb53   :  { %6352 = vmatprep.subr.mxu0 %v7217_v0  ;;  %6346 = vmatpush3.msra.mxu1 %v7427_v29 }
 0xb54   :  { %6347 = vmatprep.subr.mxu1 %v7217_v0  ;;  %6349 = vmatprep.mubr.msk.f32.mxu1 %vm7218_vm0, %v7217_v0 }
 0xb55   :  { %6348 = vmatpush3.msra.mxu1 %v7440_v31 }
 0xb56   :  { %6363 = vmatprep.subr.mxu1 %v7217_v0 }
 0xc06   :  { %v1260_v48 = vpop.f32.mrf.mxu1 }
 0xc08   :  { %v6307_v49 = vpop.f32.mrf.mxu1 }
 0xc09   :  { %v1336_v50 = vpop.f32.mrf.mxu0 }
 0xc0a   :  { %v1337_v51 = vadd.f32 %v1336_v50, %v1260_v48 }
 0xc0b   :  { %v6318_v52 = vpop.f32.mrf.mxu0 }
 0xc0c   :  { %v1340_v53 = vadd.f32 %v7482_v38, %v1337_v51 }
 0xc0e   :  { %6927 = vtanh.f32 %v1340_v53  ;;  %v1427_v54 = vpop.f32.mrf.mxu1 }
 0xc0f   :  { %v1431_v55 = vadd.f32 %v1427_v54, %v7393_v10 }
 0xc10   :  { %v6329_v56 = vpop.f32.mrf.mxu1 }
 0xc11   :  { %6929 = vtanh.f32 %v1431_v55 }
 0xc1b   :  { %v6928_v57 = vpop.eup %6927 }
 0xc1c   :  { %1346 = vrot.lane.b32.xlu0 %v6928_v57, %s7219_s7  ;;  %v1342_v59 = vmul.f32 0.5, %v6928_v57 }
 0xc1e   :  { %v6930_v58 = vpop.eup %6929  ;;  %v1343_v61 = vadd.f32 0.5, %v1342_v59 }
 0xc1f   :  { %1440 = vrot.lane.b32.xlu1 %v6930_v58, %s7219_s7  ;;  %v1433_v60 = vmul.f32 0.5, %v6930_v58 }
 0xc20   :  { %v1344_v8 = vmul.f32 %v1343_v61, %v7593_v36 }
 0xc21   :  { %v1434_v1 = vadd.f32 0.5, %v1433_v60 }
 0xc23   :  { %v1438_v14 = vmul.f32 %v1436_v9, %v1434_v1 }
 0xc8e   :  { %v1347_v62 = vpop.permute.xlu0 %1346 }
 0xc8f   :  { %v1349_v63 = vmul.f32 %v1347_v62, %v1343_v61 }
 0xc91   :  { %1351 = vrot.lane.b32.xlu0 %v1349_v63, %s7220_s3  ;;  %v1441_v3 = vpop.permute.xlu1 %1440 }
 0xc92   :  { %v1443_v4 = vmul.f32 %v1441_v3, %v1434_v1 }
 0xc94   :  { %1445 = vrot.lane.b32.xlu1 %v1443_v4, %s7220_s3 }
 0xd03   :  { %v1352_v11 = vpop.permute.xlu0 %1351 }
 0xd04   :  { %v7644_v13 = vadd.f32 %v1352_v11, %v1344_v8 }
 0xd06   :  { %6931 = vtanh.f32 %v7644_v13  ;;  %v1446_v15 = vpop.permute.xlu1 %1445 }
 0xd07   :  { %v7647_v16 = vadd.f32 %v1446_v15, %v1438_v14 }
 0xd09   :  { %6933 = vtanh.f32 %v7647_v16  ;;  %v1704_v56 = vrot.slane %v7647_v16, 6 }
 0xd13   :  { %v6932_v17 = vpop.eup %6931 }
 0xd14   :  { %1357 = vrot.lane.b32.xlu0 %v6932_v17, %s7219_s7 }
 0xd16   :  { %v6934_v18 = vpop.eup %6933 }
 0xd17   :  { %1451 = vrot.lane.b32.xlu1 %v6934_v18, %s7219_s7 }
 0xd86   :  { %v1358_v19 = vpop.permute.xlu0 %1357 }
 0xd87   :  { %v1360_v20 = vmul.f32 %v1358_v19, %v1343_v61 }
 0xd89   :  { %1456 = vrot.lane.b32.xlu0 %v1360_v20, %s7220_s3  ;;  %v1452_v21 = vpop.permute.xlu1 %1451 }
 0xd8a   :  { %v1454_v22 = vmul.f32 %v1452_v21, %v1434_v1 }
 0xd8c   :  { %1531 = vrot.lane.b32.xlu1 %v1454_v22, %s7220_s3 }
 0xdfb   :  { %v1457_v23 = vpop.permute.xlu0 %1456 }
 0xdfc   :  { %6339 = vmatmul.mubr.msk.f32.vlgmr.msra.gmra.mxu0 %vm285_vm2, %v1457_v23 }
 0xdfd   :  { %6353 = vmatpush3.msra.mxu0 %v7353_v2  ;;  %6360 = vmatprep.mubr.msk.f32.mxu0 %vm7218_vm0, %v7217_v0 }
 0xdfe   :  { %6354 = vmatprep.subr.mxu0 %v7217_v0  ;;  %v1532_v12 = vpop.permute.xlu1 %1531 }
 0xdff   :  { %6355 = vmatpush3.msra.mxu0 %v7365_v5  ;;  %6350 = vmatmul.mubr.msk.f32.vlgmr.msra.gmra.mxu1 %vm285_vm2, %v1532_v12 }
 0xe00   :  { %6356 = vmatprep.subr.mxu0 %v7217_v0  ;;  %6364 = vmatpush3.msra.mxu1 %v7403_v24 }
 0xe01   :  { %6357 = vmatpush3.msra.mxu0 %v7371_v6  ;;  %6365 = vmatprep.subr.mxu1 %v7217_v0 }
 0xe02   :  { %6358 = vmatprep.subr.mxu0 %v7217_v0  ;;  %6366 = vmatpush3.msra.mxu1 %v7405_v25 }
 0xe03   :  { %6359 = vmatpush3.msra.mxu0 %v7379_v7  ;;  %6367 = vmatprep.subr.mxu1 %v7217_v0 }
 0xe04   :  { %6361 = vmatmul.mubr.msk.f32.vlgmr.msra.gmra.mxu0 %vm285_vm2, %v1532_v12  ;;  %6368 = vmatpush3.msra.mxu1 %v7419_v28 }
 0xe05   :  { %6369 = vmatprep.subr.mxu1 %v7217_v0  ;;  %6374 = vmatprep.subr.mxu0 %v7217_v0 }
 0xe06   :  { %6370 = vmatpush3.msra.mxu1 %v7430_v30  ;;  %6371 = vmatprep.mubr.msk.f32.mxu1 %vm7218_vm0, %v7217_v0 }
 0xe07   :  { %6375 = vmatpush3.msra.mxu0 %v7411_v26  ;;  %6385 = vmatprep.subr.mxu1 %v7217_v0 }
 0xe08   :  { %6376 = vmatprep.subr.mxu0 %v7217_v0  ;;  %6382 = vmatprep.mubr.msk.f32.mxu0 %vm7218_vm0, %v7217_v0 }
 0xe09   :  { %6377 = vmatpush3.msra.mxu0 %v7416_v27 }
 0xe0a   :  { %6378 = vmatprep.subr.mxu0 %v7217_v0 }
 0xe0b   :  { %6379 = vmatpush3.msra.mxu0 %v7427_v29 }
 0xe0c   :  { %6380 = vmatprep.subr.mxu0 %v7217_v0 }
 0xe0d   :  { %6381 = vmatpush3.msra.mxu0 %v7440_v31 }
 0xe0e   :  { %6396 = vmatprep.subr.mxu0 %v7217_v0 }
 0xebc   :  { %v1526_v32 = vpop.f32.mrf.mxu0 }
 0xebe   :  { %v6340_v33 = vpop.f32.mrf.mxu0 }
 0xebf   :  { %v1601_v34 = vpop.f32.mrf.mxu1 }
 0xec0   :  { %v1602_v35 = vadd.f32 %v1601_v34, %v1526_v32 }
 0xec1   :  { %v6351_v36 = vpop.f32.mrf.mxu1 }
 0xec2   :  { %v1605_v37 = vadd.f32 %v7482_v38, %v1602_v35 }
 0xec4   :  { %6935 = vtanh.f32 %v1605_v37  ;;  %v1692_v39 = vpop.f32.mrf.mxu0 }
 0xec5   :  { %v1697_v40 = vrot.slane %v1692_v39, 6 }
 0xec6   :  { %v6362_v41 = vpop.f32.mrf.mxu0 }
 0xec7   :  { %v1699_v42 = vadd.f32 %v1697_v40, %v7393_v10 }
 0xec9   :  { %6937 = vtanh.f32 %v1699_v42 }
 0xed1   :  { %v6936_v43 = vpop.eup %6935 }
 0xed2   :  { %1611 = vrot.lane.b32.xlu0 %v6936_v43, %s7219_s7  ;;  %v1607_v45 = vmul.f32 0.5, %v6936_v43 }
 0xed4   :  { %v1608_v46 = vadd.f32 0.5, %v1607_v45 }
 0xed6   :  { %v6938_v44 = vpop.eup %6937  ;;  %v1609_v53 = vmul.f32 %v1608_v46, %v7644_v13 }
 0xed7   :  { %1708 = vrot.lane.b32.xlu1 %v6938_v44, %s7219_s7  ;;  %v1701_v48 = vmul.f32 0.5, %v6938_v44 }
 0xed9   :  { %v1702_v50 = vadd.f32 0.5, %v1701_v48  ;;  %v7027_v48 = vld [vmem:[%s8588_s2 + $0x18] sm:$0xff] }
 0xedb   :  { %v1706_v57 = vmul.f32 %v1704_v56, %v1702_v50 }
 0xf44   :  { %v1612_v47 = vpop.permute.xlu0 %1611 }
 0xf45   :  { %v1614_v49 = vmul.f32 %v1612_v47, %v1608_v46 }
 0xf47   :  { %1616 = vrot.lane.b32.xlu0 %v1614_v49, %s7220_s3 }
 0xf49   :  { %v1709_v51 = vpop.permute.xlu1 %1708 }
 0xf4a   :  { %v1711_v52 = vmul.f32 %v1709_v51, %v1702_v50  ;;  %v7029_v51 = vld [vmem:[%s8588_s2 + $0x8] sm:$0xff] }
 0xf4c   :  { %1713 = vrot.lane.b32.xlu1 %v1711_v52, %s7220_s3  ;;  %v7030_v52 = vld [vmem:[%s8588_s2] sm:$0xff] }
 0xfb9   :  { %v1617_v54 = vpop.permute.xlu0 %1616 }
 0xfba   :  { %v7694_v55 = vadd.f32 %v1617_v54, %v1609_v53 }
 0xfbc   :  { %6939 = vtanh.f32 %v7694_v55 }
 0xfbe   :  { %v1714_v58 = vpop.permute.xlu1 %1713 }
 0xfbf   :  { %v7698_v59 = vadd.f32 %v1714_v58, %v1706_v57 }
 0xfc1   :  { %6941 = vtanh.f32 %v7698_v59  ;;  %v1973_v32 = vrot.slane %v7698_v59, 6 }
 0xfc9   :  { %v6940_v60 = vpop.eup %6939 }
 0xfca   :  { %1622 = vrot.lane.b32.xlu0 %v6940_v60, %s7219_s7 }
 0xfce   :  { %v6942_v61 = vpop.eup %6941 }
 0xfcf   :  { %1719 = vrot.lane.b32.xlu1 %v6942_v61, %s7219_s7 }
0x103c   :  { %v1623_v62 = vpop.permute.xlu0 %1622 }
0x103d   :  { %v1625_v63 = vmul.f32 %v1623_v62, %v1608_v46 }
0x103f   :  { %1724 = vrot.lane.b32.xlu0 %v1625_v63, %s7220_s3 }
0x1041   :  { %v1720_v1 = vpop.permute.xlu1 %1719 }
0x1042   :  { %v1722_v3 = vmul.f32 %v1720_v1, %v1702_v50  ;;  %v7028_v50 = vld [vmem:[%s8588_s2 + $0x10] sm:$0xff] }
0x1044   :  { %v1799_v4 = vrot.slane %v1722_v3, 2 }
0x1046   :  { %1800 = vrot.lane.b32.xlu1 %v1799_v4, %s7220_s3 }
0x10b1   :  { %v1725_v8 = vpop.permute.xlu0 %1724 }
0x10b2   :  { %6372 = vmatmul.mubr.msk.f32.vlgmr.msra.gmra.mxu1 %vm285_vm2, %v1725_v8 }
0x10b3   :  { %6386 = vmatpush3.msra.mxu1 %v7353_v2  ;;  %6393 = vmatprep.mubr.msk.f32.mxu1 %vm7218_vm0, %v7217_v0 }
0x10b4   :  { %6387 = vmatprep.subr.mxu1 %v7217_v0 }
0x10b5   :  { %6388 = vmatpush3.msra.mxu1 %v7365_v5 }
0x10b6   :  { %6389 = vmatprep.subr.mxu1 %v7217_v0 }
0x10b7   :  { %6390 = vmatpush3.msra.mxu1 %v7371_v6 }
0x10b8   :  { %v1801_v9 = vpop.permute.xlu1 %1800  ;;  %6391 = vmatprep.subr.mxu1 %v7217_v0 }
0x10b9   :  { %6383 = vmatmul.mubr.msk.f32.vlgmr.msra.gmra.mxu0 %vm285_vm2, %v1801_v9  ;;  %6392 = vmatpush3.msra.mxu1 %v7379_v7 }
0x10ba   :  { %6394 = vmatmul.mubr.msk.f32.vlgmr.msra.gmra.mxu1 %vm285_vm2, %v1801_v9  ;;  %6397 = vmatpush3.msra.mxu0 %v7403_v24 }
0x10bb   :  { %6398 = vmatprep.subr.mxu0 %v7217_v0  ;;  %6407 = vmatprep.subr.mxu1 %v7217_v0 }
0x10bc   :  { %6399 = vmatpush3.msra.mxu0 %v7405_v25  ;;  %6408 = vmatpush3.msra.mxu1 %v7411_v26 }
0x10bd   :  { %6400 = vmatprep.subr.mxu0 %v7217_v0  ;;  %6409 = vmatprep.subr.mxu1 %v7217_v0 }
0x10be   :  { %6401 = vmatpush3.msra.mxu0 %v7419_v28  ;;  %6410 = vmatpush3.msra.mxu1 %v7416_v27 }
0x10bf   :  { %6402 = vmatprep.subr.mxu0 %v7217_v0  ;;  %6404 = vmatprep.mubr.msk.f32.mxu0 %vm7218_vm0, %v7217_v0 }
0x10c0   :  { %6403 = vmatpush3.msra.mxu0 %v7430_v30  ;;  %6411 = vmatprep.subr.mxu1 %v7217_v0 }
0x10c1   :  { %6418 = vmatprep.subr.mxu0 %v7217_v0  ;;  %6412 = vmatpush3.msra.mxu1 %v7427_v29 }
0x10c2   :  { %6413 = vmatprep.subr.mxu1 %v7217_v0  ;;  %6415 = vmatprep.mubr.msk.f32.mxu1 %vm7218_vm0, %v7217_v0 }
0x10c3   :  { %6414 = vmatpush3.msra.mxu1 %v7440_v31 }
0x10c4   :  { %6429 = vmatprep.subr.mxu1 %v7217_v0 }
0x1172   :  { %v1794_v2 = vpop.f32.mrf.mxu1 }
0x1174   :  { %v6373_v5 = vpop.f32.mrf.mxu1 }
0x1179   :  { %v1870_v6 = vpop.f32.mrf.mxu0 }
0x117a   :  { %v1871_v7 = vadd.f32 %v1870_v6, %v1794_v2  ;;  %v1961_v26 = vpop.f32.mrf.mxu1 }
0x117b   :  { %v1966_v27 = vrot.slane %v1961_v26, 4  ;;  %v6384_v11 = vpop.f32.mrf.mxu0 }
0x117c   :  { %v1874_v13 = vadd.f32 %v7482_v38, %v1871_v7  ;;  %v6395_v14 = vpop.f32.mrf.mxu1 }
0x117d   :  { %v1968_v29 = vadd.f32 %v1966_v27, %v7393_v10 }
0x117e   :  { %6943 = vtanh.f32 %v1874_v13 }
0x117f   :  { %6945 = vtanh.f32 %v1968_v29 }
0x118b   :  { %v6944_v15 = vpop.eup %6943 }
0x118c   :  { %v6946_v16 = vpop.eup %6945  ;;  %1880 = vrot.lane.b32.xlu0 %v6944_v15, %s7219_s7  ;;  %v1876_v17 = vmul.f32 0.5, %v6944_v15 }
0x118d   :  { %1977 = vrot.lane.b32.xlu1 %v6946_v16, %s7219_s7  ;;  %v1970_v18 = vmul.f32 0.5, %v6946_v16 }
0x118e   :  { %v1877_v19 = vadd.f32 0.5, %v1876_v17 }
0x118f   :  { %v1971_v21 = vadd.f32 0.5, %v1970_v18 }
0x1190   :  { %v1878_v33 = vmul.f32 %v1877_v19, %v7694_v55 }
0x1191   :  { %v1975_v35 = vmul.f32 %v1973_v32, %v1971_v21 }
0x11fe   :  { %v1881_v20 = vpop.permute.xlu0 %1880 }
0x11ff   :  { %v1883_v22 = vmul.f32 %v1881_v20, %v1877_v19  ;;  %v1978_v23 = vpop.permute.xlu1 %1977 }
0x1200   :  { %v1980_v12 = vmul.f32 %v1978_v23, %v1971_v21  ;;  %v7831_v23 = vld [vmem:[#allocation7] sm:$0xff] }
0x1201   :  { %1885 = vrot.lane.b32.xlu0 %v1883_v22, %s7220_s3  ;;  %v7827_v22 = vld [vmem:[#allocation7 + $0x8] sm:$0xff] }
0x1202   :  { %1982 = vrot.lane.b32.xlu1 %v1980_v12, %s7220_s3 }
0x1273   :  { %v1886_v34 = vpop.permute.xlu0 %1885 }
0x1274   :  { %v7746_v36 = vadd.f32 %v1886_v34, %v1878_v33  ;;  %v1983_v37 = vpop.permute.xlu1 %1982  ;;  %v5796_v34 = vld [vmem:[#allocation9] ss:$0 sm:$0xff] }
0x1275   :  { %v7748_v39 = vadd.f32 %v1983_v37, %v1975_v35 }
0x1276   :  { %6947 = vtanh.f32 %v7746_v36 }
0x1277   :  { %6949 = vtanh.f32 %v7748_v39  ;;  %v2242_v7 = vrot.slane %v7748_v39, 6 }
0x1283   :  { %v6948_v40 = vpop.eup %6947 }
0x1284   :  { %v6950_v41 = vpop.eup %6949  ;;  %1891 = vrot.lane.b32.xlu0 %v6948_v40, %s7219_s7 }
0x1285   :  { %1988 = vrot.lane.b32.xlu1 %v6950_v41, %s7219_s7  ;;  %v7034_v41 = vld [vmem:[#allocation6] ss:$0 sm:$0xff] }
0x12f6   :  { %v1892_v42 = vpop.permute.xlu0 %1891 }
0x12f7   :  { %v1894_v43 = vmul.f32 %v1892_v42, %v1877_v19  ;;  %v1989_v44 = vpop.permute.xlu1 %1988  ;;  %v7818_v19 = vld [vmem:[#allocation7 + $0x18] sm:$0xff] }
0x12f8   :  { %v1991_v45 = vmul.f32 %v1989_v44, %v1971_v21  ;;  %v7821_v21 = vld [vmem:[#allocation7 + $0x10] sm:$0xff] }
0x12f9   :  { %1993 = vrot.lane.b32.xlu0 %v1894_v43, %s7220_s3 }
0x12fa   :  { %v2068_v46 = vrot.slane %v1991_v45, 4 }
0x12fc   :  { %2069 = vrot.lane.b32.xlu1 %v2068_v46, %s7220_s3 }
0x136b   :  { %v1994_v47 = vpop.permute.xlu0 %1993 }
0x136c   :  { %6405 = vmatmul.mubr.msk.f32.vlgmr.msra.gmra.mxu0 %vm285_vm2, %v1994_v47 }
0x136d   :  { %6419 = vmatpush3.msra.mxu0 %v7027_v48  ;;  %6426 = vmatprep.mubr.msk.f32.mxu0 %vm7218_vm0, %v7217_v0 }
0x136e   :  { %6420 = vmatprep.subr.mxu0 %v7217_v0  ;;  %v2070_v49 = vpop.permute.xlu1 %2069 }
0x136f   :  { %6421 = vmatpush3.msra.mxu0 %v7028_v50  ;;  %6416 = vmatmul.mubr.msk.f32.vlgmr.msra.gmra.mxu1 %vm285_vm2, %v2070_v49 }
0x1370   :  { %6422 = vmatprep.subr.mxu0 %v7217_v0  ;;  %6430 = vmatpush3.msra.mxu1 %v7403_v24  ;;  %v7031_v24 = vld [vmem:[%s8590_s4 + $0x18] sm:$0xff] }
0x1371   :  { %6423 = vmatpush3.msra.mxu0 %v7029_v51  ;;  %6431 = vmatprep.subr.mxu1 %v7217_v0 }
0x1372   :  { %6424 = vmatprep.subr.mxu0 %v7217_v0  ;;  %6432 = vmatpush3.msra.mxu1 %v7405_v25  ;;  %v7032_v25 = vld [vmem:[%s8590_s4 + $0x10] sm:$0xff] }
0x1373   :  { %6425 = vmatpush3.msra.mxu0 %v7030_v52  ;;  %6433 = vmatprep.subr.mxu1 %v7217_v0 }
0x1374   :  { %6427 = vmatmul.mubr.msk.f32.vlgmr.msra.gmra.mxu0 %vm285_vm2, %v2070_v49  ;;  %6434 = vmatpush3.msra.mxu1 %v7419_v28  ;;  %v7033_v28 = vld [vmem:[%s8590_s4 + $0x8] sm:$0xff] }
0x1375   :  { %6435 = vmatprep.subr.mxu1 %v7217_v0  ;;  %6440 = vmatprep.subr.mxu0 %v7217_v0 }
0x1376   :  { %6436 = vmatpush3.msra.mxu1 %v7430_v30  ;;  %6437 = vmatprep.mubr.msk.f32.mxu1 %vm7218_vm0, %v7217_v0 }
0x1377   :  { %6441 = vmatpush3.msra.mxu0 %v7031_v24  ;;  %6451 = vmatprep.subr.mxu1 %v7217_v0 }
0x1378   :  { %6442 = vmatprep.subr.mxu0 %v7217_v0  ;;  %6448 = vmatprep.mubr.msk.f32.mxu0 %vm7218_vm0, %v7217_v0 }
0x1379   :  { %6443 = vmatpush3.msra.mxu0 %v7032_v25 }
0x137a   :  { %6444 = vmatprep.subr.mxu0 %v7217_v0 }
0x137b   :  { %6445 = vmatpush3.msra.mxu0 %v7033_v28 }
0x137c   :  { %6446 = vmatprep.subr.mxu0 %v7217_v0 }
0x137d   :  { %6447 = vmatpush3.msra.mxu0 %v7440_v31 }
0x137e   :  { %6462 = vmatprep.subr.mxu0 %v7217_v0 }
0x142c   :  { %v2063_v30 = vpop.f32.mrf.mxu0 }
0x142e   :  { %v6406_v53 = vpop.f32.mrf.mxu0 }
0x142f   :  { %v2139_v54 = vpop.f32.mrf.mxu1 }
0x1430   :  { %v2140_v55 = vadd.f32 %v2139_v54, %v2063_v30 }
0x1431   :  { %v6417_v56 = vpop.f32.mrf.mxu1 }
0x1432   :  { %v2143_v57 = vadd.f32 %v7482_v38, %v2140_v55 }
0x1434   :  { %6951 = vtanh.f32 %v2143_v57  ;;  %v2230_v58 = vpop.f32.mrf.mxu0  ;;  %v7854_v57 = vld [vmem:[#allocation13 + $0x18] sm:$0xff] }
0x1435   :  { %v2235_v59 = vrot.slane %v2230_v58, 2  ;;  %v7859_v58 = vld [vmem:[%s8598_s12 + $0x18] sm:$0xff] }
0x1436   :  { %v6428_v60 = vpop.f32.mrf.mxu0 }
0x1437   :  { %v2237_v61 = vadd.f32 %v2235_v59, %v7393_v10  ;;  %v7861_v59 = vld [vmem:[#allocation13 + $0x10] sm:$0xff]  ;;  %v7868_v60 = vld [vmem:[%s8598_s12 + $0x10] sm:$0xff] }
0x1439   :  { %6953 = vtanh.f32 %v2237_v61  ;;  %v7872_v61 = vld [vmem:[#allocation13 + $0x8] sm:$0xff] }
0x1441   :  { %v6952_v62 = vpop.eup %6951 }
0x1442   :  { %2149 = vrot.lane.b32.xlu0 %v6952_v62, %s7219_s7  ;;  %v2145_v63 = vmul.f32 0.5, %v6952_v62  ;;  %v7877_v62 = vld [vmem:[%s8598_s12 + $0x8] sm:$0xff] }
0x1444   :  { %v2146_v1 = vadd.f32 0.5, %v2145_v63 }
0x1446   :  { %v6954_v31 = vpop.eup %6953  ;;  %v2147_v10 = vmul.f32 %v2146_v1, %v7746_v36 }
0x1447   :  { %2246 = vrot.lane.b32.xlu1 %v6954_v31, %s7219_s7  ;;  %v2239_v4 = vmul.f32 0.5, %v6954_v31  ;;  %v7883_v31 = vld [vmem:[#allocation13] sm:$0xff] }
0x1449   :  { %v2240_v38 = vadd.f32 0.5, %v2239_v4 }
0x144b   :  { %v2244_v26 = vmul.f32 %v2242_v7, %v2240_v38 }
0x14b4   :  { %v2150_v3 = vpop.permute.xlu0 %2149 }
0x14b5   :  { %v2152_v8 = vmul.f32 %v2150_v3, %v2146_v1  ;;  %v7896_v3 = vld [vmem:[%s8598_s12] sm:$0xff] }
0x14b7   :  { %2154 = vrot.lane.b32.xlu0 %v2152_v8, %s7220_s3 }
0x14b9   :  { %v2247_v9 = vpop.permute.xlu1 %2246 }
0x14ba   :  { %v2249_v2 = vmul.f32 %v2247_v9, %v2240_v38 }
0x14bc   :  { %2251 = vrot.lane.b32.xlu1 %v2249_v2, %s7220_s3 }
0x1529   :  { %v2155_v5 = vpop.permute.xlu0 %2154 }
0x152a   :  { %v7810_v6 = vadd.f32 %v2155_v5, %v2147_v10 }
0x152c   :  { %6955 = vtanh.f32 %v7810_v6 }
0x152e   :  { %v2252_v27 = vpop.permute.xlu1 %2251 }
0x152f   :  { %v2254_v11 = vadd.f32 %v2252_v27, %v2244_v26 }
0x1531   :  { %6957 = vtanh.f32 %v2254_v11  ;;  %v2511_v25 = vrot.slane %v2254_v11, 6 }
0x1539   :  { %v6956_v13 = vpop.eup %6955 }
0x153a   :  { %2160 = vrot.lane.b32.xlu0 %v6956_v13, %s7219_s7 }
0x153e   :  { %v6958_v14 = vpop.eup %6957 }
0x153f   :  { %2257 = vrot.lane.b32.xlu1 %v6958_v14, %s7219_s7 }
0x15ac   :  { %v2161_v29 = vpop.permute.xlu0 %2160 }
0x15ad   :  { %v2163_v15 = vmul.f32 %v2161_v29, %v2146_v1 }
0x15af   :  { %2262 = vrot.lane.b32.xlu0 %v2163_v15, %s7220_s3 }
0x15b1   :  { %v2258_v16 = vpop.permute.xlu1 %2257 }
0x15b2   :  { %v2260_v17 = vmul.f32 %v2258_v16, %v2240_v38 }
0x15b4   :  { %v2337_v18 = vrot.slane %v2260_v17, 6 }
0x15b6   :  { %2338 = vrot.lane.b32.xlu1 %v2337_v18, %s7220_s3 }
0x1621   :  { %v2263_v20 = vpop.permute.xlu0 %2262 }
0x1622   :  { %6438 = vmatmul.mubr.msk.f32.vlgmr.msra.gmra.mxu1 %vm285_vm2, %v2263_v20 }
0x1623   :  { %6452 = vmatpush3.msra.mxu1 %v7818_v19  ;;  %6459 = vmatprep.mubr.msk.f32.mxu1 %vm7218_vm0, %v7217_v0 }
0x1624   :  { %6453 = vmatprep.subr.mxu1 %v7217_v0 }
0x1625   :  { %6454 = vmatpush3.msra.mxu1 %v7821_v21 }
0x1626   :  { %6455 = vmatprep.subr.mxu1 %v7217_v0 }
0x1627   :  { %6456 = vmatpush3.msra.mxu1 %v7827_v22 }
0x1628   :  { %v2339_v12 = vpop.permute.xlu1 %2338  ;;  %6457 = vmatprep.subr.mxu1 %v7217_v0 }
0x1629   :  { %6449 = vmatmul.mubr.msk.f32.vlgmr.msra.gmra.mxu0 %vm285_vm2, %v2339_v12  ;;  %6458 = vmatpush3.msra.mxu1 %v7831_v23 }
0x162a   :  { %6460 = vmatmul.mubr.msk.f32.vlgmr.msra.gmra.mxu1 %vm285_vm2, %v2339_v12  ;;  %6473 = vmatprep.subr.mxu1 %v7217_v0 }
0x162b   :  { %6481 = vmatprep.mubr.msk.f32.mxu1 %vm7218_vm0, %v7217_v0  ;;  %6470 = vmatprep.mubr.msk.f32.mxu0 %vm7218_vm0, %v7217_v0 }
0x162c   :  { %6474 = vmatpush3.msra.mxu1 %v7854_v57  ;;  %6463 = vmatpush3.msra.mxu0 %v7859_v58 }
0x162d   :  { %6475 = vmatprep.subr.mxu1 %v7217_v0  ;;  %6464 = vmatprep.subr.mxu0 %v7217_v0 }
0x162e   :  { %6476 = vmatpush3.msra.mxu1 %v7861_v59  ;;  %6465 = vmatpush3.msra.mxu0 %v7868_v60 }
0x162f   :  { %6477 = vmatprep.subr.mxu1 %v7217_v0  ;;  %6466 = vmatprep.subr.mxu0 %v7217_v0 }
0x1630   :  { %6478 = vmatpush3.msra.mxu1 %v7872_v61  ;;  %6467 = vmatpush3.msra.mxu0 %v7877_v62 }
0x1631   :  { %6479 = vmatprep.subr.mxu1 %v7217_v0  ;;  %6468 = vmatprep.subr.mxu0 %v7217_v0 }
0x1632   :  { %6480 = vmatpush3.msra.mxu1 %v7883_v31  ;;  %6469 = vmatpush3.msra.mxu0 %v7896_v3 }
0x1633   :  { %6495 = vmatprep.subr.mxu1 %v7217_v0  ;;  %6484 = vmatprep.subr.mxu0 %v7217_v0 }
0x16e2   :  { %v2332_v32 = vpop.f32.mrf.mxu1 }
0x16e4   :  { %v6439_v33 = vpop.f32.mrf.mxu1 }
0x16e9   :  { %v2408_v35 = vpop.f32.mrf.mxu0 }
0x16ea   :  { %v2409_v36 = vadd.f32 %v2408_v35, %v2332_v32  ;;  %v2503_v37 = vpop.f32.mrf.mxu1  ;;  %v7949_v35 = vld [vmem:[%s8600_s14 + $0x10] sm:$0xff] }
0x16eb   :  { %v2504_v39 = vadd.f32 %v5796_v34, %v2503_v37  ;;  %v6450_v40 = vpop.f32.mrf.mxu0  ;;  %v7944_v34 = vld [vmem:[%s8600_s14 + $0x18] sm:$0xff]  ;;  %v7963_v37 = vld [vmem:[%s8600_s14] sm:$0xff] }
0x16ec   :  { %v2412_v42 = vadd.f32 %v7034_v41, %v2409_v36  ;;  %v6461_v43 = vpop.f32.mrf.mxu1  ;;  %v7956_v36 = vld [vmem:[%s8600_s14 + $0x8] sm:$0xff] }
0x16ed   :  { %6959 = vtanh.f32 %v2504_v39 }
0x16ee   :  { %6961 = vtanh.f32 %v2412_v42  ;;  %v7971_v42 = vld [vmem:[#allocation10 + $0x18] sm:$0xff] }
0x16fa   :  { %v6960_v44 = vpop.eup %6959 }
0x16fb   :  { %v6962_v45 = vpop.eup %6961  ;;  %2515 = vrot.lane.b32.xlu1 %v6960_v44, %s7219_s7  ;;  %v2508_v46 = vmul.f32 0.5, %v6960_v44  ;;  %v7975_v44 = vld [vmem:[#allocation10 + $0x10] sm:$0xff] }
0x16fc   :  { %2418 = vrot.lane.b32.xlu0 %v6962_v45, %s7219_s7  ;;  %v2414_v47 = vmul.f32 0.5, %v6962_v45  ;;  %v7981_v45 = vld [vmem:[#allocation10 + $0x8] sm:$0xff] }
0x16fd   :  { %v2509_v48 = vadd.f32 0.5, %v2508_v46  ;;  %v7987_v46 = vld [vmem:[#allocation10] sm:$0xff] }
0x16fe   :  { %v2415_v50 = vadd.f32 0.5, %v2414_v47 }
0x16ff   :  { %v2513_v28 = vmul.f32 %v2511_v25, %v2509_v48 }
0x1700   :  { %v2416_v53 = vmul.f32 %v2415_v50, %v7810_v6  ;;  %v7930_v6 = vld [vmem:[%s8599_s13] ss:$0 sm:$0xff] }
0x176d   :  { %v2516_v49 = vpop.permute.xlu1 %2515 }
0x176e   :  { %v2518_v51 = vmul.f32 %v2516_v49, %v2509_v48  ;;  %v2419_v52 = vpop.permute.xlu0 %2418 }
0x176f   :  { %v2421_v24 = vmul.f32 %v2419_v52, %v2415_v50 }
0x1770   :  { %2520 = vrot.lane.b32.xlu1 %v2518_v51, %s7220_s3  ;;  %v8014_v51 = vld [vmem:[#allocation12] ss:$0 sm:$0xff] }
0x1771   :  { %2423 = vrot.lane.b32.xlu0 %v2421_v24, %s7220_s3 }
0x17e2   :  { %v2521_v30 = vpop.permute.xlu1 %2520 }
0x17e3   :  { %v7848_v54 = vadd.f32 %v2521_v30, %v2513_v28  ;;  %v2424_v55 = vpop.permute.xlu0 %2423 }
0x17e4   :  { %v7850_v56 = vadd.f32 %v2424_v55, %v2416_v53 }
0x17e5   :  { %6963 = vtanh.f32 %v7848_v54 }
0x17e6   :  { %6965 = vtanh.f32 %v7850_v56 }
0x17f2   :  { %v6964_v63 = vpop.eup %6963 }
0x17f3   :  { %v6966_v1 = vpop.eup %6965  ;;  %2526 = vrot.lane.b32.xlu1 %v6964_v63, %s7219_s7 }
0x17f4   :  { %2429 = vrot.lane.b32.xlu0 %v6966_v1, %s7219_s7 }
0x1865   :  { %v2527_v4 = vpop.permute.xlu1 %2526 }
0x1866   :  { %v2529_v8 = vmul.f32 %v2527_v4, %v2509_v48  ;;  %v2430_v38 = vpop.permute.xlu0 %2429 }
0x1867   :  { %v2432_v9 = vmul.f32 %v2430_v38, %v2415_v50 }
0x1868   :  { %2614 = vrot.lane.b32.xlu1 %v2529_v8, %s7220_s3 }
0x1869   :  { %2539 = vrot.lane.b32.xlu0 %v2432_v9, %s7220_s3 }
0x18da   :  { %v2615_v2 = vpop.permute.xlu1 %2614 }
0x18db   :  { %v2540_v10 = vpop.permute.xlu0 %2539  ;;  %6482 = vmatmul.mubr.msk.f32.vlgmr.msra.gmra.mxu1 %vm285_vm2, %v2615_v2 }
0x18dc   :  { %6496 = vmatpush3.msra.mxu1 %v7818_v19  ;;  %6471 = vmatmul.mubr.msk.f32.vlgmr.msra.gmra.mxu0 %vm285_vm2, %v2540_v10 }
0x18dd   :  { %6497 = vmatprep.subr.mxu1 %v7217_v0  ;;  %6503 = vmatprep.mubr.msk.f32.mxu1 %vm7218_vm0, %v7217_v0 }
0x18de   :  { %6498 = vmatpush3.msra.mxu1 %v7821_v21  ;;  %6492 = vmatprep.mubr.msk.f32.mxu0 %vm7218_vm0, %v7217_v0 }
0x18df   :  { %6499 = vmatprep.subr.mxu1 %v7217_v0  ;;  %6485 = vmatpush3.msra.mxu0 %v7944_v34 }
0x18e0   :  { %6500 = vmatpush3.msra.mxu1 %v7827_v22  ;;  %6486 = vmatprep.subr.mxu0 %v7217_v0 }
0x18e1   :  { %6501 = vmatprep.subr.mxu1 %v7217_v0  ;;  %6487 = vmatpush3.msra.mxu0 %v7949_v35 }
0x18e2   :  { %6502 = vmatpush3.msra.mxu1 %v7831_v23  ;;  %6488 = vmatprep.subr.mxu0 %v7217_v0 }
0x18e3   :  { %6504 = vmatmul.mubr.msk.f32.vlgmr.msra.gmra.mxu1 %vm285_vm2, %v2615_v2  ;;  %6517 = vmatprep.subr.mxu1 %v7217_v0 }
0x18e4   :  { %6518 = vmatpush3.msra.mxu1 %v7859_v58  ;;  %6525 = vmatprep.mubr.msk.f32.mxu1 %vm7218_vm0, %v7217_v0 }
0x18e5   :  { %6519 = vmatprep.subr.mxu1 %v7217_v0  ;;  %6489 = vmatpush3.msra.mxu0 %v7956_v36 }
0x18e6   :  { %6520 = vmatpush3.msra.mxu1 %v7868_v60  ;;  %6490 = vmatprep.subr.mxu0 %v7217_v0 }
0x18e7   :  { %6521 = vmatprep.subr.mxu1 %v7217_v0  ;;  %6491 = vmatpush3.msra.mxu0 %v7963_v37 }
0x18e8   :  { %6522 = vmatpush3.msra.mxu1 %v7877_v62  ;;  %6506 = vmatprep.subr.mxu0 %v7217_v0 }
0x18e9   :  { %6523 = vmatprep.subr.mxu1 %v7217_v0 }
0x18ea   :  { %6524 = vmatpush3.msra.mxu1 %v7896_v3 }
0x18eb   :  { %6539 = vmatprep.subr.mxu1 %v7217_v0 }
0x199b   :  { %v2684_v5 = vpop.f32.mrf.mxu1 }
0x199c   :  { %v2609_v7 = vpop.f32.mrf.mxu0 }
0x199d   :  { %v2685_v26 = vadd.f32 %v2684_v5, %v2609_v7  ;;  %v6483_v27 = vpop.f32.mrf.mxu1 }
0x199e   :  { %v6472_v11 = vpop.f32.mrf.mxu0 }
0x199f   :  { %v2688_v13 = vadd.f32 %v7930_v6, %v2685_v26 }
0x19a1   :  { %6967 = vtanh.f32 %v2688_v13 }
0x19a3   :  { %v7933_v14 = vpop.f32.mrf.mxu1 }
0x19a5   :  { %v6505_v29 = vpop.f32.mrf.mxu1 }
0x19ae   :  { %v6968_v15 = vpop.eup %6967 }
0x19af   :  { %2694 = vrot.lane.b32.xlu0 %v6968_v15, %s7219_s7  ;;  %v2690_v16 = vmul.f32 0.5, %v6968_v15 }
0x19b1   :  { %v2691_v17 = vadd.f32 0.5, %v2690_v16 }
0x19b3   :  { %v2692_v12 = vmul.f32 %v2691_v17, %v7850_v56 }
0x1a21   :  { %v2695_v18 = vpop.permute.xlu0 %2694 }
0x1a22   :  { %v2697_v20 = vmul.f32 %v2695_v18, %v2691_v17 }
0x1a24   :  { %2699 = vrot.lane.b32.xlu1 %v2697_v20, %s7220_s3 }
0x1a96   :  { %v2700_v32 = vpop.permute.xlu1 %2699 }
0x1a97   :  { %v7938_v33 = vadd.f32 %v2700_v32, %v2692_v12 }
0x1a99   :  { %6969 = vtanh.f32 %v7938_v33 }
0x1aa6   :  { %v6970_v39 = vpop.eup %6969 }
0x1aa7   :  { %2705 = vrot.lane.b32.xlu0 %v6970_v39, %s7219_s7 }
0x1b19   :  { %v2706_v40 = vpop.permute.xlu0 %2705 }
0x1b1a   :  { %v2708_v41 = vmul.f32 %v2706_v40, %v2691_v17 }
0x1b1c   :  { %2714 = vrot.lane.b32.xlu1 %v2708_v41, %s7220_s3 }
0x1b8e   :  { %v2715_v43 = vpop.permute.xlu1 %2714 }
0x1b8f   :  { %6493 = vmatmul.mubr.msk.f32.vlgmr.msra.gmra.mxu0 %vm285_vm2, %v2715_v43  ;;  %6526 = vmatmul.mubr.msk.f32.vlgmr.msra.gmra.mxu1 %vm285_vm2, %v2715_v43 }
0x1b90   :  { %6507 = vmatpush3.msra.mxu0 %v7971_v42  ;;  %6514 = vmatprep.mubr.msk.f32.mxu0 %vm7218_vm0, %v7217_v0 }
0x1b91   :  { %6508 = vmatprep.subr.mxu0 %v7217_v0  ;;  %6540 = vmatpush3.msra.mxu1 %v7944_v34 }
0x1b92   :  { %6509 = vmatpush3.msra.mxu0 %v7975_v44  ;;  %6541 = vmatprep.subr.mxu1 %v7217_v0 }
0x1b93   :  { %6510 = vmatprep.subr.mxu0 %v7217_v0  ;;  %6542 = vmatpush3.msra.mxu1 %v7949_v35 }
0x1b94   :  { %6511 = vmatpush3.msra.mxu0 %v7981_v45  ;;  %6543 = vmatprep.subr.mxu1 %v7217_v0 }
0x1b95   :  { %6512 = vmatprep.subr.mxu0 %v7217_v0  ;;  %6544 = vmatpush3.msra.mxu1 %v7956_v36 }
0x1b96   :  { %6513 = vmatpush3.msra.mxu0 %v7987_v46  ;;  %6545 = vmatprep.subr.mxu1 %v7217_v0 }
0x1b97   :  { %6515 = vmatmul.mubr.msk.f32.vlgmr.msra.gmra.mxu0 %vm285_vm2, %v2715_v43  ;;  %6528 = vmatprep.subr.mxu0 %v7217_v0 }
0x1b98   :  { %6529 = vmatpush3.msra.mxu0 %v7854_v57  ;;  %6536 = vmatprep.mubr.msk.f32.mxu0 %vm7218_vm0, %v7217_v0 }
0x1b99   :  { %6530 = vmatprep.subr.mxu0 %v7217_v0  ;;  %6546 = vmatpush3.msra.mxu1 %v7963_v37 }
0x1b9a   :  { %6531 = vmatpush3.msra.mxu0 %v7861_v59  ;;  %6547 = vmatprep.mubr.msk.f32.mxu1 %vm7218_vm0, %v7217_v0 }
0x1b9b   :  { %6532 = vmatprep.subr.mxu0 %v7217_v0  ;;  %6561 = vmatprep.subr.mxu1 %v7217_v0 }
0x1b9c   :  { %6533 = vmatpush3.msra.mxu0 %v7872_v61 }
0x1b9d   :  { %6534 = vmatprep.subr.mxu0 %v7217_v0 }
0x1b9e   :  { %6535 = vmatpush3.msra.mxu0 %v7883_v31 }
0x1b9f   :  { %6550 = vmatprep.subr.mxu0 %v7217_v0 }
0x1c4f   :  { %v8012_v47 = vpop.f32.mrf.mxu0  ;;  %v3037_v48 = vpop.f32.mrf.mxu1 }
0x1c51   :  { %v6494_v49 = vpop.f32.mrf.mxu0  ;;  %v6527_v50 = vpop.f32.mrf.mxu1 }
0x1c57   :  { %v2938_v52 = vpop.f32.mrf.mxu0 }
0x1c58   :  { %v2939_v24 = vadd.f32 %v2938_v52, %v7933_v14 }
0x1c59   :  { %v6516_v25 = vpop.f32.mrf.mxu0 }
0x1c5a   :  { %v2942_v28 = vadd.f32 %v8014_v51, %v2939_v24 }
0x1c5c   :  { %6971 = vtanh.f32 %v2942_v28 }
0x1c69   :  { %v6972_v30 = vpop.eup %6971 }
0x1c6a   :  { %2948 = vrot.lane.b32.xlu0 %v6972_v30, %s7219_s7  ;;  %v2944_v53 = vmul.f32 0.5, %v6972_v30 }
0x1c6c   :  { %v2945_v55 = vadd.f32 0.5, %v2944_v53 }
0x1c6e   :  { %v2946_v1 = vmul.f32 %v2945_v55, %v7848_v54 }
0x1cdc   :  { %v2949_v56 = vpop.permute.xlu0 %2948 }
0x1cdd   :  { %v2951_v63 = vmul.f32 %v2949_v56, %v2945_v55 }
0x1cdf   :  { %2953 = vrot.lane.b32.xlu1 %v2951_v63, %s7220_s3 }
0x1d51   :  { %v2954_v4 = vpop.permute.xlu1 %2953 }
0x1d52   :  { %v8021_v8 = vadd.f32 %v2954_v4, %v2946_v1 }
0x1d54   :  { %6973 = vtanh.f32 %v8021_v8 }
0x1d61   :  { %v6974_v38 = vpop.eup %6973 }
0x1d62   :  { %2959 = vrot.lane.b32.xlu0 %v6974_v38, %s7219_s7 }
0x1dd4   :  { %v2960_v9 = vpop.permute.xlu0 %2959 }
0x1dd5   :  { %v2962_v2 = vmul.f32 %v2960_v9, %v2945_v55 }
0x1dd7   :  { %3042 = vrot.lane.b32.xlu1 %v2962_v2, %s7220_s3 }
0x1e49   :  { %v3043_v10 = vpop.permute.xlu1 %3042 }
0x1e4a   :  { %6537 = vmatmul.mubr.msk.f32.vlgmr.msra.gmra.mxu0 %vm285_vm2, %v3043_v10 }
0x1e4b   :  { %6551 = vmatpush3.msra.mxu0 %v7818_v19  ;;  %6558 = vmatprep.mubr.msk.f32.mxu0 %vm7218_vm0, %v7217_v0 }
0x1e4c   :  { %6552 = vmatprep.subr.mxu0 %v7217_v0 }
0x1e4d   :  { %6553 = vmatpush3.msra.mxu0 %v7821_v21 }
0x1e4e   :  { %6554 = vmatprep.subr.mxu0 %v7217_v0 }
0x1e4f   :  { %6555 = vmatpush3.msra.mxu0 %v7827_v22 }
0x1e50   :  { %6556 = vmatprep.subr.mxu0 %v7217_v0 }
0x1e51   :  { %6557 = vmatpush3.msra.mxu0 %v7831_v23 }
0x1e52   :  { %6559 = vmatmul.mubr.msk.f32.vlgmr.msra.gmra.mxu0 %vm285_vm2, %v3043_v10  ;;  %6572 = vmatprep.subr.mxu0 %v7217_v0 }
0x1e53   :  { %6573 = vmatpush3.msra.mxu0 %v7859_v58  ;;  %6580 = vmatprep.mubr.msk.f32.mxu0 %vm7218_vm0, %v7217_v0 }
0x1e54   :  { %6574 = vmatprep.subr.mxu0 %v7217_v0 }
0x1e55   :  { %6575 = vmatpush3.msra.mxu0 %v7868_v60 }
0x1e56   :  { %6576 = vmatprep.subr.mxu0 %v7217_v0 }
0x1e57   :  { %6577 = vmatpush3.msra.mxu0 %v7877_v62 }
0x1e58   :  { %6578 = vmatprep.subr.mxu0 %v7217_v0 }
0x1e59   :  { %6579 = vmatpush3.msra.mxu0 %v7896_v3 }
0x1e5a   :  { %6594 = vmatprep.subr.mxu0 %v7217_v0 }
0x1f0a   :  { %v3112_v54 = vpop.f32.mrf.mxu0 }
0x1f0b   :  { %v3113_v5 = vadd.f32 %v3112_v54, %v3037_v48 }
0x1f0c   :  { %v6538_v7 = vpop.f32.mrf.mxu0 }
0x1f0d   :  { %v3116_v26 = vadd.f32 %v7930_v6, %v3113_v5 }
0x1f0f   :  { %6975 = vtanh.f32 %v3116_v26 }
0x1f12   :  { %v3296_v27 = vpop.f32.mrf.mxu0 }
0x1f14   :  { %v6560_v11 = vpop.f32.mrf.mxu0 }
0x1f1c   :  { %v6976_v13 = vpop.eup %6975 }
0x1f1d   :  { %3122 = vrot.lane.b32.xlu0 %v6976_v13, %s7219_s7  ;;  %v3118_v14 = vmul.f32 0.5, %v6976_v13 }
0x1f1f   :  { %v3119_v29 = vadd.f32 0.5, %v3118_v14 }
0x1f21   :  { %v3120_v17 = vmul.f32 %v3119_v29, %v7938_v33 }
0x1f8f   :  { %v3123_v15 = vpop.permute.xlu0 %3122 }
0x1f90   :  { %v3125_v16 = vmul.f32 %v3123_v15, %v3119_v29 }
0x1f92   :  { %3127 = vrot.lane.b32.xlu1 %v3125_v16, %s7220_s3 }
0x2004   :  { %v3128_v18 = vpop.permute.xlu1 %3127 }
0x2005   :  { %v8052_v20 = vadd.f32 %v3128_v18, %v3120_v17 }
0x2007   :  { %6977 = vtanh.f32 %v8052_v20 }
0x2014   :  { %v6978_v12 = vpop.eup %6977 }
0x2015   :  { %3133 = vrot.lane.b32.xlu0 %v6978_v12, %s7219_s7 }
0x2087   :  { %v3134_v32 = vpop.permute.xlu0 %3133 }
0x2088   :  { %v3136_v39 = vmul.f32 %v3134_v32, %v3119_v29 }
0x208a   :  { %3142 = vrot.lane.b32.xlu1 %v3136_v39, %s7220_s3 }
0x20fc   :  { %v3143_v40 = vpop.permute.xlu1 %3142 }
0x20fd   :  { %6548 = vmatmul.mubr.msk.f32.vlgmr.msra.gmra.mxu1 %vm285_vm2, %v3143_v40  ;;  %6581 = vmatmul.mubr.msk.f32.vlgmr.msra.gmra.mxu0 %vm285_vm2, %v3143_v40 }
0x20fe   :  { %6562 = vmatpush3.msra.mxu1 %v7971_v42  ;;  %6569 = vmatprep.mubr.msk.f32.mxu1 %vm7218_vm0, %v7217_v0 }
0x20ff   :  { %6563 = vmatprep.subr.mxu1 %v7217_v0  ;;  %6595 = vmatpush3.msra.mxu0 %v7944_v34 }
0x2100   :  { %6564 = vmatpush3.msra.mxu1 %v7975_v44  ;;  %6596 = vmatprep.subr.mxu0 %v7217_v0 }
0x2101   :  { %6565 = vmatprep.subr.mxu1 %v7217_v0  ;;  %6597 = vmatpush3.msra.mxu0 %v7949_v35 }
0x2102   :  { %6566 = vmatpush3.msra.mxu1 %v7981_v45  ;;  %6598 = vmatprep.subr.mxu0 %v7217_v0 }
0x2103   :  { %6567 = vmatprep.subr.mxu1 %v7217_v0  ;;  %6599 = vmatpush3.msra.mxu0 %v7956_v36 }
0x2104   :  { %6568 = vmatpush3.msra.mxu1 %v7987_v46  ;;  %6600 = vmatprep.subr.mxu0 %v7217_v0 }
0x2105   :  { %6570 = vmatmul.mubr.msk.f32.vlgmr.msra.gmra.mxu1 %vm285_vm2, %v3143_v40  ;;  %6583 = vmatprep.subr.mxu1 %v7217_v0 }
0x2106   :  { %6584 = vmatpush3.msra.mxu1 %v7854_v57  ;;  %6591 = vmatprep.mubr.msk.f32.mxu1 %vm7218_vm0, %v7217_v0 }
0x2107   :  { %6585 = vmatprep.subr.mxu1 %v7217_v0  ;;  %6601 = vmatpush3.msra.mxu0 %v7963_v37 }
0x2108   :  { %6586 = vmatpush3.msra.mxu1 %v7861_v59  ;;  %6602 = vmatprep.mubr.msk.f32.mxu0 %vm7218_vm0, %v7217_v0 }
0x2109   :  { %6587 = vmatprep.subr.mxu1 %v7217_v0  ;;  %6616 = vmatprep.subr.mxu0 %v7217_v0 }
0x210a   :  { %6588 = vmatpush3.msra.mxu1 %v7872_v61 }
0x210b   :  { %6589 = vmatprep.subr.mxu1 %v7217_v0 }
0x210c   :  { %6590 = vmatpush3.msra.mxu1 %v7883_v31 }
0x210d   :  { %6605 = vmatprep.subr.mxu1 %v7217_v0 }
0x21bd   :  { %v8090_v33 = vpop.f32.mrf.mxu1  ;;  %v3465_v41 = vpop.f32.mrf.mxu0 }
0x21bf   :  { %v6549_v43 = vpop.f32.mrf.mxu1  ;;  %v6582_v48 = vpop.f32.mrf.mxu0 }
0x21c5   :  { %v3366_v49 = vpop.f32.mrf.mxu1 }
0x21c6   :  { %v3367_v50 = vadd.f32 %v3366_v49, %v3296_v27 }
0x21c7   :  { %v6571_v52 = vpop.f32.mrf.mxu1 }
0x21c8   :  { %v3370_v24 = vadd.f32 %v8014_v51, %v3367_v50 }
0x21ca   :  { %6979 = vtanh.f32 %v3370_v24 }
0x21d7   :  { %v6980_v25 = vpop.eup %6979 }
0x21d8   :  { %3376 = vrot.lane.b32.xlu0 %v6980_v25, %s7219_s7  ;;  %v3372_v28 = vmul.f32 0.5, %v6980_v25 }
0x21da   :  { %v3373_v30 = vadd.f32 0.5, %v3372_v28 }
0x21dc   :  { %v3374_v56 = vmul.f32 %v3373_v30, %v8021_v8 }
0x224a   :  { %v3377_v53 = vpop.permute.xlu0 %3376 }
0x224b   :  { %v3379_v55 = vmul.f32 %v3377_v53, %v3373_v30 }
0x224d   :  { %3381 = vrot.lane.b32.xlu1 %v3379_v55, %s7220_s3 }
0x22bf   :  { %v3382_v63 = vpop.permute.xlu1 %3381 }
0x22c0   :  { %v8096_v1 = vadd.f32 %v3382_v63, %v3374_v56 }
0x22c2   :  { %6981 = vtanh.f32 %v8096_v1 }
0x22cf   :  { %v6982_v4 = vpop.eup %6981 }
0x22d0   :  { %3387 = vrot.lane.b32.xlu0 %v6982_v4, %s7219_s7 }
0x2342   :  { %v3388_v38 = vpop.permute.xlu0 %3387 }
0x2343   :  { %v3390_v9 = vmul.f32 %v3388_v38, %v3373_v30 }
0x2345   :  { %3470 = vrot.lane.b32.xlu1 %v3390_v9, %s7220_s3 }
0x23b7   :  { %v3471_v2 = vpop.permute.xlu1 %3470 }
0x23b8   :  { %6592 = vmatmul.mubr.msk.f32.vlgmr.msra.gmra.mxu1 %vm285_vm2, %v3471_v2 }
0x23b9   :  { %6606 = vmatpush3.msra.mxu1 %v7818_v19  ;;  %6613 = vmatprep.mubr.msk.f32.mxu1 %vm7218_vm0, %v7217_v0 }
0x23ba   :  { %6607 = vmatprep.subr.mxu1 %v7217_v0 }
0x23bb   :  { %6608 = vmatpush3.msra.mxu1 %v7821_v21 }
0x23bc   :  { %6609 = vmatprep.subr.mxu1 %v7217_v0 }
0x23bd   :  { %6610 = vmatpush3.msra.mxu1 %v7827_v22 }
0x23be   :  { %6611 = vmatprep.subr.mxu1 %v7217_v0 }
0x23bf   :  { %6612 = vmatpush3.msra.mxu1 %v7831_v23 }
0x23c0   :  { %6614 = vmatmul.mubr.msk.f32.vlgmr.msra.gmra.mxu1 %vm285_vm2, %v3471_v2  ;;  %6627 = vmatprep.subr.mxu1 %v7217_v0 }
0x23c1   :  { %6628 = vmatpush3.msra.mxu1 %v7859_v58  ;;  %6635 = vmatprep.mubr.msk.f32.mxu1 %vm7218_vm0, %v7217_v0 }
0x23c2   :  { %6629 = vmatprep.subr.mxu1 %v7217_v0 }
0x23c3   :  { %6630 = vmatpush3.msra.mxu1 %v7868_v60 }
0x23c4   :  { %6631 = vmatprep.subr.mxu1 %v7217_v0 }
0x23c5   :  { %6632 = vmatpush3.msra.mxu1 %v7877_v62 }
0x23c6   :  { %6633 = vmatprep.subr.mxu1 %v7217_v0 }
0x23c7   :  { %6634 = vmatpush3.msra.mxu1 %v7896_v3 }
0x23c8   :  { %6649 = vmatprep.subr.mxu1 %v7217_v0 }
0x2478   :  { %v3540_v8 = vpop.f32.mrf.mxu1 }
0x2479   :  { %v3541_v10 = vadd.f32 %v3540_v8, %v3465_v41 }
0x247a   :  { %v6593_v54 = vpop.f32.mrf.mxu1 }
0x247b   :  { %v3544_v5 = vadd.f32 %v7930_v6, %v3541_v10 }
0x247d   :  { %6983 = vtanh.f32 %v3544_v5 }
0x2480   :  { %v3724_v7 = vpop.f32.mrf.mxu1 }
0x2482   :  { %v6615_v26 = vpop.f32.mrf.mxu1 }
0x248a   :  { %v6984_v27 = vpop.eup %6983 }
0x248b   :  { %3550 = vrot.lane.b32.xlu0 %v6984_v27, %s7219_s7  ;;  %v3546_v11 = vmul.f32 0.5, %v6984_v27 }
0x248d   :  { %v3547_v13 = vadd.f32 0.5, %v3546_v11 }
0x248f   :  { %v3548_v15 = vmul.f32 %v3547_v13, %v8052_v20 }
0x24fd   :  { %v3551_v14 = vpop.permute.xlu0 %3550 }
0x24fe   :  { %v3553_v29 = vmul.f32 %v3551_v14, %v3547_v13 }
0x2500   :  { %3555 = vrot.lane.b32.xlu1 %v3553_v29, %s7220_s3 }
0x2572   :  { %v3556_v16 = vpop.permute.xlu1 %3555 }
0x2573   :  { %v8127_v17 = vadd.f32 %v3556_v16, %v3548_v15 }
0x2575   :  { %6985 = vtanh.f32 %v8127_v17 }
0x2582   :  { %v6986_v18 = vpop.eup %6985 }
0x2583   :  { %3561 = vrot.lane.b32.xlu0 %v6986_v18, %s7219_s7 }
0x25f5   :  { %v3562_v12 = vpop.permute.xlu0 %3561 }
0x25f6   :  { %v3564_v32 = vmul.f32 %v3562_v12, %v3547_v13 }
0x25f8   :  { %3570 = vrot.lane.b32.xlu1 %v3564_v32, %s7220_s3 }
0x266a   :  { %v3571_v39 = vpop.permute.xlu1 %3570 }
0x266b   :  { %6603 = vmatmul.mubr.msk.f32.vlgmr.msra.gmra.mxu0 %vm285_vm2, %v3571_v39  ;;  %6636 = vmatmul.mubr.msk.f32.vlgmr.msra.gmra.mxu1 %vm285_vm2, %v3571_v39 }
0x266c   :  { %6617 = vmatpush3.msra.mxu0 %v7971_v42  ;;  %6624 = vmatprep.mubr.msk.f32.mxu0 %vm7218_vm0, %v7217_v0 }
0x266d   :  { %6618 = vmatprep.subr.mxu0 %v7217_v0  ;;  %6650 = vmatpush3.msra.mxu1 %v7944_v34 }
0x266e   :  { %6619 = vmatpush3.msra.mxu0 %v7975_v44  ;;  %6651 = vmatprep.subr.mxu1 %v7217_v0 }
0x266f   :  { %6620 = vmatprep.subr.mxu0 %v7217_v0  ;;  %6652 = vmatpush3.msra.mxu1 %v7949_v35 }
0x2670   :  { %6621 = vmatpush3.msra.mxu0 %v7981_v45  ;;  %6653 = vmatprep.subr.mxu1 %v7217_v0 }
0x2671   :  { %6622 = vmatprep.subr.mxu0 %v7217_v0  ;;  %6654 = vmatpush3.msra.mxu1 %v7956_v36 }
0x2672   :  { %6623 = vmatpush3.msra.mxu0 %v7987_v46  ;;  %6655 = vmatprep.subr.mxu1 %v7217_v0 }
0x2673   :  { %6625 = vmatmul.mubr.msk.f32.vlgmr.msra.gmra.mxu0 %vm285_vm2, %v3571_v39  ;;  %6638 = vmatprep.subr.mxu0 %v7217_v0 }
0x2674   :  { %6639 = vmatpush3.msra.mxu0 %v7854_v57  ;;  %6646 = vmatprep.mubr.msk.f32.mxu0 %vm7218_vm0, %v7217_v0 }
0x2675   :  { %6640 = vmatprep.subr.mxu0 %v7217_v0  ;;  %6656 = vmatpush3.msra.mxu1 %v7963_v37 }
0x2676   :  { %6641 = vmatpush3.msra.mxu0 %v7861_v59  ;;  %6657 = vmatprep.mubr.msk.f32.mxu1 %vm7218_vm0, %v7217_v0 }
0x2677   :  { %6642 = vmatprep.subr.mxu0 %v7217_v0  ;;  %6671 = vmatprep.subr.mxu1 %v7217_v0 }
0x2678   :  { %6643 = vmatpush3.msra.mxu0 %v7872_v61 }
0x2679   :  { %6644 = vmatprep.subr.mxu0 %v7217_v0 }
0x267a   :  { %6645 = vmatpush3.msra.mxu0 %v7883_v31 }
0x267b   :  { %6660 = vmatprep.subr.mxu0 %v7217_v0 }
0x272b   :  { %v8165_v20 = vpop.f32.mrf.mxu0  ;;  %v3893_v40 = vpop.f32.mrf.mxu1 }
0x272d   :  { %v6604_v41 = vpop.f32.mrf.mxu0  ;;  %v6637_v43 = vpop.f32.mrf.mxu1 }
0x272e   :  { %v8251_v43 = vld [vmem:[#allocation7 + $0x18] sm:$0xff] }
0x2733   :  { %v3794_v48 = vpop.f32.mrf.mxu0 }
0x2734   :  { %v3795_v49 = vadd.f32 %v3794_v48, %v3724_v7 }
0x2735   :  { %v6626_v50 = vpop.f32.mrf.mxu0 }
0x2736   :  { %v3798_v52 = vadd.f32 %v8014_v51, %v3795_v49  ;;  %v8254_v49 = vld [vmem:[#allocation7 + $0x10] sm:$0xff]  ;;  %v8260_v50 = vld [vmem:[#allocation7 + $0x8] sm:$0xff] }
0x2738   :  { %6987 = vtanh.f32 %v3798_v52  ;;  %v8264_v52 = vld [vmem:[#allocation7] sm:$0xff] }
0x2745   :  { %v6988_v24 = vpop.eup %6987 }
0x2746   :  { %3804 = vrot.lane.b32.xlu0 %v6988_v24, %s7219_s7  ;;  %v3800_v25 = vmul.f32 0.5, %v6988_v24 }
0x2748   :  { %v3801_v28 = vadd.f32 0.5, %v3800_v25 }
0x274a   :  { %v3802_v55 = vmul.f32 %v3801_v28, %v8096_v1 }
0x27b8   :  { %v3805_v30 = vpop.permute.xlu0 %3804 }
0x27b9   :  { %v3807_v53 = vmul.f32 %v3805_v30, %v3801_v28 }
0x27bb   :  { %3809 = vrot.lane.b32.xlu1 %v3807_v53, %s7220_s3 }
0x282d   :  { %v3810_v56 = vpop.permute.xlu1 %3809 }
0x282e   :  { %v8171_v63 = vadd.f32 %v3810_v56, %v3802_v55 }
0x2830   :  { %6989 = vtanh.f32 %v8171_v63 }
0x283d   :  { %v6990_v4 = vpop.eup %6989 }
0x283e   :  { %3815 = vrot.lane.b32.xlu0 %v6990_v4, %s7219_s7 }
0x28b0   :  { %v3816_v38 = vpop.permute.xlu0 %3815 }
0x28b1   :  { %v3818_v9 = vmul.f32 %v3816_v38, %v3801_v28 }
0x28b3   :  { %3898 = vrot.lane.b32.xlu1 %v3818_v9, %s7220_s3 }
0x2925   :  { %v3899_v2 = vpop.permute.xlu1 %3898 }
0x2926   :  { %6647 = vmatmul.mubr.msk.f32.vlgmr.msra.gmra.mxu0 %vm285_vm2, %v3899_v2 }
0x2927   :  { %6661 = vmatpush3.msra.mxu0 %v7818_v19  ;;  %6668 = vmatprep.mubr.msk.f32.mxu0 %vm7218_vm0, %v7217_v0 }
0x2928   :  { %6662 = vmatprep.subr.mxu0 %v7217_v0 }
0x2929   :  { %6663 = vmatpush3.msra.mxu0 %v7821_v21 }
0x292a   :  { %6664 = vmatprep.subr.mxu0 %v7217_v0 }
0x292b   :  { %6665 = vmatpush3.msra.mxu0 %v7827_v22 }
0x292c   :  { %6666 = vmatprep.subr.mxu0 %v7217_v0 }
0x292d   :  { %6667 = vmatpush3.msra.mxu0 %v7831_v23 }
0x292e   :  { %6669 = vmatmul.mubr.msk.f32.vlgmr.msra.gmra.mxu0 %vm285_vm2, %v3899_v2  ;;  %6682 = vmatprep.subr.mxu0 %v7217_v0 }
0x292f   :  { %6683 = vmatpush3.msra.mxu0 %v7859_v58  ;;  %6690 = vmatprep.mubr.msk.f32.mxu0 %vm7218_vm0, %v7217_v0 }
0x2930   :  { %6684 = vmatprep.subr.mxu0 %v7217_v0 }
0x2931   :  { %6685 = vmatpush3.msra.mxu0 %v7868_v60 }
0x2932   :  { %6686 = vmatprep.subr.mxu0 %v7217_v0 }
0x2933   :  { %6687 = vmatpush3.msra.mxu0 %v7877_v62 }
0x2934   :  { %6688 = vmatprep.subr.mxu0 %v7217_v0 }
0x2935   :  { %6689 = vmatpush3.msra.mxu0 %v7896_v3 }
0x2936   :  { %6704 = vmatprep.subr.mxu0 %v7217_v0 }
0x29e6   :  { %v3968_v19 = vpop.f32.mrf.mxu0 }
0x29e7   :  { %v3969_v21 = vadd.f32 %v3968_v19, %v3893_v40 }
0x29e8   :  { %v6648_v22 = vpop.f32.mrf.mxu0 }
0x29e9   :  { %v3972_v23 = vadd.f32 %v7930_v6, %v3969_v21  ;;  %v8288_v22 = vld [vmem:[%s8598_s12 + $0x10] sm:$0xff] }
0x29eb   :  { %6991 = vtanh.f32 %v3972_v23  ;;  %v8295_v23 = vld [vmem:[%s8598_s12 + $0x8] sm:$0xff] }
0x29ee   :  { %v4152_v58 = vpop.f32.mrf.mxu0 }
0x29f0   :  { %v6670_v1 = vpop.f32.mrf.mxu0 }
0x29f8   :  { %v6992_v8 = vpop.eup %6991 }
0x29f9   :  { %3978 = vrot.lane.b32.xlu0 %v6992_v8, %s7219_s7  ;;  %v3974_v60 = vmul.f32 0.5, %v6992_v8 }
0x29fb   :  { %v3975_v10 = vadd.f32 0.5, %v3974_v60 }
0x29fd   :  { %v3976_v3 = vmul.f32 %v3975_v10, %v8127_v17 }
0x2a6b   :  { %v3979_v62 = vpop.permute.xlu0 %3978 }
0x2a6c   :  { %v3981_v54 = vmul.f32 %v3979_v62, %v3975_v10 }
0x2a6e   :  { %3983 = vrot.lane.b32.xlu1 %v3981_v54, %s7220_s3 }
0x2ae0   :  { %v3984_v5 = vpop.permute.xlu1 %3983 }
0x2ae1   :  { %v8202_v7 = vadd.f32 %v3984_v5, %v3976_v3 }
0x2ae3   :  { %6993 = vtanh.f32 %v8202_v7 }
0x2af0   :  { %v6994_v26 = vpop.eup %6993 }
0x2af1   :  { %3989 = vrot.lane.b32.xlu0 %v6994_v26, %s7219_s7 }
0x2b63   :  { %v3990_v27 = vpop.permute.xlu0 %3989 }
0x2b64   :  { %v3992_v11 = vmul.f32 %v3990_v27, %v3975_v10 }
0x2b66   :  { %3998 = vrot.lane.b32.xlu1 %v3992_v11, %s7220_s3 }
0x2bd8   :  { %v3999_v13 = vpop.permute.xlu1 %3998 }
0x2bd9   :  { %6658 = vmatmul.mubr.msk.f32.vlgmr.msra.gmra.mxu1 %vm285_vm2, %v3999_v13  ;;  %6691 = vmatmul.mubr.msk.f32.vlgmr.msra.gmra.mxu0 %vm285_vm2, %v3999_v13 }
0x2bda   :  { %6672 = vmatpush3.msra.mxu1 %v7971_v42  ;;  %6679 = vmatprep.mubr.msk.f32.mxu1 %vm7218_vm0, %v7217_v0 }
0x2bdb   :  { %6673 = vmatprep.subr.mxu1 %v7217_v0  ;;  %6705 = vmatpush3.msra.mxu0 %v7944_v34 }
0x2bdc   :  { %6674 = vmatpush3.msra.mxu1 %v7975_v44  ;;  %6706 = vmatprep.subr.mxu0 %v7217_v0 }
0x2bdd   :  { %6675 = vmatprep.subr.mxu1 %v7217_v0  ;;  %6707 = vmatpush3.msra.mxu0 %v7949_v35 }
0x2bde   :  { %6676 = vmatpush3.msra.mxu1 %v7981_v45  ;;  %6708 = vmatprep.subr.mxu0 %v7217_v0 }
0x2bdf   :  { %6677 = vmatprep.subr.mxu1 %v7217_v0  ;;  %6709 = vmatpush3.msra.mxu0 %v7956_v36 }
0x2be0   :  { %6678 = vmatpush3.msra.mxu1 %v7987_v46  ;;  %6710 = vmatprep.subr.mxu0 %v7217_v0 }
0x2be1   :  { %6680 = vmatmul.mubr.msk.f32.vlgmr.msra.gmra.mxu1 %vm285_vm2, %v3999_v13  ;;  %6693 = vmatprep.subr.mxu1 %v7217_v0 }
0x2be2   :  { %6694 = vmatpush3.msra.mxu1 %v7854_v57  ;;  %6701 = vmatprep.mubr.msk.f32.mxu1 %vm7218_vm0, %v7217_v0 }
0x2be3   :  { %6695 = vmatprep.subr.mxu1 %v7217_v0  ;;  %6711 = vmatpush3.msra.mxu0 %v7963_v37 }
0x2be4   :  { %6696 = vmatpush3.msra.mxu1 %v7861_v59  ;;  %6712 = vmatprep.mubr.msk.f32.mxu0 %vm7218_vm0, %v7217_v0 }
0x2be5   :  { %6697 = vmatprep.subr.mxu1 %v7217_v0  ;;  %6726 = vmatprep.subr.mxu0 %v7217_v0 }
0x2be6   :  { %6698 = vmatpush3.msra.mxu1 %v7872_v61 }
0x2be7   :  { %6699 = vmatprep.subr.mxu1 %v7217_v0 }
0x2be8   :  { %6700 = vmatpush3.msra.mxu1 %v7883_v31 }
0x2be9   :  { %6715 = vmatprep.subr.mxu1 %v7217_v0 }
0x2c99   :  { %v8240_v57 = vpop.f32.mrf.mxu1  ;;  %v4321_v34 = vpop.f32.mrf.mxu0 }
0x2c9b   :  { %v6659_v35 = vpop.f32.mrf.mxu1  ;;  %v6692_v59 = vpop.f32.mrf.mxu0 }
0x2ca1   :  { %v4222_v36 = vpop.f32.mrf.mxu1 }
0x2ca2   :  { %v4223_v37 = vadd.f32 %v4222_v36, %v4152_v58  ;;  %v8302_v58 = vld [vmem:[%s8598_s12] sm:$0xff] }
0x2ca3   :  { %v6681_v14 = vpop.f32.mrf.mxu1  ;;  %v8336_v36 = vld [vmem:[#allocation13 + $0x18] sm:$0xff] }
0x2ca4   :  { %v4226_v29 = vadd.f32 %v8014_v51, %v4223_v37  ;;  %v8342_v37 = vld [vmem:[#allocation13 + $0x8] sm:$0xff]  ;;  %v8346_v14 = vld [vmem:[#allocation13] sm:$0xff] }
0x2ca6   :  { %6995 = vtanh.f32 %v4226_v29 }
0x2cb3   :  { %v6996_v15 = vpop.eup %6995 }
0x2cb4   :  { %4232 = vrot.lane.b32.xlu0 %v6996_v15, %s7219_s7  ;;  %v4228_v61 = vmul.f32 0.5, %v6996_v15 }
0x2cb6   :  { %v4229_v16 = vadd.f32 0.5, %v4228_v61 }
0x2cb8   :  { %v4230_v18 = vmul.f32 %v4229_v16, %v8171_v63 }
0x2d26   :  { %v4233_v17 = vpop.permute.xlu0 %4232 }
0x2d27   :  { %v4235_v31 = vmul.f32 %v4233_v17, %v4229_v16 }
0x2d29   :  { %4237 = vrot.lane.b32.xlu1 %v4235_v31, %s7220_s3 }
0x2d9b   :  { %v4238_v12 = vpop.permute.xlu1 %4237 }
0x2d9c   :  { %v8246_v32 = vadd.f32 %v4238_v12, %v4230_v18  ;;  %v8379_v12 = vld [vmem:[%s8599_s13] ss:$0 sm:$0xff] }
0x2d9e   :  { %6997 = vtanh.f32 %v8246_v32 }
0x2dab   :  { %v6998_v39 = vpop.eup %6997 }
0x2dac   :  { %4243 = vrot.lane.b32.xlu0 %v6998_v39, %s7219_s7 }
0x2e1e   :  { %v4244_v40 = vpop.permute.xlu0 %4243 }
0x2e1f   :  { %v4246_v41 = vmul.f32 %v4244_v40, %v4229_v16 }
0x2e21   :  { %4326 = vrot.lane.b32.xlu1 %v4246_v41, %s7220_s3 }
0x2e93   :  { %v4327_v48 = vpop.permute.xlu1 %4326 }
0x2e94   :  { %6702 = vmatmul.mubr.msk.f32.vlgmr.msra.gmra.mxu1 %vm285_vm2, %v4327_v48 }
0x2e95   :  { %6716 = vmatpush3.msra.mxu1 %v8251_v43  ;;  %6723 = vmatprep.mubr.msk.f32.mxu1 %vm7218_vm0, %v7217_v0 }
0x2e96   :  { %6717 = vmatprep.subr.mxu1 %v7217_v0 }
0x2e97   :  { %6718 = vmatpush3.msra.mxu1 %v8254_v49 }
0x2e98   :  { %6719 = vmatprep.subr.mxu1 %v7217_v0 }
0x2e99   :  { %6720 = vmatpush3.msra.mxu1 %v8260_v50 }
0x2e9a   :  { %6721 = vmatprep.subr.mxu1 %v7217_v0 }
0x2e9b   :  { %6722 = vmatpush3.msra.mxu1 %v8264_v52 }
0x2e9c   :  { %6724 = vmatmul.mubr.msk.f32.vlgmr.msra.gmra.mxu1 %vm285_vm2, %v4327_v48  ;;  %6737 = vmatprep.subr.mxu1 %v7217_v0 }
0x2e9d   :  { %6745 = vmatprep.mubr.msk.f32.mxu1 %vm7218_vm0, %v7217_v0 }
0x2f54   :  { %v4396_v24 = vpop.f32.mrf.mxu1 }
0x2f55   :  { %v4397_v25 = vadd.f32 %v4396_v24, %v4321_v34 }
0x2f56   :  { %v6703_v28 = vpop.f32.mrf.mxu1 }
0x2f57   :  { %v4400_v30 = vadd.f32 %v7930_v6, %v4397_v25  ;;  %v8283_v6 = vld [vmem:[%s8598_s12 + $0x18] sm:$0xff] }
0x2f58   :  { %6738 = vmatpush3.msra.mxu1 %v8283_v6 }
0x2f59   :  { %6999 = vtanh.f32 %v4400_v30  ;;  %6739 = vmatprep.subr.mxu1 %v7217_v0 }
0x2f5a   :  { %6740 = vmatpush3.msra.mxu1 %v8288_v22 }
0x2f5b   :  { %6741 = vmatprep.subr.mxu1 %v7217_v0 }
0x2f5c   :  { %v4580_v53 = vpop.f32.mrf.mxu1  ;;  %6742 = vmatpush3.msra.mxu1 %v8295_v23 }
0x2f5d   :  { %6743 = vmatprep.subr.mxu1 %v7217_v0 }
0x2f5e   :  { %v6725_v55 = vpop.f32.mrf.mxu1  ;;  %6744 = vmatpush3.msra.mxu1 %v8302_v58 }
0x2f5f   :  { %6759 = vmatprep.subr.mxu1 %v7217_v0 }
0x2f66   :  { %v7000_v56 = vpop.eup %6999 }
0x2f67   :  { %4406 = vrot.lane.b32.xlu0 %v7000_v56, %s7219_s7  ;;  %v4402_v63 = vmul.f32 0.5, %v7000_v56  ;;  %v8393_v56 = vld [vmem:[%s8600_s14 + $0x18] sm:$0xff] }
0x2f69   :  { %v4403_v4 = vadd.f32 0.5, %v4402_v63  ;;  %v8398_v63 = vld [vmem:[%s8600_s14 + $0x10] sm:$0xff] }
0x2f6b   :  { %v4404_v2 = vmul.f32 %v4403_v4, %v8202_v7 }
0x2fd9   :  { %v4407_v38 = vpop.permute.xlu0 %4406 }
0x2fda   :  { %v4409_v9 = vmul.f32 %v4407_v38, %v4403_v4  ;;  %v8412_v38 = vld [vmem:[%s8600_s14] sm:$0xff] }
0x2fdc   :  { %4411 = vrot.lane.b32.xlu1 %v4409_v9, %s7220_s3 }
0x304e   :  { %v4412_v19 = vpop.permute.xlu1 %4411 }
0x304f   :  { %v8277_v21 = vadd.f32 %v4412_v19, %v4404_v2 }
0x3051   :  { %7001 = vtanh.f32 %v8277_v21 }
0x305e   :  { %v7002_v1 = vpop.eup %7001 }
0x305f   :  { %4417 = vrot.lane.b32.xlu0 %v7002_v1, %s7219_s7 }
0x30d1   :  { %v4418_v8 = vpop.permute.xlu0 %4417 }
0x30d2   :  { %v4420_v60 = vmul.f32 %v4418_v8, %v4403_v4  ;;  %v8405_v4 = vld [vmem:[%s8600_s14 + $0x8] sm:$0xff]  ;;  %v8424_v8 = vld [vmem:[#allocation10 + $0x10] sm:$0xff] }
0x30d4   :  { %4426 = vrot.lane.b32.xlu1 %v4420_v60, %s7220_s3  ;;  %v8430_v60 = vld [vmem:[#allocation10 + $0x8] sm:$0xff] }
0x3146   :  { %v4427_v10 = vpop.permute.xlu1 %4426 }
0x3147   :  { %6713 = vmatmul.mubr.msk.f32.vlgmr.msra.gmra.mxu0 %vm285_vm2, %v4427_v10  ;;  %6746 = vmatmul.mubr.msk.f32.vlgmr.msra.gmra.mxu1 %vm285_vm2, %v4427_v10 }
0x3148   :  { %6727 = vmatpush3.msra.mxu0 %v7971_v42  ;;  %6734 = vmatprep.mubr.msk.f32.mxu0 %vm7218_vm0, %v7217_v0 }
0x3149   :  { %6728 = vmatprep.subr.mxu0 %v7217_v0  ;;  %6767 = vmatprep.mubr.msk.f32.mxu1 %vm7218_vm0, %v7217_v0 }
0x314a   :  { %6729 = vmatpush3.msra.mxu0 %v7975_v44  ;;  %6760 = vmatpush3.msra.mxu1 %v8393_v56 }
0x314b   :  { %6730 = vmatprep.subr.mxu0 %v7217_v0  ;;  %6761 = vmatprep.subr.mxu1 %v7217_v0 }
0x314c   :  { %6731 = vmatpush3.msra.mxu0 %v7981_v45  ;;  %6762 = vmatpush3.msra.mxu1 %v8398_v63 }
0x314d   :  { %6732 = vmatprep.subr.mxu0 %v7217_v0  ;;  %6763 = vmatprep.subr.mxu1 %v7217_v0 }
0x314e   :  { %6733 = vmatpush3.msra.mxu0 %v7987_v46  ;;  %6764 = vmatpush3.msra.mxu1 %v8405_v4 }
0x314f   :  { %6735 = vmatmul.mubr.msk.f32.vlgmr.msra.gmra.mxu0 %vm285_vm2, %v4427_v10  ;;  %6748 = vmatprep.subr.mxu0 %v7217_v0  ;;  %v8436_v10 = vld [vmem:[#allocation10] sm:$0xff] }
0x3150   :  { %6756 = vmatprep.mubr.msk.f32.mxu0 %vm7218_vm0, %v7217_v0  ;;  %6749 = vmatpush3.msra.mxu0 %v8336_v36 }
0x3151   :  { %6750 = vmatprep.subr.mxu0 %v7217_v0  ;;  %6765 = vmatprep.subr.mxu1 %v7217_v0 }
0x3152   :  { %6766 = vmatpush3.msra.mxu1 %v8412_v38 }
0x3153   :  { %6781 = vmatprep.subr.mxu1 %v7217_v0 }
0x3207   :  { %v8327_v42 = vpop.f32.mrf.mxu0  ;;  %v4749_v62 = vpop.f32.mrf.mxu1 }
0x3209   :  { %v6714_v54 = vpop.f32.mrf.mxu0  ;;  %v6747_v44 = vpop.f32.mrf.mxu1 }
0x320f   :  { %v4650_v3 = vpop.f32.mrf.mxu0 }
0x3210   :  { %v4651_v5 = vadd.f32 %v4650_v3, %v4580_v53 }
0x3211   :  { %v6736_v7 = vpop.f32.mrf.mxu0 }
0x3212   :  { %v4654_v45 = vadd.f32 %v8014_v51, %v4651_v5  ;;  %v8338_v51 = vld [vmem:[#allocation13 + $0x10] sm:$0xff] }
0x3213   :  { %6751 = vmatpush3.msra.mxu0 %v8338_v51 }
0x3214   :  { %7003 = vtanh.f32 %v4654_v45  ;;  %6752 = vmatprep.subr.mxu0 %v7217_v0 }
0x3215   :  { %6753 = vmatpush3.msra.mxu0 %v8342_v37 }
0x3216   :  { %6754 = vmatprep.subr.mxu0 %v7217_v0 }
0x3217   :  { %6755 = vmatpush3.msra.mxu0 %v8346_v14 }
0x3218   :  { %6770 = vmatprep.subr.mxu0 %v7217_v0 }
0x3221   :  { %v7004_v26 = vpop.eup %7003 }
0x3222   :  { %4660 = vrot.lane.b32.xlu0 %v7004_v26, %s7219_s7  ;;  %v4656_v46 = vmul.f32 0.5, %v7004_v26  ;;  %v8464_v26 = vld [vmem:[#allocation12] ss:$0 sm:$0xff] }
0x3224   :  { %v4657_v27 = vadd.f32 0.5, %v4656_v46 }
0x3226   :  { %v4658_v34 = vmul.f32 %v4657_v27, %v8246_v32 }
0x3294   :  { %v4661_v11 = vpop.permute.xlu0 %4660 }
0x3295   :  { %v4663_v13 = vmul.f32 %v4661_v11, %v4657_v27 }
0x3297   :  { %4665 = vrot.lane.b32.xlu1 %v4663_v13, %s7220_s3 }
0x3309   :  { %v4666_v35 = vpop.permute.xlu1 %4665 }
0x330a   :  { %v8333_v59 = vadd.f32 %v4666_v35, %v4658_v34 }
0x330c   :  { %7005 = vtanh.f32 %v8333_v59 }
0x3319   :  { %v7006_v29 = vpop.eup %7005 }
0x331a   :  { %4671 = vrot.lane.b32.xlu0 %v7006_v29, %s7219_s7 }
0x338c   :  { %v4672_v15 = vpop.permute.xlu0 %4671 }
0x338d   :  { %v4674_v61 = vmul.f32 %v4672_v15, %v4657_v27 }
0x338f   :  { %4754 = vrot.lane.b32.xlu1 %v4674_v61, %s7220_s3 }
0x3401   :  { %v4755_v16 = vpop.permute.xlu1 %4754 }
0x3402   :  { %6757 = vmatmul.mubr.msk.f32.vlgmr.msra.gmra.mxu0 %vm285_vm2, %v4755_v16 }
0x3403   :  { %6771 = vmatpush3.msra.mxu0 %v8251_v43  ;;  %6778 = vmatprep.mubr.msk.f32.mxu0 %vm7218_vm0, %v7217_v0 }
0x3404   :  { %6772 = vmatprep.subr.mxu0 %v7217_v0 }
0x3405   :  { %6773 = vmatpush3.msra.mxu0 %v8254_v49 }
0x3406   :  { %6774 = vmatprep.subr.mxu0 %v7217_v0 }
0x3407   :  { %6775 = vmatpush3.msra.mxu0 %v8260_v50 }
0x3408   :  { %6776 = vmatprep.subr.mxu0 %v7217_v0 }
0x3409   :  { %6777 = vmatpush3.msra.mxu0 %v8264_v52 }
0x340a   :  { %6779 = vmatmul.mubr.msk.f32.vlgmr.msra.gmra.mxu0 %vm285_vm2, %v4755_v16  ;;  %6792 = vmatprep.subr.mxu0 %v7217_v0 }
0x340b   :  { %6793 = vmatpush3.msra.mxu0 %v8283_v6  ;;  %6800 = vmatprep.mubr.msk.f32.mxu0 %vm7218_vm0, %v7217_v0 }
0x340c   :  { %6794 = vmatprep.subr.mxu0 %v7217_v0 }
0x340d   :  { %6795 = vmatpush3.msra.mxu0 %v8288_v22 }
0x340e   :  { %6796 = vmatprep.subr.mxu0 %v7217_v0 }
0x340f   :  { %6797 = vmatpush3.msra.mxu0 %v8295_v23 }
0x3410   :  { %6798 = vmatprep.subr.mxu0 %v7217_v0 }
0x3411   :  { %6799 = vmatpush3.msra.mxu0 %v8302_v58 }
0x3412   :  { %6814 = vmatprep.subr.mxu0 %v7217_v0 }
0x34c2   :  { %v4824_v17 = vpop.f32.mrf.mxu0 }
0x34c3   :  { %v4825_v31 = vadd.f32 %v4824_v17, %v4749_v62 }
0x34c4   :  { %v6758_v18 = vpop.f32.mrf.mxu0 }
0x34c5   :  { %v4828_v32 = vadd.f32 %v8379_v12, %v4825_v31 }
0x34c7   :  { %7007 = vtanh.f32 %v4828_v32 }
0x34ca   :  { %v8382_v39 = vpop.f32.mrf.mxu0 }
0x34cc   :  { %v6780_v40 = vpop.f32.mrf.mxu0 }
0x34d4   :  { %v7008_v41 = vpop.eup %7007 }
0x34d5   :  { %4834 = vrot.lane.b32.xlu0 %v7008_v41, %s7219_s7  ;;  %v4830_v48 = vmul.f32 0.5, %v7008_v41 }
0x34d7   :  { %v4831_v24 = vadd.f32 0.5, %v4830_v48 }
0x34d9   :  { %v4832_v30 = vmul.f32 %v4831_v24, %v8277_v21  ;;  %v8420_v21 = vld [vmem:[#allocation10 + $0x18] sm:$0xff] }
0x3547   :  { %v4835_v25 = vpop.permute.xlu0 %4834 }
0x3548   :  { %v4837_v28 = vmul.f32 %v4835_v25, %v4831_v24 }
0x354a   :  { %4839 = vrot.lane.b32.xlu1 %v4837_v28, %s7220_s3 }
0x35bc   :  { %v4840_v53 = vpop.permute.xlu1 %4839 }
0x35bd   :  { %v8387_v55 = vadd.f32 %v4840_v53, %v4832_v30 }
0x35bf   :  { %7009 = vtanh.f32 %v8387_v55 }
0x35cc   :  { %v7010_v9 = vpop.eup %7009 }
0x35cd   :  { %4845 = vrot.lane.b32.xlu0 %v7010_v9, %s7219_s7 }
0x363f   :  { %v4846_v2 = vpop.permute.xlu0 %4845 }
0x3640   :  { %v4848_v19 = vmul.f32 %v4846_v2, %v4831_v24 }
0x3642   :  { %4854 = vrot.lane.b32.xlu1 %v4848_v19, %s7220_s3 }
0x36b4   :  { %v4855_v1 = vpop.permute.xlu1 %4854 }
0x36b5   :  { %6768 = vmatmul.mubr.msk.f32.vlgmr.msra.gmra.mxu1 %vm285_vm2, %v4855_v1  ;;  %6801 = vmatmul.mubr.msk.f32.vlgmr.msra.gmra.mxu0 %vm285_vm2, %v4855_v1 }
0x36b6   :  { %6782 = vmatpush3.msra.mxu1 %v8420_v21  ;;  %6789 = vmatprep.mubr.msk.f32.mxu1 %vm7218_vm0, %v7217_v0 }
0x36b7   :  { %6783 = vmatprep.subr.mxu1 %v7217_v0  ;;  %6815 = vmatpush3.msra.mxu0 %v8393_v56 }
0x36b8   :  { %6784 = vmatpush3.msra.mxu1 %v8424_v8  ;;  %6816 = vmatprep.subr.mxu0 %v7217_v0 }
0x36b9   :  { %6785 = vmatprep.subr.mxu1 %v7217_v0  ;;  %6817 = vmatpush3.msra.mxu0 %v8398_v63 }
0x36ba   :  { %6786 = vmatpush3.msra.mxu1 %v8430_v60  ;;  %6818 = vmatprep.subr.mxu0 %v7217_v0 }
0x36bb   :  { %6787 = vmatprep.subr.mxu1 %v7217_v0  ;;  %6819 = vmatpush3.msra.mxu0 %v8405_v4 }
0x36bc   :  { %6788 = vmatpush3.msra.mxu1 %v8436_v10  ;;  %6820 = vmatprep.subr.mxu0 %v7217_v0 }
0x36bd   :  { %6790 = vmatmul.mubr.msk.f32.vlgmr.msra.gmra.mxu1 %vm285_vm2, %v4855_v1  ;;  %6803 = vmatprep.subr.mxu1 %v7217_v0 }
0x36be   :  { %6804 = vmatpush3.msra.mxu1 %v8336_v36  ;;  %6811 = vmatprep.mubr.msk.f32.mxu1 %vm7218_vm0, %v7217_v0 }
0x36bf   :  { %6805 = vmatprep.subr.mxu1 %v7217_v0  ;;  %6821 = vmatpush3.msra.mxu0 %v8412_v38 }
0x36c0   :  { %6806 = vmatpush3.msra.mxu1 %v8338_v51  ;;  %6822 = vmatprep.mubr.msk.f32.mxu0 %vm7218_vm0, %v7217_v0 }
0x36c1   :  { %6807 = vmatprep.subr.mxu1 %v7217_v0  ;;  %6836 = vmatprep.subr.mxu0 %v7217_v0 }
0x36c2   :  { %6808 = vmatpush3.msra.mxu1 %v8342_v37 }
0x36c3   :  { %6809 = vmatprep.subr.mxu1 %v7217_v0 }
0x36c4   :  { %6810 = vmatpush3.msra.mxu1 %v8346_v14 }
0x36c5   :  { %6825 = vmatprep.subr.mxu1 %v7217_v0 }
0x3775   :  { %v8461_v62 = vpop.f32.mrf.mxu1  ;;  %v5177_v54 = vpop.f32.mrf.mxu0 }
0x3777   :  { %v6769_v44 = vpop.f32.mrf.mxu1  ;;  %v6802_v3 = vpop.f32.mrf.mxu0 }
0x377d   :  { %v5078_v5 = vpop.f32.mrf.mxu1 }
0x377e   :  { %v5079_v7 = vadd.f32 %v5078_v5, %v8382_v39 }
0x377f   :  { %v6791_v45 = vpop.f32.mrf.mxu1 }
0x3780   :  { %v5082_v46 = vadd.f32 %v8464_v26, %v5079_v7 }
0x3782   :  { %7011 = vtanh.f32 %v5082_v46 }
0x378f   :  { %v7012_v27 = vpop.eup %7011 }
0x3790   :  { %5088 = vrot.lane.b32.xlu0 %v7012_v27, %s7219_s7  ;;  %v5084_v11 = vmul.f32 0.5, %v7012_v27 }
0x3792   :  { %v5085_v13 = vadd.f32 0.5, %v5084_v11 }
0x3794   :  { %v5086_v29 = vmul.f32 %v5085_v13, %v8333_v59 }
0x3802   :  { %v5089_v34 = vpop.permute.xlu0 %5088 }
0x3803   :  { %v5091_v35 = vmul.f32 %v5089_v34, %v5085_v13 }
0x3805   :  { %5093 = vrot.lane.b32.xlu1 %v5091_v35, %s7220_s3 }
0x3877   :  { %v5094_v15 = vpop.permute.xlu1 %5093 }
0x3878   :  { %v8470_v61 = vadd.f32 %v5094_v15, %v5086_v29 }
0x387a   :  { %7013 = vtanh.f32 %v8470_v61 }
0x3887   :  { %v7014_v16 = vpop.eup %7013 }
0x3888   :  { %5099 = vrot.lane.b32.xlu0 %v7014_v16, %s7219_s7 }
0x38fa   :  { %v5100_v17 = vpop.permute.xlu0 %5099 }
0x38fb   :  { %v5102_v31 = vmul.f32 %v5100_v17, %v5085_v13 }
0x38fd   :  { %5182 = vrot.lane.b32.xlu1 %v5102_v31, %s7220_s3 }
0x396f   :  { %v5183_v18 = vpop.permute.xlu1 %5182 }
0x3970   :  { %6812 = vmatmul.mubr.msk.f32.vlgmr.msra.gmra.mxu1 %vm285_vm2, %v5183_v18 }
0x3971   :  { %6826 = vmatpush3.msra.mxu1 %v8251_v43  ;;  %6833 = vmatprep.mubr.msk.f32.mxu1 %vm7218_vm0, %v7217_v0 }
0x3972   :  { %6827 = vmatprep.subr.mxu1 %v7217_v0 }
0x3973   :  { %6828 = vmatpush3.msra.mxu1 %v8254_v49 }
0x3974   :  { %6829 = vmatprep.subr.mxu1 %v7217_v0 }
0x3975   :  { %6830 = vmatpush3.msra.mxu1 %v8260_v50 }
0x3976   :  { %6831 = vmatprep.subr.mxu1 %v7217_v0 }
0x3977   :  { %6832 = vmatpush3.msra.mxu1 %v8264_v52 }
0x3978   :  { %6834 = vmatmul.mubr.msk.f32.vlgmr.msra.gmra.mxu1 %vm285_vm2, %v5183_v18  ;;  %6847 = vmatprep.subr.mxu1 %v7217_v0 }
0x3979   :  { %6848 = vmatpush3.msra.mxu1 %v8283_v6  ;;  %6855 = vmatprep.mubr.msk.f32.mxu1 %vm7218_vm0, %v7217_v0 }
0x397a   :  { %6849 = vmatprep.subr.mxu1 %v7217_v0 }
0x397b   :  { %6850 = vmatpush3.msra.mxu1 %v8288_v22 }
0x397c   :  { %6851 = vmatprep.subr.mxu1 %v7217_v0 }
0x397d   :  { %6852 = vmatpush3.msra.mxu1 %v8295_v23 }
0x397e   :  { %6853 = vmatprep.subr.mxu1 %v7217_v0 }
0x397f   :  { %6854 = vmatpush3.msra.mxu1 %v8302_v58 }
0x3980   :  { %6869 = vmatprep.subr.mxu1 %v7217_v0 }
0x3a30   :  { %v5252_v43 = vpop.f32.mrf.mxu1 }
0x3a31   :  { %v5253_v49 = vadd.f32 %v5252_v43, %v5177_v54 }
0x3a32   :  { %v6813_v50 = vpop.f32.mrf.mxu1 }
0x3a33   :  { %v5256_v52 = vadd.f32 %v8379_v12, %v5253_v49 }
0x3a35   :  { %7015 = vtanh.f32 %v5256_v52 }
0x3a38   :  { %v5436_v6 = vpop.f32.mrf.mxu1 }
0x3a3a   :  { %v6835_v59 = vpop.f32.mrf.mxu1 }
0x3a42   :  { %v7016_v32 = vpop.eup %7015 }
0x3a43   :  { %5262 = vrot.lane.b32.xlu0 %v7016_v32, %s7219_s7  ;;  %v5258_v22 = vmul.f32 0.5, %v7016_v32 }
0x3a45   :  { %v5259_v39 = vadd.f32 0.5, %v5258_v22 }
0x3a47   :  { %v5260_v58 = vmul.f32 %v5259_v39, %v8387_v55 }
0x3ab5   :  { %v5263_v23 = vpop.permute.xlu0 %5262 }
0x3ab6   :  { %v5265_v40 = vmul.f32 %v5263_v23, %v5259_v39 }
0x3ab8   :  { %5267 = vrot.lane.b32.xlu1 %v5265_v40, %s7220_s3 }
0x3b2a   :  { %v5268_v41 = vpop.permute.xlu1 %5267 }
0x3b2b   :  { %v8501_v48 = vadd.f32 %v5268_v41, %v5260_v58 }
0x3b2d   :  { %7017 = vtanh.f32 %v8501_v48 }
0x3b3a   :  { %v7018_v24 = vpop.eup %7017 }
0x3b3b   :  { %5273 = vrot.lane.b32.xlu0 %v7018_v24, %s7219_s7 }
0x3bad   :  { %v5274_v25 = vpop.permute.xlu0 %5273 }
0x3bae   :  { %v5276_v28 = vmul.f32 %v5274_v25, %v5259_v39 }
0x3bb0   :  { %5282 = vrot.lane.b32.xlu1 %v5276_v28, %s7220_s3 }
0x3c22   :  { %v5283_v30 = vpop.permute.xlu1 %5282 }
0x3c23   :  { %6823 = vmatmul.mubr.msk.f32.vlgmr.msra.gmra.mxu0 %vm285_vm2, %v5283_v30  ;;  %6856 = vmatmul.mubr.msk.f32.vlgmr.msra.gmra.mxu1 %vm285_vm2, %v5283_v30 }
0x3c24   :  { %6837 = vmatpush3.msra.mxu0 %v8420_v21  ;;  %6844 = vmatprep.mubr.msk.f32.mxu0 %vm7218_vm0, %v7217_v0 }
0x3c25   :  { %6838 = vmatprep.subr.mxu0 %v7217_v0  ;;  %6870 = vmatpush3.msra.mxu1 %v8393_v56 }
0x3c26   :  { %6839 = vmatpush3.msra.mxu0 %v8424_v8  ;;  %6871 = vmatprep.subr.mxu1 %v7217_v0 }
0x3c27   :  { %6840 = vmatprep.subr.mxu0 %v7217_v0  ;;  %6872 = vmatpush3.msra.mxu1 %v8398_v63 }
0x3c28   :  { %6841 = vmatpush3.msra.mxu0 %v8430_v60  ;;  %6873 = vmatprep.subr.mxu1 %v7217_v0 }
0x3c29   :  { %6842 = vmatprep.subr.mxu0 %v7217_v0  ;;  %6874 = vmatpush3.msra.mxu1 %v8405_v4 }
0x3c2a   :  { %6843 = vmatpush3.msra.mxu0 %v8436_v10  ;;  %6875 = vmatprep.subr.mxu1 %v7217_v0 }
0x3c2b   :  { %6845 = vmatmul.mubr.msk.f32.vlgmr.msra.gmra.mxu0 %vm285_vm2, %v5283_v30  ;;  %6858 = vmatprep.subr.mxu0 %v7217_v0 }
0x3c2c   :  { %6859 = vmatpush3.msra.mxu0 %v8336_v36  ;;  %6866 = vmatprep.mubr.msk.f32.mxu0 %vm7218_vm0, %v7217_v0 }
0x3c2d   :  { %6860 = vmatprep.subr.mxu0 %v7217_v0  ;;  %6876 = vmatpush3.msra.mxu1 %v8412_v38 }
0x3c2e   :  { %6861 = vmatpush3.msra.mxu0 %v8338_v51  ;;  %6877 = vmatprep.mubr.msk.f32.mxu1 %vm7218_vm0, %v7217_v0 }
0x3c2f   :  { %6862 = vmatprep.subr.mxu0 %v7217_v0 }
0x3c30   :  { %6863 = vmatpush3.msra.mxu0 %v8342_v37 }
0x3c31   :  { %6864 = vmatprep.subr.mxu0 %v7217_v0 }
0x3c32   :  { %6865 = vmatpush3.msra.mxu0 %v8346_v14 }
0x3ce3   :  { %v5352_v36 = vpop.f32.mrf.mxu0  ;;  %v5605_v53 = vpop.f32.mrf.mxu1 }
0x3ce5   :  { %v6824_v55 = vpop.f32.mrf.mxu0  ;;  %v6857_v56 = vpop.f32.mrf.mxu1 }
0x3ceb   :  { %v5506_v63 = vpop.f32.mrf.mxu0 }
0x3cec   :  { %v5507_v4 = vadd.f32 %v5506_v63, %v5436_v6 }
0x3ced   :  { %v6846_v38 = vpop.f32.mrf.mxu0 }
0x3cee   :  { %v5510_v51 = vadd.f32 %v8464_v26, %v5507_v4 }
0x3cf0   :  { %7019 = vtanh.f32 %v5510_v51 }
0x3cfd   :  { %v7020_v9 = vpop.eup %7019 }
0x3cfe   :  { %5516 = vrot.lane.b32.xlu0 %v7020_v9, %s7219_s7  ;;  %v5512_v2 = vmul.f32 0.5, %v7020_v9 }
0x3d00   :  { %v5513_v19 = vadd.f32 0.5, %v5512_v2 }
0x3d02   :  { %v5514_v0 = vmul.f32 %v5513_v19, %v8470_v61 }
0x3d70   :  { %v5517_v37 = vpop.permute.xlu0 %5516 }
0x3d71   :  { %v5519_v21 = vmul.f32 %v5517_v37, %v5513_v19 }
0x3d73   :  { %5521 = vrot.lane.b32.xlu1 %v5519_v21, %s7220_s3 }
0x3de5   :  { %v5522_v14 = vpop.permute.xlu1 %5521 }
0x3de6   :  { %v5524_v1 = vadd.f32 %v5522_v14, %v5514_v0 }
0x3de8   :  { %7021 = vtanh.f32 %v5524_v1 }
0x3df5   :  { %v7022_v8 = vpop.eup %7021 }
0x3df6   :  { %5527 = vrot.lane.b32.xlu0 %v7022_v8, %s7219_s7 }
0x3e68   :  { %v5528_v60 = vpop.permute.xlu0 %5527 }
0x3e69   :  { %v5530_v10 = vmul.f32 %v5528_v60, %v5513_v19 }
0x3e6b   :  { %5610 = vrot.lane.b32.xlu1 %v5530_v10, %s7220_s3 }
0x3edd   :  { %v5611_v54 = vpop.permute.xlu1 %5610 }
0x3ede   :  { %6867 = vmatmul.mubr.msk.f32.vlgmr.msra.gmra.mxu0 %vm285_vm2, %v5611_v54 }
0x3f9e   :  { %v5680_v44 = vpop.f32.mrf.mxu0 }
0x3f9f   :  { %v5681_v3 = vadd.f32 %v5680_v44, %v5605_v53 }
0x3fa0   :  { %v6868_v5 = vpop.f32.mrf.mxu0 }
0x3fa1   :  { %v5684_v7 = vadd.f32 %v8379_v12, %v5681_v3  ;;  %v5799_v12 = vld [vmem:[%s8601_s15] ss:$0 sm:$0xff] }
0x3fa2   :  { %v2785_v15 = vadd.f32 %v5799_v12, %v8012_v47  ;;  %v3641_v61 = vadd.f32 %v5799_v12, %v8165_v20  ;;  %v4497_v16 = vadd.f32 %v5799_v12, %v8327_v42  ;;  %v5353_v17 = vadd.f32 %v5799_v12, %v5352_v36 }
0x3fa3   :  { %7023 = vtanh.f32 %v5684_v7  ;;  %v3213_v47 = vadd.f32 %v5799_v12, %v8090_v33  ;;  %v4069_v20 = vadd.f32 %v5799_v12, %v8240_v57  ;;  %v4925_v42 = vadd.f32 %v5799_v12, %v8461_v62 }
0x3fb0   :  { %v7024_v45 = vpop.eup %7023 }
0x3fb1   :  { %5690 = vrot.lane.b32.xlu0 %v7024_v45, %s7219_s7  ;;  %v5686_v26 = vmul.f32 0.5, %v7024_v45 }
0x3fb3   :  { %v5687_v46 = vadd.f32 0.5, %v5686_v26 }
0x3fb5   :  { %v5688_v13 = vmul.f32 %v5687_v46, %v8501_v48 }
0x4023   :  { %v5691_v27 = vpop.permute.xlu0 %5690 }
0x4024   :  { %v5693_v11 = vmul.f32 %v5691_v27, %v5687_v46 }
0x4026   :  { %5695 = vrot.lane.b32.xlu1 %v5693_v11, %s7220_s3 }
0x4098   :  { %v5696_v34 = vpop.permute.xlu1 %5695 }
0x4099   :  { %v5698_v35 = vadd.f32 %v5696_v34, %v5688_v13 }
0x409b   :  { %7025 = vtanh.f32 %v5698_v35 }
0x40a8   :  { %v7026_v29 = vpop.eup %7025 }
0x40a9   :  { %5701 = vrot.lane.b32.xlu0 %v7026_v29, %s7219_s7 }
0x40ad   :  { %2789 = vrot.lane.b32.xlu0 %v2785_v15, %s7221_s18 }
0x40b1   :  { %3645 = vrot.lane.b32.xlu0 %v3641_v61, %s7222_s19 }
0x40b5   :  { %4501 = vrot.lane.b32.xlu0 %v4497_v16, %s7223_s5 }
0x40b9   :  { %5357 = vrot.lane.b32.xlu0 %v5353_v17, %s7209_s25  ;;  %s7225_s25 = smov 16  }
0x411b   :  { %v5702_v31 = vpop.permute.xlu0 %5701 }
0x411c   :  { %v5704_v18 = vmul.f32 %v5702_v31, %v5687_v46 }
0x411e   :  { %5710 = vrot.lane.b32.xlu1 %v5704_v18, %s7220_s3 }
0x411f   :  { %v2790_v43 = vpop.permute.xlu0 %2789 }
0x4120   :  { %2793 = vst.msk [vmem:[%s8602_s16] sm:$0x3] %vm2792_vm3, %v2790_v43 }
0x4122   :  { %3217 = vrot.lane.b32.xlu1 %v3213_v47, %s7224_s20 }
0x4123   :  { %v3646_v50 = vpop.permute.xlu0 %3645 }
0x4126   :  { %4073 = vrot.lane.b32.xlu1 %v4069_v20, %s7220_s3 }
0x4127   :  { %v4502_v57 = vpop.permute.xlu0 %4501 }
0x412a   :  { %4929 = vrot.lane.b32.xlu1 %v4925_v42, %s7225_s25 }
0x412b   :  { %v5358_v6 = vpop.permute.xlu0 %5357 }
0x4190   :  { %v5711_v49 = vpop.permute.xlu1 %5710 }
0x4191   :  { %6878 = vmatmul.mubr.msk.f32.vlgmr.msra.gmra.mxu1 %vm285_vm2, %v5711_v49 }
0x4194   :  { %v3218_v33 = vpop.permute.xlu1 %3217 }
0x4195   :  { %3221 = vst.msk [vmem:[%s8602_s16] sm:$0x3] %vm3220_vm4, %v3218_v33 }
0x4196   :  { %3649 = vst.msk [vmem:[%s8602_s16] sm:$0x3] %vm3648_vm5, %v3646_v50 }
0x4198   :  { %v4074_v62 = vpop.permute.xlu1 %4073 }
0x4199   :  { %4077 = vst.msk [vmem:[%s8602_s16] sm:$0x3] %vm4076_vm6, %v4074_v62 }
0x419a   :  { %4505 = vst.msk [vmem:[%s8602_s16] sm:$0x3] %vm4504_vm7, %v4502_v57 }
0x419c   :  { %v4930_v52 = vpop.permute.xlu1 %4929 }
0x419d   :  { %4933 = vst.msk [vmem:[%s8602_s16] sm:$0x3] %vm4932_vm8, %v4930_v52 }
0x419e   :  { %5361 = vst.msk [vmem:[%s8602_s16] sm:$0x3] %vm5360_vm9, %v5358_v6 }
0x4251   :  { %v5780_v59 = vpop.f32.mrf.mxu1 }
0x4252   :  { %v5781_v32 = vadd.f32 %v5799_v12, %v5780_v59 }
0x4253   :  { %v6879_v22 = vpop.f32.mrf.mxu1 }
0x4254   :  { %5785 = vst.msk [vmem:[%s8602_s16] sm:$0x3] %vm5784_vm10, %v5781_v32 }
0x4255   :  { %5790 = vsyncpa [#allocation3], 1 }
0x4256   :  { %5791 = vsyncpa [#allocation5], 1 }
0x4257   :  { %5792 = vsyncpa [#allocation8], 1 }
0x4258   :  { %5793 = vsyncpa [#allocation11], 1 }
0x4259   :  { %5794 = vsyncpa [#allocation14], 1 }

</bundles_post_ra>
